<compile_context>
chip_gen: v7x
topology: tpu7x:2x2x1
jax: 0.10.0
libtpu: 0.0.40
codegen_flags: <defaults>
</compile_context>

<pallas_src>
from functools import partial

import numpy as np
import jax
import jax.numpy as jnp
from jax.experimental import pallas as pl
from jax.experimental.pallas import tpu as pltpu

# --- tiny Mistral-like config (synthetic, deterministic) ---------------------
VOCAB = 128          # vocab size
D = 64               # hidden size
H = 4                # attention heads
HD = D // H          # head dim
HH = H * HD          # = D
INTER = 128          # MLP intermediate size
N_LAYERS = 2
EPS = 1e-6
EOS_ID = 2           # tokenizer.eos_token_id (also used as pad, as in the module)
MODEL_MAX_LEN = 16   # training_args.model_max_length
ROPE_THETA = 10000.0


# ----------------------------- kernel helpers --------------------------------
def _rms_norm(x, w):
    # x: (T, D) f32, w: (1, D) f32
    var = jnp.mean(x * x, axis=-1, keepdims=True)
    return (x * jax.lax.rsqrt(var + EPS)) * w


# ------------------------------- fused kernel --------------------------------
def fused_forward_kernel(x_ref, cos_ref, sin_ref, bias_ref,
                         ln1_ref, wqkv_ref, wo_ref, ln2_ref, wgu_ref, wd_ref,
                         lnf_ref, wlm_ref, out_ref):
    """All decoder layers + final norm + LM head for one block of the batch."""
    x = x_ref[...].astype(jnp.float32)                 # (T, D)
    bf16 = jnp.bfloat16

    # Loop-invariant, lane-dense tables (precomputed on host, hoisted here).
    cos = cos_ref[...]                                  # (T, H*HD) f32
    sin = sin_ref[...]                                  # (T, H*HD) f32
    bias = bias_ref[...][None]                          # (1, T, T)  f32 additive mask

    def split_heads(t):                                 # (T, H*HD) -> (H, T, HD)
        return jnp.stack([t[:, h * HD:(h + 1) * HD] for h in range(H)], axis=0)

    # Static unroll over layers (N_LAYERS is tiny); weights stay VMEM-resident
    # and are indexed statically along the stacked leading axis.
    for l in range(N_LAYERS):
        # ---- self attention ----
        hn = _rms_norm(x, ln1_ref[l]).astype(bf16)      # (T, D)

        # One lane-dense projection for q | rot(q) | k | rot(k) | v.
        # rotate_half + 1/sqrt(HD) are folded into the weights (host-side).
        qkv = jnp.dot(hn, wqkv_ref[l],
                      preferred_element_type=jnp.float32)   # (T, 5*HH)
        q, qr = qkv[:, 0 * HH:1 * HH], qkv[:, 1 * HH:2 * HH]
        k, kr = qkv[:, 2 * HH:3 * HH], qkv[:, 3 * HH:4 * HH]
        v = qkv[:, 4 * HH:5 * HH]

        # RoPE: pure full-tile elementwise math on lane-dense tensors.
        qe = (q * cos + qr * sin).astype(bf16)
        ke = (k * cos + kr * sin).astype(bf16)

        qh = split_heads(qe)                             # (H, T, HD) bf16
        kh = split_heads(ke)
        vh = split_heads(v.astype(bf16))

        scores = jnp.einsum('hqe,hke->hqk', qh, kh,
                            preferred_element_type=jnp.float32) + bias  # (H,T,T)
        m = jnp.max(scores, axis=-1, keepdims=True)
        p = jnp.exp(scores - m)
        denom = jnp.sum(p, axis=-1, keepdims=True)
        p = (p * pl.reciprocal(denom, approx=True)).astype(bf16)

        ctxh = jnp.einsum('hqk,hke->hqe', p, vh,
                          preferred_element_type=jnp.float32)           # (H,T,HD)
        # Merge heads along lanes -> single lane-dense output projection.
        ctx = jnp.concatenate([ctxh[h] for h in range(H)], axis=-1)     # (T, HH)
        x = x + jnp.dot(ctx.astype(bf16), wo_ref[l],
                        preferred_element_type=jnp.float32)

        # ---- SwiGLU MLP (gate+up fused into one matmul) ----
        h2 = _rms_norm(x, ln2_ref[l]).astype(bf16)
        gu = jnp.dot(h2, wgu_ref[l],
                     preferred_element_type=jnp.float32)                # (T, 2*INTER)
        g, u = gu[:, :INTER], gu[:, INTER:]
        act = (g * jax.nn.sigmoid(g)) * u                               # SiLU(g)*u, f32
        x = x + jnp.dot(act.astype(bf16), wd_ref[l],
                        preferred_element_type=jnp.float32)

    # ---- final RMSNorm + LM head (lane-dense VOCAB=128 output) ----
    hf = _rms_norm(x, lnf_ref[...]).astype(bf16)
    out_ref[...] = jnp.dot(hf, wlm_ref[...],
                           preferred_element_type=jnp.float32).astype(out_ref.dtype)


# --------------------------- pallas_call wrapper ------------------------------
def _replicated_spec(a):
    """Full-array, grid-invariant BlockSpec; single-buffered (index never moves)."""
    idx = lambda b: (0,) * a.ndim
    try:
        return pl.BlockSpec(a.shape, idx, pipeline_mode=pl.Buffered(1))
    except TypeError:  # older jax without pipeline_mode kwarg
        return pl.BlockSpec(a.shape, idx)


def run_fused_forward(x_blocks, w, cos, sin, bias):
    n_blocks, T, _ = x_blocks.shape
    reps = [cos, sin, bias, w["ln1"], w["wqkv"], w["wo"], w["ln2"],
            w["wgu"], w["wd"], w["lnf"], w["wlm"]]
    return pl.pallas_call(
        fused_forward_kernel,
        out_shape=jax.ShapeDtypeStruct((n_blocks, T, VOCAB), jnp.float32),
        grid=(n_blocks,),
        in_specs=[pl.BlockSpec((pl.Squeezed(), T, D), lambda b: (b, 0, 0))]
                 + [_replicated_spec(a) for a in reps],
        out_specs=pl.BlockSpec((pl.Squeezed(), T, VOCAB), lambda b: (b, 0, 0)),
        compiler_params=pltpu.CompilerParams(
            dimension_semantics=("parallel",)),
    )(x_blocks, *reps)


# ------------------------------ glue (plain JAX) ------------------------------
def init_params(key):
    keys = jax.random.split(key, 2 + N_LAYERS)
    params = {
        "embed": jax.random.normal(keys[0], (VOCAB, D), jnp.float32) * 0.02,
        "lnf": jnp.ones((1, D), jnp.float32),
        "wlm": jax.random.normal(keys[1], (D, VOCAB), jnp.float32) * 0.02,
        "layers": [],
    }
    for l in range(N_LAYERS):
        ks = jax.random.split(keys[2 + l], 7)
        params["layers"].append({
            "ln1": jnp.ones((1, D), jnp.float32),
            "ln2": jnp.ones((1, D), jnp.float32),
            "wq": jax.random.normal(ks[0], (D, D), jnp.float32) * 0.02,
            "wk": jax.random.normal(ks[1], (D, D), jnp.float32) * 0.02,
            "wv": jax.random.normal(ks[2], (D, D), jnp.float32) * 0.02,
            "wo": jax.random.normal(ks[3], (D, D), jnp.float32) * 0.02,
            "wg": jax.random.normal(ks[4], (D, INTER), jnp.float32) * 0.02,
            "wu": jax.random.normal(ks[5], (D, INTER), jnp.float32) * 0.02,
            "wd": jax.random.normal(ks[6], (INTER, D), jnp.float32) * 0.02,
        })
    return params


def _rotate_half_matrix():
    """R such that (q @ R) == HF rotate_half(q), applied per head block."""
    r = np.zeros((HD, HD), np.float32)
    half = HD // 2
    idx = np.arange(half)
    r[idx + half, idx] = -1.0   # out[:, j]        = -q[:, j + half]  (j <  half)
    r[idx, idx + half] = 1.0    # out[:, j + half] =  q[:, j]         (j >= half)
    Rf = np.zeros((D, D), np.float32)
    for h in range(H):
        Rf[h * HD:(h + 1) * HD, h * HD:(h + 1) * HD] = r
    return jnp.asarray(Rf)


def prepare_weights(params):
    """One-time weight prep: stack layers, fold rotate_half + 1/sqrt(HD) into
    the q/k projections, fuse q|qr|k|kr|v and gate|up into lane-dense slabs.

    NOTE: rotate_half-folded-into-weights doubles Q/K projection FLOPs; fine
    while the MXU has slack at toy sizes — switch to pltpu.roll at real HD."""
    R = _rotate_half_matrix()
    scale = 1.0 / (HD ** 0.5)
    bf16 = jnp.bfloat16

    def stack(name):
        return jnp.stack([lp[name] for lp in params["layers"]])

    wq = stack("wq") * scale                 # fold score scale into q proj
    wk = stack("wk")
    wqr = jnp.einsum('lde,ef->ldf', wq, R)   # rotate_half folded into weights
    wkr = jnp.einsum('lde,ef->ldf', wk, R)
    wv = stack("wv")

    return {
        "ln1": stack("ln1"),                                        # (L, 1, D) f32
        "ln2": stack("ln2"),
        "wqkv": jnp.concatenate([wq, wqr, wk, wkr, wv],
                                axis=-1).astype(bf16),              # (L, D, 5*HH)
        "wo": stack("wo").astype(bf16),                             # (L, HH, D)
        "wgu": jnp.concatenate([stack("wg"), stack("wu")],
                               axis=-1).astype(bf16),               # (L, D, 2*INTER)
        "wd": stack("wd").astype(bf16),                             # (L, INTER, D)
        "lnf": params["lnf"],                                       # (1, D) f32
        "wlm": params["wlm"].astype(bf16),                          # (D, VOCAB)
    }


def rope_tables(seq_len):
    inv_freq = 1.0 / (ROPE_THETA ** (jnp.arange(0, HD, 2, dtype=jnp.float32) / HD))
    pos = jnp.arange(seq_len, dtype=jnp.float32)
    freqs = pos[:, None] * inv_freq[None, :]            # (S, HD/2)
    emb = jnp.concatenate([freqs, freqs], axis=-1)      # (S, HD)
    return jnp.cos(emb), jnp.sin(emb)


def block_causal_bias(nb, s):
    """Additive f32 mask for nb examples folded along sublanes: causal within
    each example, -1e30 across examples (prevents cross-example attention)."""
    t = nb * s
    idx = np.arange(t)
    blk = idx // s
    ok = (idx[:, None] >= idx[None, :]) & (blk[:, None] == blk[None, :])
    return jnp.asarray(np.where(ok, 0.0, -1e30).astype(np.float32))


def _num_tensorcores_per_chip():
    try:
        kind = jax.devices()[0].device_kind.lower()
    except Exception:
        return 1
    return 2 if any(t in kind for t in ("v7", "v5p", "v4")) else 1


def build_batch(data_tok, input_tok, prompt_tok):
    """Reproduce the token-id assembly / padding / mask logic of forward()."""
    prompt_output = [p + [EOS_ID] if len(p) < MODEL_MAX_LEN else p[:MODEL_MAX_LEN]
                     for p in data_tok]
    input_tokens = [t[:MODEL_MAX_LEN] for t in input_tok]
    prompt_input = prompt_tok

    prompt_ids = [a + b + c for a, b, c in
                  zip(input_tokens, prompt_input, prompt_output)]
    prompt_mask = [[False] * (len(a) + len(b) - 1) + [True] * len(c) + [False]
                   for a, b, c in zip(input_tokens, prompt_input, prompt_output)]

    answer_prompt = jnp.array(sum(prompt_output, []), dtype=jnp.int32)

    max_len = max(len(p) for p in prompt_ids)
    pad_id = EOS_ID  # pad_token = eos_token, as set in MistralHelper.__init__
    ids = jnp.array([p + [pad_id] * (max_len - len(p)) for p in prompt_ids],
                    dtype=jnp.int32)
    target_mask = jnp.array([m + [False] * (max_len - len(m)) for m in prompt_mask],
                            dtype=jnp.bool_)
    return ids, target_mask, answer_prompt


@partial(jax.jit, static_argnames=("n_blocks",))
def _device_forward(embed, w, ids_pad, cos, sin, bias, n_blocks):
    x = embed[ids_pad].astype(jnp.float32)         # embed_tokens gather (glue)
    B, S_pad, _ = x.shape
    xb = x.reshape(n_blocks, (B // n_blocks) * S_pad, D)
    out = run_fused_forward(xb, w, cos, sin, bias)  # single fused Pallas kernel
    return out.reshape(B, S_pad, VOCAB)


def mistral_helper_forward(params, prepared, data_tok, input_tok, prompt_tok):
    prompt_answer_ids, target_mask, answer_prompt = build_batch(
        data_tok, input_tok, prompt_tok)
    B, S = prompt_answer_ids.shape

    # Pad seq to a multiple of 16 sublanes (bf16 packing).  Padded positions
    # come after real tokens, so causal attention leaves real-token logits
    # unchanged; the extra rows are sliced off below.
    S_pad = max(16, -(-S // 16) * 16)
    ids_pad = jnp.pad(prompt_answer_ids, ((0, 0), (0, S_pad - S)),
                      constant_values=EOS_ID)

    # Fold the batch into the sublane axis: one grid step on single-TC chips
    # (v5e/v6e), otherwise split B across TensorCores via the "parallel" grid.
    n_tc = _num_tensorcores_per_chip()
    n_blocks = n_tc if (n_tc > 1 and B % n_tc == 0) else 1
    nb = B // n_blocks

    cos_hd, sin_hd = rope_tables(S_pad)                      # (S_pad, HD)
    cos = jnp.tile(jnp.tile(cos_hd, (1, H)), (nb, 1))        # (nb*S_pad, H*HD)
    sin = jnp.tile(jnp.tile(sin_hd, (1, H)), (nb, 1))
    bias = block_causal_bias(nb, S_pad)                      # (nb*S_pad, nb*S_pad)

    logits = _device_forward(params["embed"], prepared, ids_pad, cos, sin, bias,
                             n_blocks=n_blocks)
    return logits[:, :S, :], answer_prompt, target_mask


# ------------------------------------ main ------------------------------------
if __name__ == "__main__":
    key = jax.random.PRNGKey(0)
    params = init_params(key)
    prepared = prepare_weights(params)

    # TODO(synk): SentencePiece string tokenization has no Pallas/JAX
    # equivalent; token ids are synthesized deterministically instead.
    data_tok = [[11, 12, 13], [21, 22]]           # "data" -> answer token ids
    input_tok = [[31, 32, 33, 34], [41, 42, 43]]  # "input" token ids
    prompt_tok = [[51], [52, 53]]                 # "prompt" token ids

    logits, answer_prompt, target_mask = mistral_helper_forward(
        params, prepared, data_tok, input_tok, prompt_tok)

    jax.block_until_ready(logits)
    jax.block_until_ready(answer_prompt)
    jax.block_until_ready(target_mask)

    assert logits.shape == (2, 9, VOCAB)
    assert answer_prompt.shape == (7,)
    assert target_mask.shape == (2, 9)
    print("KERNEL_OK")
</pallas_src>

<mosaic_0001>
module attributes {stable_mosaic.version = 11 : i64} {
  func.func @fused_forward_kernel(%arg0: i32, %arg1: memref<1x32x64xf32, #tpu.memory_space<vmem>>, %arg2: memref<32x64xf32, #tpu.memory_space<vmem>>, %arg3: memref<32x64xf32, #tpu.memory_space<vmem>>, %arg4: memref<32x32xf32, #tpu.memory_space<vmem>>, %arg5: memref<2x1x64xf32, #tpu.memory_space<vmem>>, %arg6: memref<2x64x320xbf16, #tpu.memory_space<vmem>>, %arg7: memref<2x64x64xbf16, #tpu.memory_space<vmem>>, %arg8: memref<2x1x64xf32, #tpu.memory_space<vmem>>, %arg9: memref<2x64x256xbf16, #tpu.memory_space<vmem>>, %arg10: memref<2x128x64xbf16, #tpu.memory_space<vmem>>, %arg11: memref<1x64xf32, #tpu.memory_space<vmem>>, %arg12: memref<64x128xbf16, #tpu.memory_space<vmem>>, %arg13: memref<1x32x128xf32, #tpu.memory_space<vmem>>) attributes {dimension_semantics = [#tpu.dimension_semantics<parallel>], iteration_bounds = array<i64: 1>, scalar_prefetch = 0 : i64, scratch_operands = 0 : i64, tpu.core_type = #tpu.core_type<tc>, window_params = [{transform_indices = @transform_0, window_bounds = array<i64: 1, 32, 64>}, {pipeline_mode = #tpu.pipeline_mode<synchronous>, transform_indices = @transform_1, window_bounds = array<i64: 32, 64>}, {pipeline_mode = #tpu.pipeline_mode<synchronous>, transform_indices = @transform_2, window_bounds = array<i64: 32, 64>}, {pipeline_mode = #tpu.pipeline_mode<synchronous>, transform_indices = @transform_3, window_bounds = array<i64: 32, 32>}, {pipeline_mode = #tpu.pipeline_mode<synchronous>, transform_indices = @transform_4, window_bounds = array<i64: 2, 1, 64>}, {pipeline_mode = #tpu.pipeline_mode<synchronous>, transform_indices = @transform_5, window_bounds = array<i64: 2, 64, 320>}, {pipeline_mode = #tpu.pipeline_mode<synchronous>, transform_indices = @transform_6, window_bounds = array<i64: 2, 64, 64>}, {pipeline_mode = #tpu.pipeline_mode<synchronous>, transform_indices = @transform_7, window_bounds = array<i64: 2, 1, 64>}, {pipeline_mode = #tpu.pipeline_mode<synchronous>, transform_indices = @transform_8, window_bounds = array<i64: 2, 64, 256>}, {pipeline_mode = #tpu.pipeline_mode<synchronous>, transform_indices = @transform_9, window_bounds = array<i64: 2, 128, 64>}, {pipeline_mode = #tpu.pipeline_mode<synchronous>, transform_indices = @transform_10, window_bounds = array<i64: 1, 64>}, {pipeline_mode = #tpu.pipeline_mode<synchronous>, transform_indices = @transform_11, window_bounds = array<i64: 64, 128>}, {transform_indices = @transform_12, window_bounds = array<i64: 1, 32, 128>}]} {
    %c0 = arith.constant 0 : index
    %c0_0 = arith.constant 0 : index
    %c0_1 = arith.constant 0 : index
    %0 = vector.load %arg1[%c0, %c0_0, %c0_1] : memref<1x32x64xf32, #tpu.memory_space<vmem>>, vector<1x32x64xf32>
    %1 = vector.shape_cast %0 : vector<1x32x64xf32> to vector<32x64xf32>
    %c0_2 = arith.constant 0 : index
    %c0_3 = arith.constant 0 : index
    %2 = vector.load %arg2[%c0_2, %c0_3] : memref<32x64xf32, #tpu.memory_space<vmem>>, vector<32x64xf32>
    %c0_4 = arith.constant 0 : index
    %c0_5 = arith.constant 0 : index
    %3 = vector.load %arg3[%c0_4, %c0_5] : memref<32x64xf32, #tpu.memory_space<vmem>>, vector<32x64xf32>
    %c0_6 = arith.constant 0 : index
    %c0_7 = arith.constant 0 : index
    %4 = vector.load %arg4[%c0_6, %c0_7] : memref<32x32xf32, #tpu.memory_space<vmem>>, vector<32x32xf32>
    %5 = vector.shape_cast %4 : vector<32x32xf32> to vector<1x32x32xf32>
    %c0_8 = arith.constant 0 : index
    %c0_9 = arith.constant 0 : index
    %c0_10 = arith.constant 0 : index
    %6 = vector.load %arg5[%c0_8, %c0_9, %c0_10] : memref<2x1x64xf32, #tpu.memory_space<vmem>>, vector<1x1x64xf32>
    %7 = vector.shape_cast %6 : vector<1x1x64xf32> to vector<1x64xf32>
    %8 = arith.mulf %1, %1 : vector<32x64xf32>
    %cst = arith.constant dense<0.000000e+00> : vector<32xf32>
    %9 = vector.multi_reduction <add>, %8, %cst [1] : vector<32x64xf32> to vector<32xf32>
    %10 = vector.shape_cast %9 : vector<32xf32> to vector<32x1xf32>
    %cst_11 = arith.constant 6.400000e+01 : f32
    %11 = vector.broadcast %cst_11 : f32 to vector<32x1xf32>
    %12 = arith.divf %10, %11 : vector<32x1xf32>
    %cst_12 = arith.constant 9.99999997E-7 : f32
    %13 = vector.broadcast %cst_12 : f32 to vector<32x1xf32>
    %14 = arith.addf %12, %13 : vector<32x1xf32>
    %15 = math.rsqrt %14 : vector<32x1xf32>
    %16 = vector.broadcast %15 : vector<32x1xf32> to vector<32x64xf32>
    %17 = arith.mulf %1, %16 : vector<32x64xf32>
    %18 = vector.broadcast %7 : vector<1x64xf32> to vector<32x64xf32>
    %19 = arith.mulf %17, %18 : vector<32x64xf32>
    %20 = arith.truncf %19 : vector<32x64xf32> to vector<32x64xbf16>
    %c0_13 = arith.constant 0 : index
    %c0_14 = arith.constant 0 : index
    %c0_15 = arith.constant 0 : index
    %21 = vector.load %arg6[%c0_13, %c0_14, %c0_15] : memref<2x64x320xbf16, #tpu.memory_space<vmem>>, vector<1x64x320xbf16>
    %22 = vector.shape_cast %21 : vector<1x64x320xbf16> to vector<64x320xbf16>
    %cst_16 = arith.constant dense<0.000000e+00> : vector<32x320xf32>
    %23 = tpu.matmul %20, %22, %cst_16 {dimension_numbers = #tpu.dot_dimension_numbers<[1], [0], [0], [1], [0, 0, 1, 1], [], []>} : vector<32x64xbf16>, vector<64x320xbf16>, vector<32x320xf32> -> vector<32x320xf32>
    %24 = vector.extract_strided_slice %23 {offsets = [0, 0], sizes = [32, 64], strides = [1, 1]} : vector<32x320xf32> to vector<32x64xf32>
    %25 = vector.extract_strided_slice %23 {offsets = [0, 64], sizes = [32, 64], strides = [1, 1]} : vector<32x320xf32> to vector<32x64xf32>
    %26 = vector.extract_strided_slice %23 {offsets = [0, 128], sizes = [32, 64], strides = [1, 1]} : vector<32x320xf32> to vector<32x64xf32>
    %27 = vector.extract_strided_slice %23 {offsets = [0, 192], sizes = [32, 64], strides = [1, 1]} : vector<32x320xf32> to vector<32x64xf32>
    %28 = vector.extract_strided_slice %23 {offsets = [0, 256], sizes = [32, 64], strides = [1, 1]} : vector<32x320xf32> to vector<32x64xf32>
    %29 = arith.mulf %24, %2 : vector<32x64xf32>
    %30 = arith.mulf %25, %3 : vector<32x64xf32>
    %31 = arith.addf %29, %30 : vector<32x64xf32>
    %32 = arith.truncf %31 : vector<32x64xf32> to vector<32x64xbf16>
    %33 = arith.mulf %26, %2 : vector<32x64xf32>
    %34 = arith.mulf %27, %3 : vector<32x64xf32>
    %35 = arith.addf %33, %34 : vector<32x64xf32>
    %36 = arith.truncf %35 : vector<32x64xf32> to vector<32x64xbf16>
    %37 = vector.extract_strided_slice %32 {offsets = [0, 0], sizes = [32, 16], strides = [1, 1]} : vector<32x64xbf16> to vector<32x16xbf16>
    %38 = vector.extract_strided_slice %32 {offsets = [0, 16], sizes = [32, 16], strides = [1, 1]} : vector<32x64xbf16> to vector<32x16xbf16>
    %39 = vector.extract_strided_slice %32 {offsets = [0, 32], sizes = [32, 16], strides = [1, 1]} : vector<32x64xbf16> to vector<32x16xbf16>
    %40 = vector.extract_strided_slice %32 {offsets = [0, 48], sizes = [32, 16], strides = [1, 1]} : vector<32x64xbf16> to vector<32x16xbf16>
    %41 = vector.shape_cast %37 : vector<32x16xbf16> to vector<1x32x16xbf16>
    %42 = vector.shape_cast %38 : vector<32x16xbf16> to vector<1x32x16xbf16>
    %43 = vector.shape_cast %39 : vector<32x16xbf16> to vector<1x32x16xbf16>
    %44 = vector.shape_cast %40 : vector<32x16xbf16> to vector<1x32x16xbf16>
    %45 = tpu.concatenate %41, %42, %43, %44 in 0 : vector<1x32x16xbf16>, vector<1x32x16xbf16>, vector<1x32x16xbf16>, vector<1x32x16xbf16> -> vector<4x32x16xbf16>
    %46 = vector.extract_strided_slice %36 {offsets = [0, 0], sizes = [32, 16], strides = [1, 1]} : vector<32x64xbf16> to vector<32x16xbf16>
    %47 = vector.extract_strided_slice %36 {offsets = [0, 16], sizes = [32, 16], strides = [1, 1]} : vector<32x64xbf16> to vector<32x16xbf16>
    %48 = vector.extract_strided_slice %36 {offsets = [0, 32], sizes = [32, 16], strides = [1, 1]} : vector<32x64xbf16> to vector<32x16xbf16>
    %49 = vector.extract_strided_slice %36 {offsets = [0, 48], sizes = [32, 16], strides = [1, 1]} : vector<32x64xbf16> to vector<32x16xbf16>
    %50 = vector.shape_cast %46 : vector<32x16xbf16> to vector<1x32x16xbf16>
    %51 = vector.shape_cast %47 : vector<32x16xbf16> to vector<1x32x16xbf16>
    %52 = vector.shape_cast %48 : vector<32x16xbf16> to vector<1x32x16xbf16>
    %53 = vector.shape_cast %49 : vector<32x16xbf16> to vector<1x32x16xbf16>
    %54 = tpu.concatenate %50, %51, %52, %53 in 0 : vector<1x32x16xbf16>, vector<1x32x16xbf16>, vector<1x32x16xbf16>, vector<1x32x16xbf16> -> vector<4x32x16xbf16>
    %55 = arith.truncf %28 : vector<32x64xf32> to vector<32x64xbf16>
    %56 = vector.extract_strided_slice %55 {offsets = [0, 0], sizes = [32, 16], strides = [1, 1]} : vector<32x64xbf16> to vector<32x16xbf16>
    %57 = vector.extract_strided_slice %55 {offsets = [0, 16], sizes = [32, 16], strides = [1, 1]} : vector<32x64xbf16> to vector<32x16xbf16>
    %58 = vector.extract_strided_slice %55 {offsets = [0, 32], sizes = [32, 16], strides = [1, 1]} : vector<32x64xbf16> to vector<32x16xbf16>
    %59 = vector.extract_strided_slice %55 {offsets = [0, 48], sizes = [32, 16], strides = [1, 1]} : vector<32x64xbf16> to vector<32x16xbf16>
    %60 = vector.shape_cast %56 : vector<32x16xbf16> to vector<1x32x16xbf16>
    %61 = vector.shape_cast %57 : vector<32x16xbf16> to vector<1x32x16xbf16>
    %62 = vector.shape_cast %58 : vector<32x16xbf16> to vector<1x32x16xbf16>
    %63 = vector.shape_cast %59 : vector<32x16xbf16> to vector<1x32x16xbf16>
    %64 = tpu.concatenate %60, %61, %62, %63 in 0 : vector<1x32x16xbf16>, vector<1x32x16xbf16>, vector<1x32x16xbf16>, vector<1x32x16xbf16> -> vector<4x32x16xbf16>
    "tpu.trace_start"() <{level = 10 : i32, message = "hqe,hke->hqk"}> : () -> ()
    %cst_17 = arith.constant dense<0.000000e+00> : vector<4x32x32xf32>
    %65 = tpu.matmul %45, %54, %cst_17 {dimension_numbers = #tpu.dot_dimension_numbers<[2], [2], [1], [1], [0, 0, 0, 1, 1, 1], [0], [0]>} : vector<4x32x16xbf16>, vector<4x32x16xbf16>, vector<4x32x32xf32> -> vector<4x32x32xf32>
    "tpu.trace_stop"() : () -> ()
    %66 = vector.broadcast %5 : vector<1x32x32xf32> to vector<4x32x32xf32>
    %67 = arith.addf %65, %66 : vector<4x32x32xf32>
    %cst_18 = arith.constant dense<0xFF800000> : vector<4x32xf32>
    %68 = vector.multi_reduction <maximumf>, %67, %cst_18 [2] : vector<4x32x32xf32> to vector<4x32xf32>
    %69 = vector.shape_cast %68 : vector<4x32xf32> to vector<4x32x1xf32>
    %70 = vector.broadcast %69 : vector<4x32x1xf32> to vector<4x32x32xf32>
    %71 = arith.subf %67, %70 : vector<4x32x32xf32>
    %72 = math.exp %71 : vector<4x32x32xf32>
    %cst_19 = arith.constant dense<0.000000e+00> : vector<4x32xf32>
    %73 = vector.multi_reduction <add>, %72, %cst_19 [2] : vector<4x32x32xf32> to vector<4x32xf32>
    %74 = vector.shape_cast %73 : vector<4x32xf32> to vector<4x32x1xf32>
    %75 = tpu.reciprocal %74 {approx = true} : vector<4x32x1xf32> -> vector<4x32x1xf32>
    %76 = vector.broadcast %75 : vector<4x32x1xf32> to vector<4x32x32xf32>
    %77 = arith.mulf %72, %76 : vector<4x32x32xf32>
    %78 = arith.truncf %77 : vector<4x32x32xf32> to vector<4x32x32xbf16>
    "tpu.trace_start"() <{level = 10 : i32, message = "hqk,hke->hqe"}> : () -> ()
    %cst_20 = arith.constant dense<0.000000e+00> : vector<4x32x16xf32>
    %79 = tpu.matmul %78, %64, %cst_20 {dimension_numbers = #tpu.dot_dimension_numbers<[2], [1], [1], [2], [0, 0, 0, 1, 1, 2], [0], [0]>} : vector<4x32x32xbf16>, vector<4x32x16xbf16>, vector<4x32x16xf32> -> vector<4x32x16xf32>
    "tpu.trace_stop"() : () -> ()
    %80 = vector.extract_strided_slice %79 {offsets = [0, 0, 0], sizes = [1, 32, 16], strides = [1, 1, 1]} : vector<4x32x16xf32> to vector<1x32x16xf32>
    %81 = vector.shape_cast %80 : vector<1x32x16xf32> to vector<32x16xf32>
    %82 = vector.extract_strided_slice %79 {offsets = [1, 0, 0], sizes = [1, 32, 16], strides = [1, 1, 1]} : vector<4x32x16xf32> to vector<1x32x16xf32>
    %83 = vector.shape_cast %82 : vector<1x32x16xf32> to vector<32x16xf32>
    %84 = vector.extract_strided_slice %79 {offsets = [2, 0, 0], sizes = [1, 32, 16], strides = [1, 1, 1]} : vector<4x32x16xf32> to vector<1x32x16xf32>
    %85 = vector.shape_cast %84 : vector<1x32x16xf32> to vector<32x16xf32>
    %86 = vector.extract_strided_slice %79 {offsets = [3, 0, 0], sizes = [1, 32, 16], strides = [1, 1, 1]} : vector<4x32x16xf32> to vector<1x32x16xf32>
    %87 = vector.shape_cast %86 : vector<1x32x16xf32> to vector<32x16xf32>
    %88 = tpu.concatenate %81, %83, %85, %87 in 1 : vector<32x16xf32>, vector<32x16xf32>, vector<32x16xf32>, vector<32x16xf32> -> vector<32x64xf32>
    %89 = arith.truncf %88 : vector<32x64xf32> to vector<32x64xbf16>
    %c0_21 = arith.constant 0 : index
    %c0_22 = arith.constant 0 : index
    %c0_23 = arith.constant 0 : index
    %90 = vector.load %arg7[%c0_21, %c0_22, %c0_23] : memref<2x64x64xbf16, #tpu.memory_space<vmem>>, vector<1x64x64xbf16>
    %91 = vector.shape_cast %90 : vector<1x64x64xbf16> to vector<64x64xbf16>
    %cst_24 = arith.constant dense<0.000000e+00> : vector<32x64xf32>
    %92 = tpu.matmul %89, %91, %cst_24 {dimension_numbers = #tpu.dot_dimension_numbers<[1], [0], [0], [1], [0, 0, 1, 1], [], []>} : vector<32x64xbf16>, vector<64x64xbf16>, vector<32x64xf32> -> vector<32x64xf32>
    %93 = arith.addf %1, %92 : vector<32x64xf32>
    %c0_25 = arith.constant 0 : index
    %c0_26 = arith.constant 0 : index
    %c0_27 = arith.constant 0 : index
    %94 = vector.load %arg8[%c0_25, %c0_26, %c0_27] : memref<2x1x64xf32, #tpu.memory_space<vmem>>, vector<1x1x64xf32>
    %95 = vector.shape_cast %94 : vector<1x1x64xf32> to vector<1x64xf32>
    %96 = arith.mulf %93, %93 : vector<32x64xf32>
    %cst_28 = arith.constant dense<0.000000e+00> : vector<32xf32>
    %97 = vector.multi_reduction <add>, %96, %cst_28 [1] : vector<32x64xf32> to vector<32xf32>
    %98 = vector.shape_cast %97 : vector<32xf32> to vector<32x1xf32>
    %cst_29 = arith.constant 6.400000e+01 : f32
    %99 = vector.broadcast %cst_29 : f32 to vector<32x1xf32>
    %100 = arith.divf %98, %99 : vector<32x1xf32>
    %cst_30 = arith.constant 9.99999997E-7 : f32
    %101 = vector.broadcast %cst_30 : f32 to vector<32x1xf32>
    %102 = arith.addf %100, %101 : vector<32x1xf32>
    %103 = math.rsqrt %102 : vector<32x1xf32>
    %104 = vector.broadcast %103 : vector<32x1xf32> to vector<32x64xf32>
    %105 = arith.mulf %93, %104 : vector<32x64xf32>
    %106 = vector.broadcast %95 : vector<1x64xf32> to vector<32x64xf32>
    %107 = arith.mulf %105, %106 : vector<32x64xf32>
    %108 = arith.truncf %107 : vector<32x64xf32> to vector<32x64xbf16>
    %c0_31 = arith.constant 0 : index
    %c0_32 = arith.constant 0 : index
    %c0_33 = arith.constant 0 : index
    %109 = vector.load %arg9[%c0_31, %c0_32, %c0_33] : memref<2x64x256xbf16, #tpu.memory_space<vmem>>, vector<1x64x256xbf16>
    %110 = vector.shape_cast %109 : vector<1x64x256xbf16> to vector<64x256xbf16>
    %cst_34 = arith.constant dense<0.000000e+00> : vector<32x256xf32>
    %111 = tpu.matmul %108, %110, %cst_34 {dimension_numbers = #tpu.dot_dimension_numbers<[1], [0], [0], [1], [0, 0, 1, 1], [], []>} : vector<32x64xbf16>, vector<64x256xbf16>, vector<32x256xf32> -> vector<32x256xf32>
    %112 = vector.extract_strided_slice %111 {offsets = [0, 0], sizes = [32, 128], strides = [1, 1]} : vector<32x256xf32> to vector<32x128xf32>
    %113 = vector.extract_strided_slice %111 {offsets = [0, 128], sizes = [32, 128], strides = [1, 1]} : vector<32x256xf32> to vector<32x128xf32>
    %114 = arith.negf %112 : vector<32x128xf32>
    %115 = math.exp %114 : vector<32x128xf32>
    %cst_35 = arith.constant 1.000000e+00 : f32
    %116 = vector.broadcast %cst_35 : f32 to vector<32x128xf32>
    %117 = arith.addf %116, %115 : vector<32x128xf32>
    %118 = arith.divf %116, %117 : vector<32x128xf32>
    %119 = arith.mulf %112, %118 : vector<32x128xf32>
    %120 = arith.mulf %119, %113 : vector<32x128xf32>
    %121 = arith.truncf %120 : vector<32x128xf32> to vector<32x128xbf16>
    %c0_36 = arith.constant 0 : index
    %c0_37 = arith.constant 0 : index
    %c0_38 = arith.constant 0 : index
    %122 = vector.load %arg10[%c0_36, %c0_37, %c0_38] : memref<2x128x64xbf16, #tpu.memory_space<vmem>>, vector<1x128x64xbf16>
    %123 = vector.shape_cast %122 : vector<1x128x64xbf16> to vector<128x64xbf16>
    %cst_39 = arith.constant dense<0.000000e+00> : vector<32x64xf32>
    %124 = tpu.matmul %121, %123, %cst_39 {dimension_numbers = #tpu.dot_dimension_numbers<[1], [0], [0], [1], [0, 0, 1, 1], [], []>} : vector<32x128xbf16>, vector<128x64xbf16>, vector<32x64xf32> -> vector<32x64xf32>
    %125 = arith.addf %93, %124 : vector<32x64xf32>
    %c1 = arith.constant 1 : index
    %c0_40 = arith.constant 0 : index
    %c0_41 = arith.constant 0 : index
    %126 = vector.load %arg5[%c1, %c0_40, %c0_41] : memref<2x1x64xf32, #tpu.memory_space<vmem>>, vector<1x1x64xf32>
    %127 = vector.shape_cast %126 : vector<1x1x64xf32> to vector<1x64xf32>
    %128 = arith.mulf %125, %125 : vector<32x64xf32>
    %cst_42 = arith.constant dense<0.000000e+00> : vector<32xf32>
    %129 = vector.multi_reduction <add>, %128, %cst_42 [1] : vector<32x64xf32> to vector<32xf32>
    %130 = vector.shape_cast %129 : vector<32xf32> to vector<32x1xf32>
    %cst_43 = arith.constant 6.400000e+01 : f32
    %131 = vector.broadcast %cst_43 : f32 to vector<32x1xf32>
    %132 = arith.divf %130, %131 : vector<32x1xf32>
    %cst_44 = arith.constant 9.99999997E-7 : f32
    %133 = vector.broadcast %cst_44 : f32 to vector<32x1xf32>
    %134 = arith.addf %132, %133 : vector<32x1xf32>
    %135 = math.rsqrt %134 : vector<32x1xf32>
    %136 = vector.broadcast %135 : vector<32x1xf32> to vector<32x64xf32>
    %137 = arith.mulf %125, %136 : vector<32x64xf32>
    %138 = vector.broadcast %127 : vector<1x64xf32> to vector<32x64xf32>
    %139 = arith.mulf %137, %138 : vector<32x64xf32>
    %140 = arith.truncf %139 : vector<32x64xf32> to vector<32x64xbf16>
    %c1_45 = arith.constant 1 : index
    %c0_46 = arith.constant 0 : index
    %c0_47 = arith.constant 0 : index
    %141 = vector.load %arg6[%c1_45, %c0_46, %c0_47] : memref<2x64x320xbf16, #tpu.memory_space<vmem>>, vector<1x64x320xbf16>
    %142 = vector.shape_cast %141 : vector<1x64x320xbf16> to vector<64x320xbf16>
    %cst_48 = arith.constant dense<0.000000e+00> : vector<32x320xf32>
    %143 = tpu.matmul %140, %142, %cst_48 {dimension_numbers = #tpu.dot_dimension_numbers<[1], [0], [0], [1], [0, 0, 1, 1], [], []>} : vector<32x64xbf16>, vector<64x320xbf16>, vector<32x320xf32> -> vector<32x320xf32>
    %144 = vector.extract_strided_slice %143 {offsets = [0, 0], sizes = [32, 64], strides = [1, 1]} : vector<32x320xf32> to vector<32x64xf32>
    %145 = vector.extract_strided_slice %143 {offsets = [0, 64], sizes = [32, 64], strides = [1, 1]} : vector<32x320xf32> to vector<32x64xf32>
    %146 = vector.extract_strided_slice %143 {offsets = [0, 128], sizes = [32, 64], strides = [1, 1]} : vector<32x320xf32> to vector<32x64xf32>
    %147 = vector.extract_strided_slice %143 {offsets = [0, 192], sizes = [32, 64], strides = [1, 1]} : vector<32x320xf32> to vector<32x64xf32>
    %148 = vector.extract_strided_slice %143 {offsets = [0, 256], sizes = [32, 64], strides = [1, 1]} : vector<32x320xf32> to vector<32x64xf32>
    %149 = arith.mulf %144, %2 : vector<32x64xf32>
    %150 = arith.mulf %145, %3 : vector<32x64xf32>
    %151 = arith.addf %149, %150 : vector<32x64xf32>
    %152 = arith.truncf %151 : vector<32x64xf32> to vector<32x64xbf16>
    %153 = arith.mulf %146, %2 : vector<32x64xf32>
    %154 = arith.mulf %147, %3 : vector<32x64xf32>
    %155 = arith.addf %153, %154 : vector<32x64xf32>
    %156 = arith.truncf %155 : vector<32x64xf32> to vector<32x64xbf16>
    %157 = vector.extract_strided_slice %152 {offsets = [0, 0], sizes = [32, 16], strides = [1, 1]} : vector<32x64xbf16> to vector<32x16xbf16>
    %158 = vector.extract_strided_slice %152 {offsets = [0, 16], sizes = [32, 16], strides = [1, 1]} : vector<32x64xbf16> to vector<32x16xbf16>
    %159 = vector.extract_strided_slice %152 {offsets = [0, 32], sizes = [32, 16], strides = [1, 1]} : vector<32x64xbf16> to vector<32x16xbf16>
    %160 = vector.extract_strided_slice %152 {offsets = [0, 48], sizes = [32, 16], strides = [1, 1]} : vector<32x64xbf16> to vector<32x16xbf16>
    %161 = vector.shape_cast %157 : vector<32x16xbf16> to vector<1x32x16xbf16>
    %162 = vector.shape_cast %158 : vector<32x16xbf16> to vector<1x32x16xbf16>
    %163 = vector.shape_cast %159 : vector<32x16xbf16> to vector<1x32x16xbf16>
    %164 = vector.shape_cast %160 : vector<32x16xbf16> to vector<1x32x16xbf16>
    %165 = tpu.concatenate %161, %162, %163, %164 in 0 : vector<1x32x16xbf16>, vector<1x32x16xbf16>, vector<1x32x16xbf16>, vector<1x32x16xbf16> -> vector<4x32x16xbf16>
    %166 = vector.extract_strided_slice %156 {offsets = [0, 0], sizes = [32, 16], strides = [1, 1]} : vector<32x64xbf16> to vector<32x16xbf16>
    %167 = vector.extract_strided_slice %156 {offsets = [0, 16], sizes = [32, 16], strides = [1, 1]} : vector<32x64xbf16> to vector<32x16xbf16>
    %168 = vector.extract_strided_slice %156 {offsets = [0, 32], sizes = [32, 16], strides = [1, 1]} : vector<32x64xbf16> to vector<32x16xbf16>
    %169 = vector.extract_strided_slice %156 {offsets = [0, 48], sizes = [32, 16], strides = [1, 1]} : vector<32x64xbf16> to vector<32x16xbf16>
    %170 = vector.shape_cast %166 : vector<32x16xbf16> to vector<1x32x16xbf16>
    %171 = vector.shape_cast %167 : vector<32x16xbf16> to vector<1x32x16xbf16>
    %172 = vector.shape_cast %168 : vector<32x16xbf16> to vector<1x32x16xbf16>
    %173 = vector.shape_cast %169 : vector<32x16xbf16> to vector<1x32x16xbf16>
    %174 = tpu.concatenate %170, %171, %172, %173 in 0 : vector<1x32x16xbf16>, vector<1x32x16xbf16>, vector<1x32x16xbf16>, vector<1x32x16xbf16> -> vector<4x32x16xbf16>
    %175 = arith.truncf %148 : vector<32x64xf32> to vector<32x64xbf16>
    %176 = vector.extract_strided_slice %175 {offsets = [0, 0], sizes = [32, 16], strides = [1, 1]} : vector<32x64xbf16> to vector<32x16xbf16>
    %177 = vector.extract_strided_slice %175 {offsets = [0, 16], sizes = [32, 16], strides = [1, 1]} : vector<32x64xbf16> to vector<32x16xbf16>
    %178 = vector.extract_strided_slice %175 {offsets = [0, 32], sizes = [32, 16], strides = [1, 1]} : vector<32x64xbf16> to vector<32x16xbf16>
    %179 = vector.extract_strided_slice %175 {offsets = [0, 48], sizes = [32, 16], strides = [1, 1]} : vector<32x64xbf16> to vector<32x16xbf16>
    %180 = vector.shape_cast %176 : vector<32x16xbf16> to vector<1x32x16xbf16>
    %181 = vector.shape_cast %177 : vector<32x16xbf16> to vector<1x32x16xbf16>
    %182 = vector.shape_cast %178 : vector<32x16xbf16> to vector<1x32x16xbf16>
    %183 = vector.shape_cast %179 : vector<32x16xbf16> to vector<1x32x16xbf16>
    %184 = tpu.concatenate %180, %181, %182, %183 in 0 : vector<1x32x16xbf16>, vector<1x32x16xbf16>, vector<1x32x16xbf16>, vector<1x32x16xbf16> -> vector<4x32x16xbf16>
    "tpu.trace_start"() <{level = 10 : i32, message = "hqe,hke->hqk"}> : () -> ()
    %cst_49 = arith.constant dense<0.000000e+00> : vector<4x32x32xf32>
    %185 = tpu.matmul %165, %174, %cst_49 {dimension_numbers = #tpu.dot_dimension_numbers<[2], [2], [1], [1], [0, 0, 0, 1, 1, 1], [0], [0]>} : vector<4x32x16xbf16>, vector<4x32x16xbf16>, vector<4x32x32xf32> -> vector<4x32x32xf32>
    "tpu.trace_stop"() : () -> ()
    %186 = vector.broadcast %5 : vector<1x32x32xf32> to vector<4x32x32xf32>
    %187 = arith.addf %185, %186 : vector<4x32x32xf32>
    %cst_50 = arith.constant dense<0xFF800000> : vector<4x32xf32>
    %188 = vector.multi_reduction <maximumf>, %187, %cst_50 [2] : vector<4x32x32xf32> to vector<4x32xf32>
    %189 = vector.shape_cast %188 : vector<4x32xf32> to vector<4x32x1xf32>
    %190 = vector.broadcast %189 : vector<4x32x1xf32> to vector<4x32x32xf32>
    %191 = arith.subf %187, %190 : vector<4x32x32xf32>
    %192 = math.exp %191 : vector<4x32x32xf32>
    %cst_51 = arith.constant dense<0.000000e+00> : vector<4x32xf32>
    %193 = vector.multi_reduction <add>, %192, %cst_51 [2] : vector<4x32x32xf32> to vector<4x32xf32>
    %194 = vector.shape_cast %193 : vector<4x32xf32> to vector<4x32x1xf32>
    %195 = tpu.reciprocal %194 {approx = true} : vector<4x32x1xf32> -> vector<4x32x1xf32>
    %196 = vector.broadcast %195 : vector<4x32x1xf32> to vector<4x32x32xf32>
    %197 = arith.mulf %192, %196 : vector<4x32x32xf32>
    %198 = arith.truncf %197 : vector<4x32x32xf32> to vector<4x32x32xbf16>
    "tpu.trace_start"() <{level = 10 : i32, message = "hqk,hke->hqe"}> : () -> ()
    %cst_52 = arith.constant dense<0.000000e+00> : vector<4x32x16xf32>
    %199 = tpu.matmul %198, %184, %cst_52 {dimension_numbers = #tpu.dot_dimension_numbers<[2], [1], [1], [2], [0, 0, 0, 1, 1, 2], [0], [0]>} : vector<4x32x32xbf16>, vector<4x32x16xbf16>, vector<4x32x16xf32> -> vector<4x32x16xf32>
    "tpu.trace_stop"() : () -> ()
    %200 = vector.extract_strided_slice %199 {offsets = [0, 0, 0], sizes = [1, 32, 16], strides = [1, 1, 1]} : vector<4x32x16xf32> to vector<1x32x16xf32>
    %201 = vector.shape_cast %200 : vector<1x32x16xf32> to vector<32x16xf32>
    %202 = vector.extract_strided_slice %199 {offsets = [1, 0, 0], sizes = [1, 32, 16], strides = [1, 1, 1]} : vector<4x32x16xf32> to vector<1x32x16xf32>
    %203 = vector.shape_cast %202 : vector<1x32x16xf32> to vector<32x16xf32>
    %204 = vector.extract_strided_slice %199 {offsets = [2, 0, 0], sizes = [1, 32, 16], strides = [1, 1, 1]} : vector<4x32x16xf32> to vector<1x32x16xf32>
    %205 = vector.shape_cast %204 : vector<1x32x16xf32> to vector<32x16xf32>
    %206 = vector.extract_strided_slice %199 {offsets = [3, 0, 0], sizes = [1, 32, 16], strides = [1, 1, 1]} : vector<4x32x16xf32> to vector<1x32x16xf32>
    %207 = vector.shape_cast %206 : vector<1x32x16xf32> to vector<32x16xf32>
    %208 = tpu.concatenate %201, %203, %205, %207 in 1 : vector<32x16xf32>, vector<32x16xf32>, vector<32x16xf32>, vector<32x16xf32> -> vector<32x64xf32>
    %209 = arith.truncf %208 : vector<32x64xf32> to vector<32x64xbf16>
    %c1_53 = arith.constant 1 : index
    %c0_54 = arith.constant 0 : index
    %c0_55 = arith.constant 0 : index
    %210 = vector.load %arg7[%c1_53, %c0_54, %c0_55] : memref<2x64x64xbf16, #tpu.memory_space<vmem>>, vector<1x64x64xbf16>
    %211 = vector.shape_cast %210 : vector<1x64x64xbf16> to vector<64x64xbf16>
    %cst_56 = arith.constant dense<0.000000e+00> : vector<32x64xf32>
    %212 = tpu.matmul %209, %211, %cst_56 {dimension_numbers = #tpu.dot_dimension_numbers<[1], [0], [0], [1], [0, 0, 1, 1], [], []>} : vector<32x64xbf16>, vector<64x64xbf16>, vector<32x64xf32> -> vector<32x64xf32>
    %213 = arith.addf %125, %212 : vector<32x64xf32>
    %c1_57 = arith.constant 1 : index
    %c0_58 = arith.constant 0 : index
    %c0_59 = arith.constant 0 : index
    %214 = vector.load %arg8[%c1_57, %c0_58, %c0_59] : memref<2x1x64xf32, #tpu.memory_space<vmem>>, vector<1x1x64xf32>
    %215 = vector.shape_cast %214 : vector<1x1x64xf32> to vector<1x64xf32>
    %216 = arith.mulf %213, %213 : vector<32x64xf32>
    %cst_60 = arith.constant dense<0.000000e+00> : vector<32xf32>
    %217 = vector.multi_reduction <add>, %216, %cst_60 [1] : vector<32x64xf32> to vector<32xf32>
    %218 = vector.shape_cast %217 : vector<32xf32> to vector<32x1xf32>
    %cst_61 = arith.constant 6.400000e+01 : f32
    %219 = vector.broadcast %cst_61 : f32 to vector<32x1xf32>
    %220 = arith.divf %218, %219 : vector<32x1xf32>
    %cst_62 = arith.constant 9.99999997E-7 : f32
    %221 = vector.broadcast %cst_62 : f32 to vector<32x1xf32>
    %222 = arith.addf %220, %221 : vector<32x1xf32>
    %223 = math.rsqrt %222 : vector<32x1xf32>
    %224 = vector.broadcast %223 : vector<32x1xf32> to vector<32x64xf32>
    %225 = arith.mulf %213, %224 : vector<32x64xf32>
    %226 = vector.broadcast %215 : vector<1x64xf32> to vector<32x64xf32>
    %227 = arith.mulf %225, %226 : vector<32x64xf32>
    %228 = arith.truncf %227 : vector<32x64xf32> to vector<32x64xbf16>
    %c1_63 = arith.constant 1 : index
    %c0_64 = arith.constant 0 : index
    %c0_65 = arith.constant 0 : index
    %229 = vector.load %arg9[%c1_63, %c0_64, %c0_65] : memref<2x64x256xbf16, #tpu.memory_space<vmem>>, vector<1x64x256xbf16>
    %230 = vector.shape_cast %229 : vector<1x64x256xbf16> to vector<64x256xbf16>
    %cst_66 = arith.constant dense<0.000000e+00> : vector<32x256xf32>
    %231 = tpu.matmul %228, %230, %cst_66 {dimension_numbers = #tpu.dot_dimension_numbers<[1], [0], [0], [1], [0, 0, 1, 1], [], []>} : vector<32x64xbf16>, vector<64x256xbf16>, vector<32x256xf32> -> vector<32x256xf32>
    %232 = vector.extract_strided_slice %231 {offsets = [0, 0], sizes = [32, 128], strides = [1, 1]} : vector<32x256xf32> to vector<32x128xf32>
    %233 = vector.extract_strided_slice %231 {offsets = [0, 128], sizes = [32, 128], strides = [1, 1]} : vector<32x256xf32> to vector<32x128xf32>
    %234 = arith.negf %232 : vector<32x128xf32>
    %235 = math.exp %234 : vector<32x128xf32>
    %cst_67 = arith.constant 1.000000e+00 : f32
    %236 = vector.broadcast %cst_67 : f32 to vector<32x128xf32>
    %237 = arith.addf %236, %235 : vector<32x128xf32>
    %238 = arith.divf %236, %237 : vector<32x128xf32>
    %239 = arith.mulf %232, %238 : vector<32x128xf32>
    %240 = arith.mulf %239, %233 : vector<32x128xf32>
    %241 = arith.truncf %240 : vector<32x128xf32> to vector<32x128xbf16>
    %c1_68 = arith.constant 1 : index
    %c0_69 = arith.constant 0 : index
    %c0_70 = arith.constant 0 : index
    %242 = vector.load %arg10[%c1_68, %c0_69, %c0_70] : memref<2x128x64xbf16, #tpu.memory_space<vmem>>, vector<1x128x64xbf16>
    %243 = vector.shape_cast %242 : vector<1x128x64xbf16> to vector<128x64xbf16>
    %cst_71 = arith.constant dense<0.000000e+00> : vector<32x64xf32>
    %244 = tpu.matmul %241, %243, %cst_71 {dimension_numbers = #tpu.dot_dimension_numbers<[1], [0], [0], [1], [0, 0, 1, 1], [], []>} : vector<32x128xbf16>, vector<128x64xbf16>, vector<32x64xf32> -> vector<32x64xf32>
    %245 = arith.addf %213, %244 : vector<32x64xf32>
    %c0_72 = arith.constant 0 : index
    %c0_73 = arith.constant 0 : index
    %246 = vector.load %arg11[%c0_72, %c0_73] : memref<1x64xf32, #tpu.memory_space<vmem>>, vector<1x64xf32>
    %247 = arith.mulf %245, %245 : vector<32x64xf32>
    %cst_74 = arith.constant dense<0.000000e+00> : vector<32xf32>
    %248 = vector.multi_reduction <add>, %247, %cst_74 [1] : vector<32x64xf32> to vector<32xf32>
    %249 = vector.shape_cast %248 : vector<32xf32> to vector<32x1xf32>
    %cst_75 = arith.constant 6.400000e+01 : f32
    %250 = vector.broadcast %cst_75 : f32 to vector<32x1xf32>
    %251 = arith.divf %249, %250 : vector<32x1xf32>
    %cst_76 = arith.constant 9.99999997E-7 : f32
    %252 = vector.broadcast %cst_76 : f32 to vector<32x1xf32>
    %253 = arith.addf %251, %252 : vector<32x1xf32>
    %254 = math.rsqrt %253 : vector<32x1xf32>
    %255 = vector.broadcast %254 : vector<32x1xf32> to vector<32x64xf32>
    %256 = arith.mulf %245, %255 : vector<32x64xf32>
    %257 = vector.broadcast %246 : vector<1x64xf32> to vector<32x64xf32>
    %258 = arith.mulf %256, %257 : vector<32x64xf32>
    %259 = arith.truncf %258 : vector<32x64xf32> to vector<32x64xbf16>
    %c0_77 = arith.constant 0 : index
    %c0_78 = arith.constant 0 : index
    %260 = vector.load %arg12[%c0_77, %c0_78] : memref<64x128xbf16, #tpu.memory_space<vmem>>, vector<64x128xbf16>
    %cst_79 = arith.constant dense<0.000000e+00> : vector<32x128xf32>
    %261 = tpu.matmul %259, %260, %cst_79 {dimension_numbers = #tpu.dot_dimension_numbers<[1], [0], [0], [1], [0, 0, 1, 1], [], []>} : vector<32x64xbf16>, vector<64x128xbf16>, vector<32x128xf32> -> vector<32x128xf32>
    %c0_80 = arith.constant 0 : index
    %c0_81 = arith.constant 0 : index
    %c0_82 = arith.constant 0 : index
    %262 = vector.load %arg13[%c0_80, %c0_81, %c0_82] : memref<1x32x128xf32, #tpu.memory_space<vmem>>, vector<1x32x128xf32>
    %263 = vector.shape_cast %262 : vector<1x32x128xf32> to vector<32x128xf32>
    %264 = vector.shape_cast %261 : vector<32x128xf32> to vector<1x32x128xf32>
    tpu.vector_store %arg13[%c0_80, %c0_81, %c0_82], %264 {strides = array<i32>} : memref<1x32x128xf32, #tpu.memory_space<vmem>>, vector<1x32x128xf32>,
    return
  }
  func.func @transform_0(%arg0: i32) -> (i32, i32, i32) {
    %c0_i32 = arith.constant 0 : i32
    %c0_i32_0 = arith.constant 0 : i32
    %c0_i32_1 = arith.constant 0 : i32
    return %arg0, %c0_i32, %c0_i32_0 : i32, i32, i32
  }
  func.func @transform_1(%arg0: i32) -> (i32, i32) {
    %c0_i32 = arith.constant 0 : i32
    %c0_i32_0 = arith.constant 0 : i32
    %c0_i32_1 = arith.constant 0 : i32
    return %c0_i32, %c0_i32_0 : i32, i32
  }
  func.func @transform_2(%arg0: i32) -> (i32, i32) {
    %c0_i32 = arith.constant 0 : i32
    %c0_i32_0 = arith.constant 0 : i32
    %c0_i32_1 = arith.constant 0 : i32
    return %c0_i32, %c0_i32_0 : i32, i32
  }
  func.func @transform_3(%arg0: i32) -> (i32, i32) {
    %c0_i32 = arith.constant 0 : i32
    %c0_i32_0 = arith.constant 0 : i32
    %c0_i32_1 = arith.constant 0 : i32
    return %c0_i32, %c0_i32_0 : i32, i32
  }
  func.func @transform_4(%arg0: i32) -> (i32, i32, i32) {
    %c0_i32 = arith.constant 0 : i32
    %c0_i32_0 = arith.constant 0 : i32
    %c0_i32_1 = arith.constant 0 : i32
    %c0_i32_2 = arith.constant 0 : i32
    return %c0_i32, %c0_i32_0, %c0_i32_1 : i32, i32, i32
  }
  func.func @transform_5(%arg0: i32) -> (i32, i32, i32) {
    %c0_i32 = arith.constant 0 : i32
    %c0_i32_0 = arith.constant 0 : i32
    %c0_i32_1 = arith.constant 0 : i32
    %c0_i32_2 = arith.constant 0 : i32
    return %c0_i32, %c0_i32_0, %c0_i32_1 : i32, i32, i32
  }
  func.func @transform_6(%arg0: i32) -> (i32, i32, i32) {
    %c0_i32 = arith.constant 0 : i32
    %c0_i32_0 = arith.constant 0 : i32
    %c0_i32_1 = arith.constant 0 : i32
    %c0_i32_2 = arith.constant 0 : i32
    return %c0_i32, %c0_i32_0, %c0_i32_1 : i32, i32, i32
  }
  func.func @transform_7(%arg0: i32) -> (i32, i32, i32) {
    %c0_i32 = arith.constant 0 : i32
    %c0_i32_0 = arith.constant 0 : i32
    %c0_i32_1 = arith.constant 0 : i32
    %c0_i32_2 = arith.constant 0 : i32
    return %c0_i32, %c0_i32_0, %c0_i32_1 : i32, i32, i32
  }
  func.func @transform_8(%arg0: i32) -> (i32, i32, i32) {
    %c0_i32 = arith.constant 0 : i32
    %c0_i32_0 = arith.constant 0 : i32
    %c0_i32_1 = arith.constant 0 : i32
    %c0_i32_2 = arith.constant 0 : i32
    return %c0_i32, %c0_i32_0, %c0_i32_1 : i32, i32, i32
  }
  func.func @transform_9(%arg0: i32) -> (i32, i32, i32) {
    %c0_i32 = arith.constant 0 : i32
    %c0_i32_0 = arith.constant 0 : i32
    %c0_i32_1 = arith.constant 0 : i32
    %c0_i32_2 = arith.constant 0 : i32
    return %c0_i32, %c0_i32_0, %c0_i32_1 : i32, i32, i32
  }
  func.func @transform_10(%arg0: i32) -> (i32, i32) {
    %c0_i32 = arith.constant 0 : i32
    %c0_i32_0 = arith.constant 0 : i32
    %c0_i32_1 = arith.constant 0 : i32
    return %c0_i32, %c0_i32_0 : i32, i32
  }
  func.func @transform_11(%arg0: i32) -> (i32, i32) {
    %c0_i32 = arith.constant 0 : i32
    %c0_i32_0 = arith.constant 0 : i32
    %c0_i32_1 = arith.constant 0 : i32
    return %c0_i32, %c0_i32_0 : i32, i32
  }
  func.func @transform_12(%arg0: i32) -> (i32, i32, i32) {
    %c0_i32 = arith.constant 0 : i32
    %c0_i32_0 = arith.constant 0 : i32
    %c0_i32_1 = arith.constant 0 : i32
    return %arg0, %c0_i32, %c0_i32_0 : i32, i32, i32
  }
}

</mosaic_0001>

<bundles_post_ra>
// kernel: _device_forward.1
= control target key start
LH: loop header
LB: loop body
LE: loop exit
PB: predicated region body
PF: predicated region fallthrough
CT: control target
= control target key end

     0   :  { %vm64_vm0 = vcmask 523264   ;;  %v4062_v22 = vmov 0   ;;  %s5149_s0 = inlined_call_operand.vmem [shape: f32[1,32,64], index: 0, kind: input, shape index: {}]   ;;  %s5150_s1 = inlined_call_operand.vmem [shape: f32[32,64], index: 1, kind: input, shape index: {}]   ;;  %s5151_s2 = inlined_call_operand.vmem [shape: f32[32,64], index: 2, kind: input, shape index: {}]   ;;  %s5152_s3 = inlined_call_operand.vmem [shape: f32[32,32], index: 3, kind: input, shape index: {}]   ;;  %s5153_s4 = inlined_call_operand.vmem [shape: f32[2,1,64], index: 4, kind: input, shape index: {}]   ;;  %s5154_s5 = inlined_call_operand.vmem [shape: bf16[2,64,320], index: 5, kind: input, shape index: {}]   ;;  %s5155_s6 = inlined_call_operand.vmem [shape: bf16[2,64,64], index: 6, kind: input, shape index: {}]   ;;  %s5156_s7 = inlined_call_operand.vmem [shape: f32[2,1,64], index: 7, kind: input, shape index: {}]   ;;  %s5157_s8 = inlined_call_operand.vmem [shape: bf16[2,64,256], index: 8, kind: input, shape index: {}]   ;;  %s5158_s9 = inlined_call_operand.vmem [shape: bf16[2,128,64], index: 9, kind: input, shape index: {}]   ;;  %s5159_s10 = inlined_call_operand.vmem [shape: f32[1,64], index: 10, kind: input, shape index: {}]   ;;  %s5160_s11 = inlined_call_operand.vmem [shape: bf16[64,128], index: 11, kind: input, shape index: {}]   ;;  %s5161_s12 = inlined_call_operand.hbm [shape: f32[1,32,128], index: 12, kind: output, shape index: {}]  }
   0x1   :  { %v4141_v0 = vld [vmem:[%s5149_s0] sm:$0xff]  ;;  %v4146_v1 = vld [vmem:[%s5149_s0 + $0x10] sm:$0xff]  ;;  %v4151_v2 = vld [vmem:[%s5149_s0 + $0x8] sm:$0xff]  ;;  %224 = vmatprep.mubr.bf16.mxu0 %v4062_v22 }
   0x2   :  { %v60_v3 = vmul.f32 %v4141_v0, %v4141_v0  ;;  %v62_v4 = vmul.f32 %v4146_v1, %v4146_v1  ;;  %v61_v5 = vmul.f32 %v4151_v2, %v4151_v2  ;;  %v4162_v6 = vld [vmem:[%s5149_s0 + $0x18] sm:$0xff]  ;;  %v3742_v12 = vld [vmem:[%s5154_s5 + $0x4] ss:$12 sps:$4 sm:$0xff]   ;;  %v3744_v13 = vld [vmem:[%s5154_s5] ss:$12 sps:$4 sm:$0xff]  }
   0x3   :  { %v63_v7 = vmul.f32 %v4162_v6, %v4162_v6  ;;  %v3745_v14 = vld [vmem:[%s5154_s5 + $0x8] ss:$12 sps:$4 sm:$0xff]   ;;  %192 = vmatprep.subr.bf16.mxu0 %v3742_v12  ;;  %v3749_v16 = vld [vmem:[%s5154_s5 + $0x20] ss:$12 sps:$4 sm:$0xff]   ;;  %v3748_v17 = vld [vmem:[%s5154_s5 + $0x18] ss:$12 sps:$4 sm:$0xff]  }
   0x4   :  { %v65_v8 = vsel %vm64_vm0, %v60_v3, 0.0  ;;  %v71_v9 = vsel %vm64_vm0, %v62_v4, 0.0  ;;  %v68_v10 = vsel %vm64_vm0, %v61_v5, 0.0  ;;  %v3746_v15 = vld [vmem:[%s5154_s5 + $0x1c] ss:$12 sps:$4 sm:$0xff]   ;;  %193 = vmatpush1.bf16.msra.mxu0 %v3744_v13  ;;  %3427 = vmatprep.subr.bf16.mxu1 %v3745_v14 }
   0x5   :  { %66 = vadd.xlane.f32.xlu0 %v65_v8  ;;  %72 = vadd.xlane.f32.xlu1 %v71_v9  ;;  %v74_v11 = vsel %vm64_vm0, %v63_v7, 0.0  ;;  %v3750_v18 = vld [vmem:[%s5154_s5 + $0x34] ss:$12 sps:$4 sm:$0xff]   ;;  %v3752_v19 = vld [vmem:[%s5154_s5 + $0x30] ss:$12 sps:$4 sm:$0xff]  }
   0x6   :  { %3428 = vmatpush3.bf16.msra.mxu1 %v3745_v14  ;;  %194 = vmatprep.subr.bf16.mxu0 %v3746_v15  ;;  %v3753_v20 = vld [vmem:[%s5154_s5 + $0x38] ss:$12 sps:$4 sm:$0xff]   ;;  %v3757_v23 = vld [vmem:[%s5154_s5 + $0x50] ss:$12 sps:$4 sm:$0xff]   ;;  %v3756_v24 = vld [vmem:[%s5154_s5 + $0x48] ss:$12 sps:$4 sm:$0xff]  }
   0x7   :  { %3429 = vmatprep.subr.bf16.mxu1 %v3749_v16  ;;  %v3754_v21 = vld [vmem:[%s5154_s5 + $0x4c] ss:$12 sps:$4 sm:$0xff]  }
   0x8   :  { %195 = vmatpush1.bf16.msra.mxu0 %v3748_v17 }
   0x9   :  { %69 = vadd.xlane.f32.xlu0 %v68_v10  ;;  %75 = vadd.xlane.f32.xlu1 %v74_v11 }
   0xa   :  { %3430 = vmatpush3.bf16.msra.mxu1 %v3749_v16  ;;  %196 = vmatprep.subr.bf16.mxu0 %v3750_v18 }
   0xb   :  { %3431 = vmatprep.subr.bf16.mxu1 %v3753_v20 }
   0xc   :  { %197 = vmatpush1.bf16.msra.mxu0 %v3752_v19 }
   0xd   :  { %198 = vmatprep.subr.bf16.mxu0 %v3754_v21 }
   0xe   :  { %3432 = vmatpush3.bf16.msra.mxu1 %v3753_v20 }
   0xf   :  { %3433 = vmatprep.subr.bf16.mxu1 %v3757_v23 }
  0x10   :  { %199 = vmatpush1.bf16.msra.mxu0 %v3756_v24 }
  0x11   :  { %17 = vsyncpa [#allocation3], 0  ;;  %v51_v25 = vld [vmem:[%s5151_s2] sm:$0xff]  ;;  %v52_v26 = vld [vmem:[%s5151_s2 + $0x8] sm:$0xff]  ;;  %s4063_s21 = smov 64   ;;  %vm420_vm1 = vcmask 130048  }
  0x12   :  { %3434 = vmatpush3.bf16.msra.mxu1 %v3757_v23  ;;  %v53_v27 = vld [vmem:[%s5151_s2 + $0x10] sm:$0xff]  ;;  %v54_v28 = vld [vmem:[%s5151_s2 + $0x18] sm:$0xff]  ;;  %v3132_v46 = vld [vmem:[%s5153_s4] ss:$0 sm:$0xff]  ;;  %s4064_s17 = smov 112   ;;  %s4065_s18 = smov 96  }
  0x13   :  { %v47_v18 = vld [vmem:[%s5150_s1] sm:$0xff]  ;;  %v48_v19 = vld [vmem:[%s5150_s1 + $0x8] sm:$0xff]  ;;  %s4066_s19 = smov 80   ;;  %vm665_vm2 = vcmask 261120   ;;  %s4067_s14 = smov 16   ;;  %vm1126_vm3 = vcmask 392192  }
  0x14   :  { %s4068_s20 = smov 32   ;;  %s4069_s24 = smov 48  }
  0x15   :  { %s4070_s23 = smov [#allocation2]  }
  0x1a   :  { %304 = vrot.lane.b32.xlu1 %v52_v26, %s4063_s21 }
  0x1e   :  { %306 = vrot.lane.b32.xlu1 %v53_v27, %s4063_s21 }
  0x1f   :  { %302 = vrot.lane.b32.xlu0 %v51_v25, %s4063_s21 }
  0x22   :  { %308 = vrot.lane.b32.xlu1 %v54_v28, %s4063_s21  ;;  %v49_v28 = vld [vmem:[%s5150_s1 + $0x10] sm:$0xff] }
  0x92   :  { %v67_v29 = vpop.xlane.xlu0 %66  ;;  %v73_v30 = vpop.xlane.xlu1 %72 }
  0x93   :  { %v78_v31 = vmul.f32 0.015625, %v67_v29  ;;  %v80_v32 = vmul.f32 0.015625, %v73_v30  ;;  %v50_v29 = vld [vmem:[%s5150_s1 + $0x18] sm:$0xff] }
  0x95   :  { %v82_v33 = vadd.f32 1e-06, %v78_v31  ;;  %v84_v34 = vadd.f32 1e-06, %v80_v32 }
  0x96   :  { %v70_v35 = vpop.xlane.xlu0 %69  ;;  %v76_v36 = vpop.xlane.xlu1 %75 }
  0x97   :  { %3826 = vrsqrt.f32 %v82_v33  ;;  %v79_v37 = vmul.f32 0.015625, %v70_v35  ;;  %v81_v38 = vmul.f32 0.015625, %v76_v36 }
  0x98   :  { %3828 = vrsqrt.f32 %v84_v34 }
  0x99   :  { %v83_v39 = vadd.f32 1e-06, %v79_v37  ;;  %v85_v40 = vadd.f32 1e-06, %v81_v38 }
  0x9a   :  { %v4235_v56 = vpop.permute.xlu1 %304  ;;  %v4237_v57 = vpop.permute.xlu0 %302 }
  0x9b   :  { %3830 = vrsqrt.f32 %v83_v39 }
  0x9c   :  { %3832 = vrsqrt.f32 %v85_v40 }
  0x9e   :  { %v4239_v59 = vpop.permute.xlu1 %306 }
  0xa1   :  { %v3827_v41 = vpop.eup %3826 }
  0xa2   :  { %v3829_v42 = vpop.eup %3828  ;;  %v90_v44 = vmul.f32 %v3827_v41, %v4141_v0  ;;  %v4249_v9 = vpop.permute.xlu1 %308 }
  0xa3   :  { %v92_v43 = vmul.f32 %v3829_v42, %v4146_v1 }
  0xa4   :  { %v100_v51 = vmul.f32 %v3132_v46, %v90_v44 }
  0xa5   :  { %v3831_v45 = vpop.eup %3830  ;;  %v102_v50 = vmul.f32 %v3132_v46, %v92_v43 }
  0xa6   :  { %v3833_v47 = vpop.eup %3832  ;;  %v91_v48 = vmul.f32 %v3831_v45, %v4151_v2 }
  0xa7   :  { %v93_v49 = vmul.f32 %v3833_v47, %v4162_v6 }
  0xa8   :  { %v101_v52 = vmul.f32 %v3132_v46, %v91_v48 }
  0xa9   :  { %v103_v53 = vmul.f32 %v3132_v46, %v93_v49 }
  0xaa   :  { %v104_v54 = vpack.c.bf16 %v101_v52, %v100_v51 }
  0xab   :  { %v105_v55 = vpack.c.bf16 %v103_v53, %v102_v50 }
  0xac   :  { %3145 = vmatmul.mubr.msk.bf16.vlgmr.msra.gmra.mrb[0].mxu0 %vm64_vm0, %v104_v54  ;;  %3435 = vmatprep.mubr.msk.bf16.mxu1 %vm64_vm0, %v104_v54 }
  0xad   :  { %3436 = vmatmul.mubr.msk.bf16.vlgmr.msra.gmra.mrb[0].mxu1 %vm64_vm0, %v105_v55  ;;  %234 = vmatprep.mubr.bf16.mxu0 %v4062_v22 }
  0xb4   :  { %3146 = vmatmul.mubr.msk.bf16.gmra.mrb[4].mxu0 %vm64_vm0, %v105_v55 }
 0x17f   :  { %v226_v58 = vpop.f32.mrb[0].mxu0 }
 0x180   :  { %v228_v60 = vpop.f32.mrb[1].mxu0  ;;  %v3437_v61 = vpop.f32.mrb[0].mxu1  ;;  %v314_v14 = vmul.f32 %v4237_v57, %v226_v58  ;;  %v294_v38 = vmul.f32 %v226_v58, %v47_v18 }
 0x181   :  { %v344_v62 = vmul.f32 %v4237_v57, %v228_v60  ;;  %v230_v63 = vpop.f32.mrb[2].mxu0  ;;  %v279_v0 = vpop.f32.mrb[1].mxu1  ;;  %v340_v21 = vmul.f32 %v228_v60, %v47_v18  ;;  %v4326_v18 = vld [vmem:[%s5152_s3 + $0x8] sm:$0xff] }
 0x182   :  { %v232_v1 = vpop.f32.mrb[3].mxu0  ;;  %v3438_v2 = vpop.f32.mrb[2].mxu1  ;;  %v315_v15 = vmul.f32 %v4235_v56, %v230_v63  ;;  %v295_v39 = vmul.f32 %v230_v63, %v48_v19 }
 0x183   :  { %v345_v3 = vmul.f32 %v4235_v56, %v232_v1  ;;  %v4243_v4 = vpack.c.bf16 %v3438_v2, %v3437_v61  ;;  %v282_v5 = vpop.f32.mrb[3].mxu1  ;;  %352 = vrot.lane.b32.xlu0 %v344_v62, %s4063_s21  ;;  %v341_v23 = vmul.f32 %v232_v1, %v48_v19 }
 0x184   :  { %v4246_v6 = vpack.c.bf16 %v282_v5, %v279_v0 }
 0x185   :  { %354 = vrot.lane.b32.xlu1 %v345_v3, %s4063_s21 }
 0x187   :  { %v236_v7 = vpop.f32.mrb[4].mxu0 }
 0x188   :  { %v238_v8 = vpop.f32.mrb[5].mxu0  ;;  %v316_v16 = vmul.f32 %v4239_v59, %v236_v7  ;;  %v296_v46 = vmul.f32 %v236_v7, %v49_v28 }
 0x189   :  { %v346_v10 = vmul.f32 %v4239_v59, %v238_v8  ;;  %v240_v11 = vpop.f32.mrb[6].mxu0  ;;  %v342_v32 = vmul.f32 %v238_v8, %v49_v28 }
 0x18a   :  { %v242_v12 = vpop.f32.mrb[7].mxu0  ;;  %v317_v17 = vmul.f32 %v4249_v9, %v240_v11  ;;  %v297_v47 = vmul.f32 %v240_v11, %v50_v29 }
 0x18b   :  { %v347_v13 = vmul.f32 %v4249_v9, %v242_v12  ;;  %356 = vrot.lane.b32.xlu0 %v346_v10, %s4063_s21  ;;  %v343_v33 = vmul.f32 %v242_v12, %v50_v29 }
 0x18d   :  { %358 = vrot.lane.b32.xlu1 %v347_v13, %s4063_s21  ;;  %v57_v13 = vld [vmem:[%s5152_s3 + $0x10] sm:$0xff] }
 0x18f   :  { %322 = vrot.lane.b32.xlu0 %v314_v14, %s4063_s21 }
 0x191   :  { %324 = vrot.lane.b32.xlu1 %v315_v15, %s4063_s21  ;;  %v55_v15 = vld [vmem:[%s5152_s3] sm:$0xff] }
 0x193   :  { %326 = vrot.lane.b32.xlu0 %v316_v16, %s4063_s21 }
 0x195   :  { %328 = vrot.lane.b32.xlu1 %v317_v17, %s4063_s21 }
 0x1f5   :  { %v353_v20 = vpop.permute.xlu0 %352 }
 0x1f6   :  { %v364_v25 = vadd.f32 %v353_v20, %v340_v21 }
 0x1f7   :  { %v355_v24 = vpop.permute.xlu1 %354 }
 0x1f8   :  { %v365_v26 = vadd.f32 %v355_v24, %v341_v23  ;;  %v4335_v24 = vld [vmem:[%s5152_s3 + $0x18] sm:$0xff] }
 0x1fa   :  { %v368_v27 = vpack.c.bf16 %v365_v26, %v364_v25 }
 0x1fc   :  { %3655 = vmatprep.subr.msk.bf16.mxu0 %vm420_vm1, %v368_v27  ;;  %386 = vrot.lane.b32.xlu0 %v368_v27, %s4064_s17  ;;  %v428_v30 = vsel %vm420_vm1, %v368_v27, 0 }
 0x1fd   :  { %3440 = vmatpush3.bf16.xpose.msra.mxu0 %v428_v30  ;;  %v357_v31 = vpop.permute.xlu0 %356 }
 0x1fe   :  { %v366_v35 = vadd.f32 %v357_v31, %v342_v32 }
 0x1ff   :  { %v359_v34 = vpop.permute.xlu1 %358 }
 0x200   :  { %v367_v36 = vadd.f32 %v359_v34, %v343_v33  ;;  %390 = vrot.lane.b32.xlu0 %v368_v27, %s4065_s18 }
 0x201   :  { %v323_v37 = vpop.permute.xlu0 %322 }
 0x202   :  { %v369_v40 = vpack.c.bf16 %v367_v36, %v366_v35  ;;  %v334_v42 = vadd.f32 %v323_v37, %v294_v38 }
 0x203   :  { %v325_v41 = vpop.permute.xlu1 %324 }
 0x204   :  { %v335_v43 = vadd.f32 %v325_v41, %v295_v39  ;;  %388 = vrot.lane.b32.xlu1 %v369_v40, %s4064_s17  ;;  %3656 = vmatprep.subr.msk.bf16.mxu0 %vm420_vm1, %v369_v40  ;;  %v431_v44 = vsel %vm420_vm1, %v369_v40, 0 }
 0x205   :  { %394 = vrot.lane.b32.xlu0 %v368_v27, %s4066_s19  ;;  %3442 = vmatpush3.bf16.xpose.msra.mxu0 %v431_v44  ;;  %v327_v45 = vpop.permute.xlu0 %326 }
 0x206   :  { %v338_v48 = vpack.c.bf16 %v335_v43, %v334_v42  ;;  %v336_v50 = vadd.f32 %v327_v45, %v296_v46 }
 0x207   :  { %v329_v49 = vpop.permute.xlu1 %328 }
 0x208   :  { %v337_v51 = vadd.f32 %v329_v49, %v297_v47  ;;  %372 = vrot.lane.b32.xlu1 %v338_v48, %s4064_s17  ;;  %3443 = vmatprep.mubr.msk.bf16.mxu0 %vm420_vm1, %v338_v48 }
 0x209   :  { %392 = vrot.lane.b32.xlu0 %v369_v40, %s4065_s18 }
 0x20a   :  { %v339_v52 = vpack.c.bf16 %v337_v51, %v336_v50 }
 0x20c   :  { %374 = vrot.lane.b32.xlu1 %v339_v52, %s4064_s17  ;;  %3444 = vmatmul.mubr.msk.bf16.vlgmr.msra.gmra.mrb[8].mxu0 %vm420_vm1, %v339_v52 }
 0x20d   :  { %376 = vrot.lane.b32.xlu0 %v338_v48, %s4065_s18 }
 0x210   :  { %396 = vrot.lane.b32.xlu1 %v369_v40, %s4066_s19 }
 0x211   :  { %380 = vrot.lane.b32.xlu0 %v338_v48, %s4066_s19 }
 0x214   :  { %378 = vrot.lane.b32.xlu1 %v339_v52, %s4065_s18 }
 0x218   :  { %382 = vrot.lane.b32.xlu1 %v339_v52, %s4066_s19 }
 0x26e   :  { %v387_v53 = vpop.permute.xlu0 %386 }
 0x26f   :  { %3657 = vmatprep.subr.msk.bf16.mxu1 %vm420_vm1, %v387_v53  ;;  %v489_v54 = vsel %vm420_vm1, %v387_v53, 0 }
 0x270   :  { %3448 = vmatpush3.bf16.xpose.msra.mxu1 %v489_v54 }
 0x272   :  { %v391_v55 = vpop.permute.xlu0 %390 }
 0x273   :  { %3659 = vmatprep.subr.msk.bf16.mxu0 %vm420_vm1, %v391_v55  ;;  %v550_v58 = vsel %vm420_vm1, %v391_v55, 0 }
 0x274   :  { %3456 = vmatpush3.bf16.xpose.msra.mxu0 %v550_v58 }
 0x276   :  { %v389_v60 = vpop.permute.xlu1 %388 }
 0x277   :  { %v395_v61 = vpop.permute.xlu0 %394  ;;  %3658 = vmatprep.subr.msk.bf16.mxu1 %vm420_vm1, %v389_v60  ;;  %v492_v62 = vsel %vm420_vm1, %v389_v60, 0 }
 0x278   :  { %3450 = vmatpush3.bf16.xpose.msra.mxu1 %v492_v62  ;;  %v611_v5 = vsel %vm420_vm1, %v395_v61, 0 }
 0x279   :  { %3661 = vmatprep.subr.msk.bf16.mxu1 %vm420_vm1, %v395_v61 }
 0x27a   :  { %v373_v63 = vpop.permute.xlu1 %372 }
 0x27b   :  { %v393_v0 = vpop.permute.xlu0 %392  ;;  %3451 = vmatprep.mubr.msk.bf16.mxu1 %vm420_vm1, %v373_v63 }
 0x27c   :  { %3660 = vmatprep.subr.msk.bf16.mxu0 %vm420_vm1, %v393_v0  ;;  %v553_v1 = vsel %vm420_vm1, %v393_v0, 0 }
 0x27d   :  { %3458 = vmatpush3.bf16.xpose.msra.mxu0 %v553_v1 }
 0x27e   :  { %v375_v2 = vpop.permute.xlu1 %374 }
 0x27f   :  { %v377_v3 = vpop.permute.xlu0 %376  ;;  %3452 = vmatmul.mubr.msk.bf16.vlgmr.msra.gmra.mrb[4].mxu1 %vm420_vm1, %v375_v2 }
 0x280   :  { %3459 = vmatprep.mubr.msk.bf16.mxu0 %vm420_vm1, %v377_v3  ;;  %3464 = vmatpush3.bf16.xpose.msra.mxu1 %v611_v5 }
 0x282   :  { %v397_v7 = vpop.permute.xlu1 %396 }
 0x283   :  { %v381_v8 = vpop.permute.xlu0 %380  ;;  %3662 = vmatprep.subr.msk.bf16.mxu1 %vm420_vm1, %v397_v7  ;;  %v614_v11 = vsel %vm420_vm1, %v397_v7, 0 }
 0x284   :  { %3467 = vmatprep.mubr.msk.bf16.mxu1 %vm420_vm1, %v381_v8 }
 0x286   :  { %v379_v10 = vpop.permute.xlu1 %378 }
 0x287   :  { %3460 = vmatmul.mubr.msk.bf16.vlgmr.msra.gmra.mrb[12].mxu0 %vm420_vm1, %v379_v10 }
 0x288   :  { %3466 = vmatpush3.bf16.xpose.msra.mxu1 %v614_v11 }
 0x289   :  { %3471 = vmatprep.subr.bf16.mxu1 %v4246_v6 }
 0x28a   :  { %v383_v12 = vpop.permute.xlu1 %382 }
 0x28f   :  { %3468 = vmatmul.mubr.msk.bf16.vlgmr.msra.gmra.mrb[8].mxu1 %vm420_vm1, %v383_v12 }
 0x290   :  { %3472 = vmatpush3.bf16.msra.mxu1 %v4246_v6 }
 0x291   :  { %3473 = vmatprep.subr.bf16.mxu1 %v4243_v4 }
 0x294   :  { %3474 = vmatpush3.bf16.msra.mxu1 %v4243_v4 }
 0x2df   :  { %v3445_v14 = vpop.f32.mrb[8].mxu0 }
 0x2e0   :  { %v4321_v16 = vadd.f32 %v3445_v14, %v57_v13  ;;  %v467_v17 = vpop.f32.mrb[9].mxu0 }
 0x2e1   :  { %v3446_v19 = vpop.f32.mrb[10].mxu0  ;;  %v4328_v20 = vadd.f32 %v467_v17, %v55_v15 }
 0x2e2   :  { %v470_v21 = vpop.f32.mrb[11].mxu0  ;;  %v672_v23 = vsel %vm665_vm2, %v4321_v16, -inf  ;;  %v4343_v27 = vadd.f32 %v3446_v19, %v4335_v24 }
 0x2e3   :  { %v4338_v25 = vadd.f32 %v470_v21, %v4326_v18  ;;  %673 = vmax.xlane.f32.xlu0 %v672_v23  ;;  %v666_v28 = vsel %vm665_vm2, %v4328_v20, -inf }
 0x2e4   :  { %v675_v29 = vsel %vm665_vm2, %v4343_v27, -inf }
 0x2e5   :  { %v669_v26 = vsel %vm665_vm2, %v4338_v25, -inf }
 0x2e6   :  { %670 = vmax.xlane.f32.xlu1 %v669_v26 }
 0x2e7   :  { %667 = vmax.xlane.f32.xlu0 %v666_v28 }
 0x2eb   :  { %676 = vmax.xlane.f32.xlu0 %v675_v29 }
 0x352   :  { %v3453_v30 = vpop.f32.mrb[4].mxu1 }
 0x353   :  { %v4349_v31 = vadd.f32 %v3453_v30, %v57_v13  ;;  %v528_v32 = vpop.f32.mrb[5].mxu1 }
 0x354   :  { %v3454_v33 = vpop.f32.mrb[6].mxu1  ;;  %v4360_v42 = vadd.f32 %v528_v32, %v55_v15 }
 0x355   :  { %v4352_v34 = vadd.f32 %v3454_v33, %v4335_v24  ;;  %v531_v35 = vpop.f32.mrb[7].mxu1  ;;  %v684_v36 = vsel %vm665_vm2, %v4349_v31, -inf }
 0x356   :  { %685 = vmax.xlane.f32.xlu0 %v684_v36  ;;  %v4368_v46 = vadd.f32 %v531_v35, %v4326_v18  ;;  %v678_v49 = vsel %vm665_vm2, %v4360_v42, -inf }
 0x357   :  { %v687_v37 = vsel %vm665_vm2, %v4352_v34, -inf }
 0x358   :  { %688 = vmax.xlane.f32.xlu1 %v687_v37  ;;  %v681_v53 = vsel %vm665_vm2, %v4368_v46, -inf }
 0x35a   :  { %v3461_v38 = vpop.f32.mrb[12].mxu0 }
 0x35b   :  { %v4358_v39 = vadd.f32 %v3461_v38, %v57_v13  ;;  %v589_v40 = vpop.f32.mrb[13].mxu0 }
 0x35c   :  { %v3462_v41 = vpop.f32.mrb[14].mxu0  ;;  %v4372_v48 = vadd.f32 %v589_v40, %v55_v15 }
 0x35d   :  { %v4363_v43 = vadd.f32 %v3462_v41, %v4335_v24  ;;  %v592_v44 = vpop.f32.mrb[15].mxu0  ;;  %v696_v45 = vsel %vm665_vm2, %v4358_v39, -inf }
 0x35e   :  { %697 = vmax.xlane.f32.xlu0 %v696_v45  ;;  %v4377_v51 = vadd.f32 %v592_v44, %v4326_v18  ;;  %v690_v60 = vsel %vm665_vm2, %v4372_v48, -inf }
 0x35f   :  { %v699_v47 = vsel %vm665_vm2, %v4363_v43, -inf }
 0x360   :  { %700 = vmax.xlane.f32.xlu1 %v699_v47  ;;  %v693_v61 = vsel %vm665_vm2, %v4377_v51, -inf }
 0x362   :  { %679 = vmax.xlane.f32.xlu0 %v678_v49  ;;  %v3469_v50 = vpop.f32.mrb[8].mxu1 }
 0x363   :  { %v650_v52 = vpop.f32.mrb[9].mxu1  ;;  %v4387_v62 = vadd.f32 %v3469_v50, %v57_v13 }
 0x364   :  { %682 = vmax.xlane.f32.xlu1 %v681_v53  ;;  %v3470_v54 = vpop.f32.mrb[10].mxu1  ;;  %v4381_v55 = vadd.f32 %v650_v52, %v55_v15 }
 0x365   :  { %v653_v58 = vpop.f32.mrb[11].mxu1  ;;  %v708_v0 = vsel %vm665_vm2, %v4387_v62, -inf  ;;  %v4402_v10 = vadd.f32 %v3470_v54, %v4335_v24 }
 0x366   :  { %691 = vmax.xlane.f32.xlu0 %v690_v60  ;;  %v702_v63 = vsel %vm665_vm2, %v4381_v55, -inf  ;;  %v4407_v12 = vadd.f32 %v653_v58, %v4326_v18 }
 0x367   :  { %v711_v13 = vsel %vm665_vm2, %v4402_v10, -inf }
 0x368   :  { %694 = vmax.xlane.f32.xlu1 %v693_v61 }
 0x36a   :  { %703 = vmax.xlane.f32.xlu0 %v702_v63 }
 0x36e   :  { %709 = vmax.xlane.f32.xlu0 %v708_v0 }
 0x370   :  { %v674_v1 = vpop.xlane.xlu0 %673 }
 0x371   :  { %v716_v2 = vsub.f32 %v4321_v16, %v674_v1  ;;  %v705_v16 = vsel %vm665_vm2, %v4407_v12, -inf }
 0x373   :  { %v734_v5 = vmul.f32 1.442695, %v716_v2 }
 0x374   :  { %v668_v3 = vpop.xlane.xlu0 %667 }
 0x375   :  { %v714_v7 = vsub.f32 %v4328_v20, %v668_v3  ;;  %3834 = vpow2.f32 %v734_v5  ;;  %v671_v20 = vpop.xlane.xlu1 %670 }
 0x376   :  { %v715_v21 = vsub.f32 %v4338_v25, %v671_v20 }
 0x377   :  { %v730_v8 = vmul.f32 1.442695, %v714_v7 }
 0x378   :  { %v677_v18 = vpop.xlane.xlu0 %676  ;;  %v732_v24 = vmul.f32 1.442695, %v715_v21 }
 0x379   :  { %404 = vrot.lane.b32.xlu1 %v4243_v4, %s4064_s17  ;;  %3836 = vpow2.f32 %v730_v8  ;;  %v717_v19 = vsub.f32 %v4343_v27, %v677_v18 }
 0x37b   :  { %v736_v23 = vmul.f32 1.442695, %v717_v19 }
 0x37d   :  { %408 = vrot.lane.b32.xlu1 %v4246_v6, %s4065_s18  ;;  %3838 = vpow2.f32 %v736_v23 }
 0x37e   :  { %3840 = vpow2.f32 %v732_v24 }
 0x37f   :  { %v4404_v11 = vpop.eup %3834 }
 0x380   :  { %v768_v14 = vsel %vm665_vm2, %v4404_v11, 0.0 }
 0x383   :  { %v4413_v15 = vpop.eup %3836 }
 0x384   :  { %402 = vrot.lane.b32.xlu0 %v4246_v6, %s4064_s17  ;;  %v762_v17 = vsel %vm665_vm2, %v4413_v15, 0.0 }
 0x387   :  { %v4423_v26 = vpop.eup %3838 }
 0x388   :  { %v771_v28 = vsel %vm665_vm2, %v4423_v26, 0.0  ;;  %v4427_v29 = vpop.eup %3840 }
 0x3a1   :  { %712 = vmax.xlane.f32.xlu1 %v711_v13 }
 0x3a3   :  { %769 = vadd.xlane.f32.xlu0 %v768_v14 }
 0x3a5   :  { %706 = vmax.xlane.f32.xlu1 %v705_v16 }
 0x3a7   :  { %763 = vadd.xlane.f32.xlu0 %v762_v17 }
 0x3b6   :  { %414 = vrot.lane.b32.xlu1 %v4246_v6, %s4066_s19  ;;  %v765_v6 = vsel %vm665_vm2, %v4427_v29, 0.0 }
 0x3da   :  { %772 = vadd.xlane.f32.xlu1 %v771_v28 }
 0x3de   :  { %766 = vadd.xlane.f32.xlu1 %v765_v6 }
 0x3e3   :  { %v686_v27 = vpop.xlane.xlu0 %685 }
 0x3e4   :  { %v720_v30 = vsub.f32 %v4349_v31, %v686_v27 }
 0x3e5   :  { %v689_v25 = vpop.xlane.xlu1 %688 }
 0x3e6   :  { %v742_v32 = vmul.f32 1.442695, %v720_v30  ;;  %v721_v33 = vsub.f32 %v4352_v34, %v689_v25 }
 0x3e8   :  { %3842 = vpow2.f32 %v742_v32  ;;  %v744_v35 = vmul.f32 1.442695, %v721_v33 }
 0x3ea   :  { %3844 = vpow2.f32 %v744_v35 }
 0x3eb   :  { %v698_v36 = vpop.xlane.xlu0 %697 }
 0x3ec   :  { %v724_v37 = vsub.f32 %v4358_v39, %v698_v36 }
 0x3ed   :  { %v701_v38 = vpop.xlane.xlu1 %700 }
 0x3ee   :  { %v750_v40 = vmul.f32 1.442695, %v724_v37  ;;  %v725_v41 = vsub.f32 %v4363_v43, %v701_v38 }
 0x3ef   :  { %v680_v44 = vpop.xlane.xlu0 %679 }
 0x3f0   :  { %3846 = vpow2.f32 %v750_v40  ;;  %v752_v45 = vmul.f32 1.442695, %v725_v41  ;;  %v718_v47 = vsub.f32 %v4360_v42, %v680_v44 }
 0x3f1   :  { %v683_v31 = vpop.xlane.xlu1 %682 }
 0x3f2   :  { %v4436_v49 = vpop.eup %3842  ;;  %3848 = vpow2.f32 %v752_v45  ;;  %v738_v34 = vmul.f32 1.442695, %v718_v47  ;;  %v719_v50 = vsub.f32 %v4368_v46, %v683_v31 }
 0x3f3   :  { %v692_v52 = vpop.xlane.xlu0 %691  ;;  %v780_v39 = vsel %vm665_vm2, %v4436_v49, 0.0 }
 0x3f4   :  { %v4441_v53 = vpop.eup %3844  ;;  %3850 = vpow2.f32 %v738_v34  ;;  %v740_v43 = vmul.f32 1.442695, %v719_v50  ;;  %v722_v54 = vsub.f32 %v4372_v48, %v692_v52  ;;  %781 = vadd.xlane.f32.xlu0 %v780_v39 }
 0x3f5   :  { %v695_v58 = vpop.xlane.xlu1 %694  ;;  %v783_v42 = vsel %vm665_vm2, %v4441_v53, 0.0 }
 0x3f6   :  { %3852 = vpow2.f32 %v740_v43  ;;  %v746_v60 = vmul.f32 1.442695, %v722_v54  ;;  %v723_v61 = vsub.f32 %v4377_v51, %v695_v58  ;;  %784 = vadd.xlane.f32.xlu1 %v783_v42 }
 0x3f7   :  { %v704_v46 = vpop.xlane.xlu0 %703 }
 0x3f8   :  { %3854 = vpow2.f32 %v746_v60  ;;  %v748_v63 = vmul.f32 1.442695, %v723_v61  ;;  %v726_v48 = vsub.f32 %v4381_v55, %v704_v46 }
 0x3f9   :  { %v4447_v0 = vpop.permute.xlu1 %404 }
 0x3fa   :  { %v4449_v1 = vpop.eup %3846  ;;  %3856 = vpow2.f32 %v748_v63  ;;  %v754_v14 = vmul.f32 1.442695, %v726_v48 }
 0x3fb   :  { %v710_v2 = vpop.xlane.xlu0 %709  ;;  %v792_v3 = vsel %vm665_vm2, %v4449_v1, 0.0 }
 0x3fc   :  { %v4454_v5 = vpop.eup %3848  ;;  %v728_v7 = vsub.f32 %v4387_v62, %v710_v2  ;;  %793 = vadd.xlane.f32.xlu0 %v792_v3 }
 0x3fd   :  { %v409_v51 = vpop.permute.xlu1 %408  ;;  %v795_v8 = vsel %vm665_vm2, %v4454_v5, 0.0 }
 0x3fe   :  { %v4459_v13 = vpop.eup %3850  ;;  %v758_v16 = vmul.f32 1.442695, %v728_v7  ;;  %3487 = vmatprep.subr.bf16.mxu0 %v409_v51  ;;  %796 = vadd.xlane.f32.xlu1 %v795_v8 }
 0x3ff   :  { %3488 = vmatpush3.bf16.msra.mxu0 %v409_v51  ;;  %v403_v55 = vpop.permute.xlu0 %402  ;;  %v774_v17 = vsel %vm665_vm2, %v4459_v13, 0.0 }
 0x400   :  { %v4463_v18 = vpop.eup %3852  ;;  %3858 = vpow2.f32 %v758_v16  ;;  %775 = vadd.xlane.f32.xlu0 %v774_v17  ;;  %3479 = vmatprep.subr.bf16.mxu1 %v403_v55 }
 0x401   :  { %v777_v62 = vsel %vm665_vm2, %v4463_v18, 0.0  ;;  %3860 = vpow2.f32 %v754_v14 }
 0x402   :  { %v4467_v19 = vpop.eup %3854  ;;  %778 = vadd.xlane.f32.xlu1 %v777_v62 }
 0x403   :  { %v786_v20 = vsel %vm665_vm2, %v4467_v19, 0.0 }
 0x404   :  { %v4471_v21 = vpop.eup %3856  ;;  %787 = vadd.xlane.f32.xlu0 %v786_v20 }
 0x405   :  { %v789_v23 = vsel %vm665_vm2, %v4471_v21, 0.0 }
 0x406   :  { %790 = vadd.xlane.f32.xlu1 %v789_v23 }
 0x40a   :  { %v4475_v24 = vpop.eup %3858 }
 0x40b   :  { %v804_v28 = vsel %vm665_vm2, %v4475_v24, 0.0  ;;  %v4479_v6 = vpop.eup %3860 }
 0x40c   :  { %805 = vadd.xlane.f32.xlu0 %v804_v28  ;;  %v798_v27 = vsel %vm665_vm2, %v4479_v6, 0.0 }
 0x410   :  { %799 = vadd.xlane.f32.xlu0 %v798_v27 }
 0x426   :  { %410 = vrot.lane.b32.xlu0 %v4243_v4, %s4065_s18 }
 0x42e   :  { %v713_v30 = vpop.xlane.xlu1 %712 }
 0x42f   :  { %v729_v25 = vsub.f32 %v4402_v10, %v713_v30 }
 0x430   :  { %v770_v10 = vpop.xlane.xlu0 %769 }
 0x431   :  { %v760_v32 = vmul.f32 1.442695, %v729_v25 }
 0x432   :  { %v707_v33 = vpop.xlane.xlu1 %706 }
 0x433   :  { %3862 = vpow2.f32 %v760_v32  ;;  %v727_v35 = vsub.f32 %v4407_v12, %v707_v33 }
 0x434   :  { %v764_v12 = vpop.xlane.xlu0 %763 }
 0x435   :  { %v756_v36 = vmul.f32 1.442695, %v727_v35 }
 0x436   :  { %v415_v44 = vpop.permute.xlu1 %414 }
 0x437   :  { %3864 = vpow2.f32 %v756_v36 }
 0x43d   :  { %v4487_v37 = vpop.eup %3862 }
 0x43e   :  { %v807_v38 = vsel %vm665_vm2, %v4487_v37, 0.0 }
 0x43f   :  { %808 = vadd.xlane.f32.xlu1 %v807_v38 }
 0x441   :  { %v4491_v40 = vpop.eup %3864 }
 0x442   :  { %v801_v41 = vsel %vm665_vm2, %v4491_v40, 0.0 }
 0x443   :  { %802 = vadd.xlane.f32.xlu1 %v801_v41 }
 0x454   :  { %416 = vrot.lane.b32.xlu1 %v4243_v4, %s4066_s19 }
 0x467   :  { %v773_v45 = vpop.xlane.xlu1 %772 }
 0x468   :  { %3866 = vrcp.f32 %v773_v45 }
 0x469   :  { %3868 = vrcp.f32 %v764_v12 }
 0x46a   :  { %3870 = vrcp.f32 %v770_v10 }
 0x46b   :  { %v767_v47 = vpop.xlane.xlu1 %766 }
 0x46c   :  { %3872 = vrcp.f32 %v767_v47 }
 0x472   :  { %v3867_v31 = vpop.eup %3866 }
 0x473   :  { %v3869_v34 = vpop.eup %3868  ;;  %v829_v39 = vmul.f32 %v3867_v31, %v4423_v26 }
 0x474   :  { %v3871_v50 = vpop.eup %3870  ;;  %v826_v43 = vmul.f32 %v3869_v34, %v4413_v15 }
 0x475   :  { %v828_v4 = vmul.f32 %v3871_v50, %v4404_v11 }
 0x476   :  { %v3873_v52 = vpop.eup %3872 }
 0x477   :  { %v827_v54 = vmul.f32 %v3873_v52, %v4427_v29  ;;  %v843_v42 = vpack.c.bf16 %v829_v39, %v828_v4  ;;  %v3760_v4 = vld [vmem:[%s5155_s6 + $0x10] sm:$0xff]  }
 0x479   :  { %v842_v58 = vpack.c.bf16 %v827_v54, %v826_v43 }
 0x47b   :  { %3475 = vmatprep.mubr.msk.bf16.mxu1 %vm665_vm2, %v842_v58 }
 0x47c   :  { %3476 = vmatmul.mubr.msk.bf16.vlgmr.msra.gmra.mrb[12].mxu1 %vm665_vm2, %v843_v42 }
 0x47d   :  { %3480 = vmatpush3.bf16.msra.mxu1 %v403_v55 }
 0x47e   :  { %3481 = vmatprep.subr.bf16.mxu1 %v4447_v0 }
 0x481   :  { %3482 = vmatpush3.bf16.msra.mxu1 %v4447_v0  ;;  %v782_v60 = vpop.xlane.xlu0 %781 }
 0x482   :  { %3495 = vmatprep.subr.bf16.mxu1 %v415_v44 }
 0x483   :  { %v785_v26 = vpop.xlane.xlu1 %784 }
 0x484   :  { %3874 = vrcp.f32 %v785_v26 }
 0x489   :  { %v794_v61 = vpop.xlane.xlu0 %793 }
 0x48b   :  { %v797_v15 = vpop.xlane.xlu1 %796 }
 0x48d   :  { %v776_v29 = vpop.xlane.xlu0 %775 }
 0x48e   :  { %3876 = vrcp.f32 %v776_v29  ;;  %v3875_v48 = vpop.eup %3874  ;;  %v3761_v29 = vld [vmem:[%s5155_s6 + $0x18] sm:$0xff]  }
 0x48f   :  { %3878 = vrcp.f32 %v782_v60  ;;  %v779_v11 = vpop.xlane.xlu1 %778  ;;  %v833_v51 = vmul.f32 %v3875_v48, %v4441_v53 }
 0x490   :  { %3880 = vrcp.f32 %v779_v11 }
 0x491   :  { %v788_v46 = vpop.xlane.xlu0 %787 }
 0x492   :  { %3882 = vrcp.f32 %v788_v46 }
 0x493   :  { %3884 = vrcp.f32 %v797_v15  ;;  %v791_v63 = vpop.xlane.xlu1 %790 }
 0x494   :  { %3886 = vrcp.f32 %v791_v63 }
 0x495   :  { %3888 = vrcp.f32 %v794_v61 }
 0x498   :  { %v3877_v2 = vpop.eup %3876 }
 0x499   :  { %v3879_v0 = vpop.eup %3878  ;;  %v806_v3 = vpop.xlane.xlu0 %805  ;;  %v830_v8 = vmul.f32 %v3877_v2, %v4459_v13 }
 0x49a   :  { %v3881_v7 = vpop.eup %3880  ;;  %v832_v55 = vmul.f32 %v3879_v0, %v4436_v49 }
 0x49b   :  { %v831_v14 = vmul.f32 %v3881_v7, %v4463_v18 }
 0x49c   :  { %v3883_v16 = vpop.eup %3882  ;;  %v845_v28 = vpack.c.bf16 %v833_v51, %v832_v55 }
 0x49d   :  { %v3885_v17 = vpop.eup %3884  ;;  %v800_v62 = vpop.xlane.xlu0 %799  ;;  %v844_v20 = vpack.c.bf16 %v831_v14, %v830_v8  ;;  %v834_v30 = vmul.f32 %v3883_v16, %v4467_v19 }
 0x49e   :  { %v3887_v23 = vpop.eup %3886  ;;  %v837_v53 = vmul.f32 %v3885_v17, %v4454_v5 }
 0x49f   :  { %v3889_v27 = vpop.eup %3888  ;;  %3483 = vmatprep.mubr.msk.bf16.mxu1 %vm665_vm2, %v844_v20  ;;  %v835_v25 = vmul.f32 %v3887_v23, %v4471_v21 }
 0x4a0   :  { %3484 = vmatmul.mubr.msk.bf16.vlgmr.msra.gmra.mrb[16].mxu1 %vm665_vm2, %v845_v28  ;;  %v836_v49 = vmul.f32 %v3889_v27, %v4449_v1 }
 0x4a1   :  { %3496 = vmatpush3.bf16.msra.mxu1 %v415_v44  ;;  %v411_v13 = vpop.permute.xlu0 %410  ;;  %v846_v18 = vpack.c.bf16 %v835_v25, %v834_v30 }
 0x4a2   :  { %3489 = vmatprep.subr.bf16.mxu0 %v411_v13  ;;  %v847_v32 = vpack.c.bf16 %v837_v53, %v836_v49 }
 0x4a3   :  { %3490 = vmatpush3.bf16.msra.mxu0 %v411_v13  ;;  %3491 = vmatprep.mubr.msk.bf16.mxu0 %vm665_vm2, %v846_v18 }
 0x4a6   :  { %3492 = vmatmul.mubr.msk.bf16.vlgmr.msra.gmra.mrb[16].mxu0 %vm665_vm2, %v847_v32 }
 0x4cc   :  { %v809_v33 = vpop.xlane.xlu1 %808 }
 0x4cd   :  { %3890 = vrcp.f32 %v809_v33 }
 0x4ce   :  { %3892 = vrcp.f32 %v800_v62 }
 0x4cf   :  { %3894 = vrcp.f32 %v806_v3 }
 0x4d0   :  { %v803_v19 = vpop.xlane.xlu1 %802 }
 0x4d1   :  { %3896 = vrcp.f32 %v803_v19 }
 0x4d4   :  { %v417_v5 = vpop.permute.xlu1 %416 }
 0x4d5   :  { %3497 = vmatprep.subr.bf16.mxu1 %v417_v5 }
 0x4d6   :  { %3498 = vmatpush3.bf16.msra.mxu1 %v417_v5 }
 0x4d7   :  { %v3891_v21 = vpop.eup %3890 }
 0x4d8   :  { %v3893_v35 = vpop.eup %3892  ;;  %v841_v38 = vmul.f32 %v3891_v21, %v4487_v37 }
 0x4d9   :  { %v3895_v36 = vpop.eup %3894  ;;  %v838_v41 = vmul.f32 %v3893_v35, %v4479_v6  ;;  %v3758_v6 = vld [vmem:[%s5155_s6] sm:$0xff]  }
 0x4da   :  { %v840_v44 = vmul.f32 %v3895_v36, %v4475_v24  ;;  %v3759_v24 = vld [vmem:[%s5155_s6 + $0x8] sm:$0xff]   ;;  %3503 = vmatprep.subr.bf16.mxu0 %v3758_v6 }
 0x4db   :  { %v3897_v1 = vpop.eup %3896  ;;  %3504 = vmatpush3.bf16.msra.mxu0 %v3758_v6 }
 0x4dc   :  { %v839_v10 = vmul.f32 %v3897_v1, %v4491_v40  ;;  %v849_v45 = vpack.c.bf16 %v841_v38, %v840_v44  ;;  %3505 = vmatprep.subr.bf16.mxu0 %v3759_v24 }
 0x4de   :  { %v848_v12 = vpack.c.bf16 %v839_v10, %v838_v41 }
 0x4df   :  { %3506 = vmatpush3.bf16.msra.mxu0 %v3759_v24  ;;  %v4028_v24 = vld [vmem:[%s5149_s0 + $0x8] sm:$0xff] }
 0x4e0   :  { %3499 = vmatprep.mubr.msk.bf16.mxu1 %vm665_vm2, %v848_v12  ;;  %3507 = vmatprep.subr.bf16.mxu0 %v3760_v4 }
 0x4e1   :  { %3500 = vmatmul.mubr.msk.bf16.vlgmr.msra.gmra.mrb[20].mxu1 %vm665_vm2, %v849_v45 }
 0x4e2   :  { %1355 = vmatprep.mubr.bf16.mxu1 %v4062_v22 }
 0x4e3   :  { %3508 = vmatpush3.bf16.msra.mxu0 %v3760_v4 }
 0x4e4   :  { %3509 = vmatprep.subr.bf16.mxu0 %v3761_v29 }
 0x4e7   :  { %3510 = vmatpush3.bf16.msra.mxu0 %v3761_v29  ;;  %v3764_v29 = vld [vmem:[%s5157_s8 + $0x4] ss:$8 sps:$4 sm:$0xff]  }
 0x4e8   :  { %1323 = vmatprep.subr.bf16.mxu1 %v3764_v29 }
 0x54f   :  { %v3477_v47 = vpop.f32.mrb[12].mxu1 }
 0x550   :  { %v890_v31 = vpop.f32.mrb[13].mxu1 }
 0x551   :  { %v3478_v34 = vpop.f32.mrb[14].mxu1 }
 0x552   :  { %v893_v50 = vpop.f32.mrb[15].mxu1 }
 0x573   :  { %v3485_v52 = vpop.f32.mrb[16].mxu1 }
 0x574   :  { %v945_v37 = vpop.f32.mrb[17].mxu1 }
 0x575   :  { %v3486_v40 = vpop.f32.mrb[18].mxu1 }
 0x576   :  { %v3682_v39 = vpack.i.bf16 %v3486_v40, %v3485_v52  ;;  %v948_v43 = vpop.f32.mrb[19].mxu1 }
 0x577   :  { %v3692_v54 = vpack.i.bf16 %v948_v43, %v945_v37  ;;  %v4029_v43 = vld [vmem:[%s5149_s0 + $0x18] sm:$0xff] }
 0x578   :  { %3683 = vrot.lane.b32.xlu1 %v3682_v39, %s4067_s14 }
 0x579   :  { %3693 = vrot.lane.b32.xlu0 %v3692_v54, %s4067_s14  ;;  %v3493_v58 = vpop.f32.mrb[16].mxu0 }
 0x57a   :  { %v1000_v42 = vpop.f32.mrb[17].mxu0 }
 0x57b   :  { %v3494_v60 = vpop.f32.mrb[18].mxu0 }
 0x57c   :  { %v3687_v26 = vpack.i.bf16 %v3494_v60, %v3493_v58  ;;  %v1003_v61 = vpop.f32.mrb[19].mxu0 }
 0x57d   :  { %v3697_v15 = vpack.i.bf16 %v1003_v61, %v1000_v42 }
 0x57e   :  { %3688 = vrot.lane.b32.xlu1 %v3687_v26, %s4068_s20 }
 0x57f   :  { %3698 = vrot.lane.b32.xlu0 %v3697_v15, %s4068_s20 }
 0x5b4   :  { %v3501_v11 = vpop.f32.mrb[20].mxu1 }
 0x5b5   :  { %v1055_v46 = vpop.f32.mrb[21].mxu1 }
 0x5b6   :  { %v3502_v63 = vpop.f32.mrb[22].mxu1 }
 0x5b7   :  { %v3707_v48 = vpack.i.bf16 %v3502_v63, %v3501_v11  ;;  %v1058_v2 = vpop.f32.mrb[23].mxu1  ;;  %v3762_v11 = vld [vmem:[%s5157_s8] ss:$8 sps:$4 sm:$0xff]   ;;  %v3765_v63 = vld [vmem:[%s5157_s8 + $0x10] ss:$8 sps:$4 sm:$0xff]  }
 0x5b8   :  { %v3702_v0 = vpack.i.bf16 %v1058_v2, %v1055_v46  ;;  %1324 = vmatpush1.bf16.msra.mxu1 %v3762_v11  ;;  %v3767_v46 = vld [vmem:[%s5157_s8 + $0x14] ss:$8 sps:$4 sm:$0xff]   ;;  %v3768_v2 = vld [vmem:[%s5157_s8 + $0x20] ss:$8 sps:$4 sm:$0xff]  }
 0x5b9   :  { %3708 = vrot.lane.b32.xlu1 %v3707_v48, %s4069_s24  ;;  %1325 = vmatprep.subr.bf16.mxu1 %v3767_v46  ;;  %v3770_v48 = vld [vmem:[%s5157_s8 + $0x24] ss:$8 sps:$4 sm:$0xff]  }
 0x5ba   :  { %3703 = vrot.lane.b32.xlu0 %v3702_v0, %s4069_s24  ;;  %v3771_v0 = vld [vmem:[%s5157_s8 + $0x30] ss:$8 sps:$4 sm:$0xff]  }
 0x5bc   :  { %1326 = vmatpush1.bf16.msra.mxu1 %v3765_v63 }
 0x5bd   :  { %1327 = vmatprep.subr.bf16.mxu1 %v3770_v48 }
 0x5c0   :  { %1328 = vmatpush1.bf16.msra.mxu1 %v3768_v2 }
 0x5ea   :  { %v3684_v3 = vpop.permute.xlu1 %3683 }
 0x5eb   :  { %v3694_v7 = vpop.permute.xlu0 %3693  ;;  %v3686_v8 = vunpack.i.h.bf16 %v3684_v3  ;;  %v3685_v14 = vunpack.i.l.bf16 %v3684_v3  ;;  %v3773_v3 = vld [vmem:[%s5157_s8 + $0x34] ss:$8 sps:$4 sm:$0xff]  }
 0x5ec   :  { %v3696_v55 = vunpack.i.h.bf16 %v3694_v7  ;;  %v3695_v17 = vunpack.i.l.bf16 %v3694_v7  ;;  %1329 = vmatprep.subr.bf16.mxu1 %v3773_v3 }
 0x5ed   :  { %v1121_v27 = vsel %vm420_vm1, %v3478_v34, %v3686_v8  ;;  %v1120_v30 = vsel %vm420_vm1, %v3477_v47, %v3685_v14  ;;  %1330 = vmatpush1.bf16.msra.mxu1 %v3771_v0 }
 0x5ee   :  { %v1119_v53 = vsel %vm420_vm1, %v893_v50, %v3696_v55  ;;  %v1118_v13 = vsel %vm420_vm1, %v890_v31, %v3695_v17  ;;  %v4026_v31 = vld [vmem:[%s5149_s0 + $0x10] sm:$0xff]  ;;  %v4027_v50 = vld [vmem:[%s5149_s0] sm:$0xff] }
 0x5f0   :  { %v3689_v51 = vpop.permute.xlu1 %3688 }
 0x5f1   :  { %v3699_v16 = vpop.permute.xlu0 %3698  ;;  %v3691_v62 = vunpack.i.h.bf16 %v3689_v51  ;;  %v3690_v20 = vunpack.i.l.bf16 %v3689_v51 }
 0x5f2   :  { %v3701_v23 = vunpack.i.h.bf16 %v3699_v16  ;;  %v3700_v28 = vunpack.i.l.bf16 %v3699_v16 }
 0x5f3   :  { %v1125_v33 = vsel %vm665_vm2, %v1121_v27, %v3691_v62  ;;  %v1124_v19 = vsel %vm665_vm2, %v1120_v30, %v3690_v20 }
 0x5f4   :  { %v1122_v35 = vsel %vm665_vm2, %v1118_v13, %v3700_v28  ;;  %v1123_v36 = vsel %vm665_vm2, %v1119_v53, %v3701_v23  ;;  %v3171_v13 = vld [vmem:[%s5156_s7] ss:$0 sm:$0xff] }
 0x62b   :  { %v3709_v25 = vpop.permute.xlu1 %3708 }
 0x62c   :  { %v3711_v18 = vunpack.i.h.bf16 %v3709_v25  ;;  %v3710_v49 = vunpack.i.l.bf16 %v3709_v25  ;;  %v3704_v32 = vpop.permute.xlu0 %3703 }
 0x62d   :  { %v3706_v5 = vunpack.i.h.bf16 %v3704_v32  ;;  %v3705_v21 = vunpack.i.l.bf16 %v3704_v32 }
 0x62e   :  { %v1129_v1 = vsel %vm1126_vm3, %v1124_v19, %v3710_v49  ;;  %v1130_v38 = vsel %vm1126_vm3, %v1125_v33, %v3711_v18 }
 0x62f   :  { %v1132_v41 = vpack.c.bf16 %v1130_v38, %v1129_v1  ;;  %v1127_v10 = vsel %vm1126_vm3, %v1122_v35, %v3705_v21  ;;  %v1128_v44 = vsel %vm1126_vm3, %v1123_v36, %v3706_v5 }
 0x630   :  { %v1131_v12 = vpack.c.bf16 %v1128_v44, %v1127_v10  ;;  %v3775_v10 = vld [vmem:[%s5158_s9 + $0x8] sm:$0xff]   ;;  %v3776_v44 = vld [vmem:[%s5158_s9 + $0x10] sm:$0xff]  }
 0x632   :  { %3511 = vmatprep.mubr.msk.bf16.mxu0 %vm64_vm0, %v1131_v12  ;;  %v3777_v12 = vld [vmem:[%s5158_s9 + $0x18] sm:$0xff]  }
 0x633   :  { %3512 = vmatmul.mubr.msk.bf16.vlgmr.msra.gmra.mrb[20].mxu0 %vm64_vm0, %v1132_v41  ;;  %v3774_v41 = vld [vmem:[%s5158_s9] sm:$0xff]  }
 0x634   :  { %3515 = vmatprep.subr.bf16.mxu0 %v3774_v41 }
 0x635   :  { %3516 = vmatpush3.bf16.msra.mxu0 %v3774_v41  ;;  %v3782_v41 = vld [vmem:[%s5154_s5 + $0x60] ss:$12 sps:$4 sm:$0xff]  }
 0x636   :  { %3517 = vmatprep.subr.bf16.mxu0 %v3775_v10 }
 0x639   :  { %3518 = vmatpush3.bf16.msra.mxu0 %v3775_v10  ;;  %v3787_v10 = vld [vmem:[%s5154_s5 + $0x7c] ss:$12 sps:$4 sm:$0xff]  }
 0x63a   :  { %3519 = vmatprep.subr.bf16.mxu0 %v3776_v44 }
 0x63d   :  { %3520 = vmatpush3.bf16.msra.mxu0 %v3776_v44  ;;  %v3785_v44 = vld [vmem:[%s5154_s5 + $0x78] ss:$12 sps:$4 sm:$0xff]  }
 0x63e   :  { %3521 = vmatprep.subr.bf16.mxu0 %v3777_v12 }
 0x641   :  { %3522 = vmatpush3.bf16.msra.mxu0 %v3777_v12  ;;  %v3790_v12 = vld [vmem:[%s5154_s5 + $0x94] ss:$12 sps:$4 sm:$0xff]  }
 0x706   :  { %v3513_v45 = vpop.f32.mrb[20].mxu0 }
 0x707   :  { %v1205_v47 = vpop.f32.mrb[21].mxu0  ;;  %v4559_v34 = vadd.f32 %v4026_v31, %v3513_v45  ;;  %v3778_v45 = vld [vmem:[%s5158_s9 + $0x20] sm:$0xff]   ;;  %v3780_v31 = vld [vmem:[%s5158_s9 + $0x30] sm:$0xff]  }
 0x708   :  { %v4564_v52 = vadd.f32 %v4027_v50, %v1205_v47  ;;  %v3514_v37 = vpop.f32.mrb[22].mxu0  ;;  %3523 = vmatprep.subr.bf16.mxu0 %v3778_v45  ;;  %v3779_v47 = vld [vmem:[%s5158_s9 + $0x28] sm:$0xff]   ;;  %v3781_v50 = vld [vmem:[%s5158_s9 + $0x38] sm:$0xff]  }
 0x709   :  { %v1208_v6 = vpop.f32.mrb[23].mxu0  ;;  %v4576_v54 = vadd.f32 %v4029_v43, %v3514_v37  ;;  %v1227_v42 = vmul.f32 %v4559_v34, %v4559_v34  ;;  %3524 = vmatpush3.bf16.msra.mxu0 %v3778_v45  ;;  %v3788_v45 = vld [vmem:[%s5154_s5 + $0x90] ss:$12 sps:$4 sm:$0xff]  }
 0x70a   :  { %v4569_v40 = vadd.f32 %v4028_v24, %v1208_v6  ;;  %v1225_v39 = vmul.f32 %v4564_v52, %v4564_v52  ;;  %3525 = vmatprep.subr.bf16.mxu0 %v3779_v47 }
 0x70b   :  { %v1235_v26 = vsel %vm64_vm0, %v1227_v42, 0.0  ;;  %v1228_v61 = vmul.f32 %v4576_v54, %v4576_v54 }
 0x70c   :  { %v1229_v4 = vsel %vm64_vm0, %v1225_v39, 0.0  ;;  %v1226_v58 = vmul.f32 %v4569_v40, %v4569_v40 }
 0x70d   :  { %1230 = vadd.xlane.f32.xlu0 %v1229_v4  ;;  %v1238_v15 = vsel %vm64_vm0, %v1228_v61, 0.0  ;;  %3526 = vmatpush3.bf16.msra.mxu0 %v3779_v47  ;;  %v3793_v47 = vld [vmem:[%s5154_s5 + $0xac] ss:$12 sps:$4 sm:$0xff]  }
 0x70e   :  { %v1232_v60 = vsel %vm64_vm0, %v1226_v58, 0.0  ;;  %3527 = vmatprep.subr.bf16.mxu0 %v3780_v31 }
 0x70f   :  { %1233 = vadd.xlane.f32.xlu1 %v1232_v60 }
 0x711   :  { %1236 = vadd.xlane.f32.xlu0 %v1235_v26  ;;  %3528 = vmatpush3.bf16.msra.mxu0 %v3780_v31  ;;  %v3791_v31 = vld [vmem:[%s5154_s5 + $0xa8] ss:$12 sps:$4 sm:$0xff]  }
 0x712   :  { %3529 = vmatprep.subr.bf16.mxu0 %v3781_v50 }
 0x715   :  { %1239 = vadd.xlane.f32.xlu0 %v1238_v15  ;;  %3530 = vmatpush3.bf16.msra.mxu0 %v3781_v50  ;;  %v3794_v50 = vld [vmem:[%s5154_s5 + $0x68] ss:$12 sps:$4 sm:$0xff]  }
 0x79a   :  { %v1231_v7 = vpop.xlane.xlu0 %1230 }
 0x79b   :  { %v1241_v51 = vmul.f32 0.015625, %v1231_v7 }
 0x79c   :  { %v1234_v8 = vpop.xlane.xlu1 %1233 }
 0x79d   :  { %v1245_v14 = vadd.f32 1e-06, %v1241_v51  ;;  %v1242_v16 = vmul.f32 0.015625, %v1234_v8 }
 0x79e   :  { %v1237_v55 = vpop.xlane.xlu0 %1236 }
 0x79f   :  { %3898 = vrsqrt.f32 %v1245_v14  ;;  %v1246_v17 = vadd.f32 1e-06, %v1242_v16  ;;  %v1243_v62 = vmul.f32 0.015625, %v1237_v55 }
 0x7a1   :  { %3900 = vrsqrt.f32 %v1246_v17  ;;  %v1247_v20 = vadd.f32 1e-06, %v1243_v62 }
 0x7a2   :  { %v1240_v23 = vpop.xlane.xlu0 %1239 }
 0x7a3   :  { %v1244_v28 = vmul.f32 0.015625, %v1240_v23  ;;  %3902 = vrsqrt.f32 %v1247_v20 }
 0x7a5   :  { %v1248_v27 = vadd.f32 1e-06, %v1244_v28 }
 0x7a7   :  { %3904 = vrsqrt.f32 %v1248_v27 }
 0x7a9   :  { %v3899_v30 = vpop.eup %3898 }
 0x7aa   :  { %v1253_v25 = vmul.f32 %v3899_v30, %v4564_v52 }
 0x7ab   :  { %v3901_v53 = vpop.eup %3900 }
 0x7ac   :  { %v1254_v18 = vmul.f32 %v3901_v53, %v4569_v40  ;;  %v1263_v49 = vmul.f32 %v3171_v13, %v1253_v25 }
 0x7ad   :  { %v3903_v33 = vpop.eup %3902 }
 0x7ae   :  { %v1264_v32 = vmul.f32 %v3171_v13, %v1254_v18  ;;  %v1255_v21 = vmul.f32 %v3903_v33, %v4559_v34 }
 0x7b0   :  { %v1267_v19 = vpack.c.bf16 %v1264_v32, %v1263_v49  ;;  %v1265_v1 = vmul.f32 %v3171_v13, %v1255_v21 }
 0x7b1   :  { %v3905_v5 = vpop.eup %3904 }
 0x7b2   :  { %3180 = vmatmul.mubr.msk.bf16.vlgmr.msra.gmra.mrb[24].mxu1 %vm64_vm0, %v1267_v19  ;;  %v1256_v35 = vmul.f32 %v3905_v5, %v4576_v54 }
 0x7b3   :  { %1365 = vmatprep.mubr.bf16.mxu1 %v4062_v22 }
 0x7b4   :  { %v1266_v36 = vmul.f32 %v3171_v13, %v1256_v35 }
 0x7b6   :  { %v1268_v38 = vpack.c.bf16 %v1266_v36, %v1265_v1 }
 0x7ba   :  { %3181 = vmatmul.mubr.msk.bf16.gmra.mrb[28].mxu1 %vm64_vm0, %v1268_v38  ;;  %v3784_v38 = vld [vmem:[%s5154_s5 + $0x64] ss:$12 sps:$4 sm:$0xff]  }
 0x7bb   :  { %1692 = vmatprep.mubr.bf16.mxu1 %v4062_v22  ;;  %1660 = vmatprep.subr.bf16.mxu1 %v3784_v38 }
 0x7bc   :  { %1661 = vmatpush1.bf16.msra.mxu1 %v3782_v41 }
 0x7bd   :  { %1662 = vmatprep.subr.bf16.mxu1 %v3787_v10 }
 0x7c0   :  { %1663 = vmatpush1.bf16.msra.mxu1 %v3785_v44 }
 0x7c1   :  { %1664 = vmatprep.subr.bf16.mxu1 %v3790_v12 }
 0x7c4   :  { %1665 = vmatpush1.bf16.msra.mxu1 %v3788_v45  ;;  %v4030_v45 = vld [vmem:[%s5150_s1] sm:$0xff] }
 0x7c5   :  { %1666 = vmatprep.subr.bf16.mxu1 %v3793_v47 }
 0x7c8   :  { %1667 = vmatpush1.bf16.msra.mxu1 %v3791_v31 }
 0x7c9   :  { %3535 = vmatprep.subr.bf16.mxu1 %v3794_v50 }
 0x885   :  { %v1357_v37 = vpop.f32.mrb[24].mxu1 }
 0x886   :  { %v3182_v6 = vmul.f32 -1.442695, %v1357_v37  ;;  %v1359_v24 = vpop.f32.mrb[25].mxu1 }
 0x887   :  { %v1361_v39 = vpop.f32.mrb[26].mxu1 }
 0x888   :  { %3906 = vpow2.f32 %v3182_v6  ;;  %v3183_v43 = vmul.f32 -1.442695, %v1361_v39  ;;  %v1363_v4 = vpop.f32.mrb[27].mxu1 }
 0x88a   :  { %3908 = vpow2.f32 %v3183_v43 }
 0x88d   :  { %v1367_v58 = vpop.f32.mrb[28].mxu1 }
 0x88e   :  { %v3184_v42 = vmul.f32 -1.442695, %v1367_v58  ;;  %v1369_v60 = vpop.f32.mrb[29].mxu1 }
 0x88f   :  { %v1371_v26 = vpop.f32.mrb[30].mxu1 }
 0x890   :  { %3910 = vpow2.f32 %v3184_v42  ;;  %v3185_v61 = vmul.f32 -1.442695, %v1371_v26  ;;  %v1373_v15 = vpop.f32.mrb[31].mxu1 }
 0x892   :  { %v3907_v29 = vpop.eup %3906  ;;  %3912 = vpow2.f32 %v3185_v61 }
 0x893   :  { %v1388_v11 = vadd.f32 1.0, %v3907_v29 }
 0x894   :  { %v3909_v46 = vpop.eup %3908 }
 0x895   :  { %3914 = vrcp.f32 %v1388_v11  ;;  %v1389_v63 = vadd.f32 1.0, %v3909_v46 }
 0x897   :  { %3916 = vrcp.f32 %v1389_v63  ;;  %v3195_v63 = vld [vmem:[%s5153_s4 + $0x1] ss:$0 sm:$0xff] }
 0x89a   :  { %v3911_v48 = vpop.eup %3910 }
 0x89b   :  { %v1390_v2 = vadd.f32 1.0, %v3911_v48 }
 0x89c   :  { %v3913_v0 = vpop.eup %3912 }
 0x89d   :  { %3918 = vrcp.f32 %v1390_v2  ;;  %v1391_v3 = vadd.f32 1.0, %v3913_v0 }
 0x89f   :  { %v3915_v7 = vpop.eup %3914  ;;  %3920 = vrcp.f32 %v1391_v3 }
 0x8a0   :  { %v1400_v51 = vmul.f32 %v3915_v7, %v1357_v37 }
 0x8a1   :  { %v3917_v8 = vpop.eup %3916 }
 0x8a2   :  { %v1404_v14 = vmul.f32 %v1400_v51, %v1359_v24  ;;  %v1401_v16 = vmul.f32 %v3917_v8, %v1361_v39  ;;  %v3795_v8 = vld [vmem:[%s5154_s5 + $0x80] ss:$12 sps:$4 sm:$0xff]  }
 0x8a4   :  { %v1405_v55 = vmul.f32 %v1401_v16, %v1363_v4 }
 0x8a6   :  { %v1408_v17 = vpack.c.bf16 %v1405_v55, %v1404_v14 }
 0x8a7   :  { %v3919_v62 = vpop.eup %3918 }
 0x8a8   :  { %v1402_v20 = vmul.f32 %v3919_v62, %v1367_v58  ;;  %3531 = vmatprep.mubr.bf16.mxu0 %v1408_v17  ;;  %v3796_v17 = vld [vmem:[%s5154_s5 + $0x98] ss:$12 sps:$4 sm:$0xff]  }
 0x8a9   :  { %v3921_v23 = vpop.eup %3920 }
 0x8aa   :  { %v1406_v28 = vmul.f32 %v1402_v20, %v1369_v60  ;;  %v1403_v27 = vmul.f32 %v3921_v23, %v1371_v26  ;;  %v3797_v23 = vld [vmem:[%s5154_s5 + $0xb0] ss:$12 sps:$4 sm:$0xff]  }
 0x8ac   :  { %v1407_v30 = vmul.f32 %v1403_v27, %v1373_v15 }
 0x8ae   :  { %v1409_v25 = vpack.c.bf16 %v1407_v30, %v1406_v28 }
 0x8b0   :  { %3532 = vmatmul.mubr.bf16.vlgmr.msra.gmra.mrb[24].mxu0 %v1409_v25 }
 0x983   :  { %v3533_v53 = vpop.f32.mrb[24].mxu0 }
 0x984   :  { %v1508_v13 = vpop.f32.mrb[25].mxu0  ;;  %v4648_v18 = vadd.f32 %v3533_v53, %v4559_v34 }
 0x985   :  { %v4651_v49 = vadd.f32 %v1508_v13, %v4564_v52  ;;  %v3534_v32 = vpop.f32.mrb[26].mxu0 }
 0x986   :  { %v1511_v33 = vpop.f32.mrb[27].mxu0  ;;  %v4654_v19 = vadd.f32 %v3534_v32, %v4576_v54  ;;  %v1531_v52 = vmul.f32 %v4648_v18, %v4648_v18 }
 0x987   :  { %v4657_v5 = vadd.f32 %v1511_v33, %v4569_v40  ;;  %v1529_v21 = vmul.f32 %v4651_v49, %v4651_v49 }
 0x988   :  { %v1532_v54 = vmul.f32 %v4654_v19, %v4654_v19  ;;  %v1539_v40 = vsel %vm64_vm0, %v1531_v52, 0.0 }
 0x989   :  { %v1533_v35 = vsel %vm64_vm0, %v1529_v21, 0.0  ;;  %v1530_v34 = vmul.f32 %v4657_v5, %v4657_v5 }
 0x98a   :  { %1534 = vadd.xlane.f32.xlu0 %v1533_v35  ;;  %v1542_v1 = vsel %vm64_vm0, %v1532_v54, 0.0 }
 0x98b   :  { %v1536_v36 = vsel %vm64_vm0, %v1530_v34, 0.0 }
 0x98c   :  { %1537 = vadd.xlane.f32.xlu1 %v1536_v36 }
 0x98e   :  { %1540 = vadd.xlane.f32.xlu0 %v1539_v40 }
 0x990   :  { %1543 = vadd.xlane.f32.xlu1 %v1542_v1 }
 0xa17   :  { %v1535_v37 = vpop.xlane.xlu0 %1534 }
 0xa18   :  { %v1545_v6 = vmul.f32 0.015625, %v1535_v37 }
 0xa19   :  { %v1538_v24 = vpop.xlane.xlu1 %1537 }
 0xa1a   :  { %v1549_v39 = vadd.f32 1e-06, %v1545_v6  ;;  %v1546_v43 = vmul.f32 0.015625, %v1538_v24 }
 0xa1b   :  { %v1541_v4 = vpop.xlane.xlu0 %1540 }
 0xa1c   :  { %3922 = vrsqrt.f32 %v1549_v39  ;;  %v1550_v58 = vadd.f32 1e-06, %v1546_v43  ;;  %v1547_v42 = vmul.f32 0.015625, %v1541_v4  ;;  %v4032_v43 = vld [vmem:[%s5150_s1 + $0x10] sm:$0xff] }
 0xa1d   :  { %v1544_v60 = vpop.xlane.xlu1 %1543 }
 0xa1e   :  { %3924 = vrsqrt.f32 %v1550_v58  ;;  %v1551_v26 = vadd.f32 1e-06, %v1547_v42  ;;  %v1548_v61 = vmul.f32 0.015625, %v1544_v60  ;;  %v4033_v58 = vld [vmem:[%s5150_s1 + $0x18] sm:$0xff] }
 0xa20   :  { %v1552_v15 = vadd.f32 1e-06, %v1548_v61  ;;  %3926 = vrsqrt.f32 %v1551_v26 }
 0xa22   :  { %3928 = vrsqrt.f32 %v1552_v15 }
 0xa26   :  { %v3923_v29 = vpop.eup %3922 }
 0xa27   :  { %v1557_v11 = vmul.f32 %v3923_v29, %v4651_v49 }
 0xa28   :  { %v3925_v46 = vpop.eup %3924 }
 0xa29   :  { %v1558_v48 = vmul.f32 %v3925_v46, %v4657_v5  ;;  %v1567_v0 = vmul.f32 %v3195_v63, %v1557_v11 }
 0xa2a   :  { %v3927_v2 = vpop.eup %3926 }
 0xa2b   :  { %v1568_v3 = vmul.f32 %v3195_v63, %v1558_v48  ;;  %v1559_v16 = vmul.f32 %v3927_v2, %v4648_v18 }
 0xa2c   :  { %v3929_v7 = vpop.eup %3928 }
 0xa2d   :  { %v1571_v51 = vpack.c.bf16 %v1568_v3, %v1567_v0  ;;  %v1560_v14 = vmul.f32 %v3929_v7, %v4654_v19  ;;  %v1569_v62 = vmul.f32 %v3195_v63, %v1559_v16 }
 0xa2f   :  { %3224 = vmatmul.mubr.msk.bf16.vlgmr.msra.gmra.mrb[32].mxu1 %vm64_vm0, %v1571_v51  ;;  %v1570_v55 = vmul.f32 %v3195_v63, %v1560_v14 }
 0xa30   :  { %3536 = vmatpush3.bf16.msra.mxu1 %v3794_v50  ;;  %1702 = vmatprep.mubr.bf16.mxu1 %v4062_v22 }
 0xa31   :  { %3537 = vmatprep.subr.bf16.mxu1 %v3795_v8  ;;  %v1572_v20 = vpack.c.bf16 %v1570_v55, %v1569_v62 }
 0xa34   :  { %3538 = vmatpush3.bf16.msra.mxu1 %v3795_v8 }
 0xa35   :  { %3539 = vmatprep.subr.bf16.mxu1 %v3796_v17 }
 0xa37   :  { %3225 = vmatmul.mubr.msk.bf16.gmra.mrb[36].mxu1 %vm64_vm0, %v1572_v20 }
 0xa38   :  { %3540 = vmatpush3.bf16.msra.mxu1 %v3796_v17  ;;  %3543 = vmatprep.mubr.msk.bf16.mxu1 %vm64_vm0, %v1571_v51 }
 0xa39   :  { %3541 = vmatprep.subr.bf16.mxu1 %v3797_v23 }
 0xa3c   :  { %3542 = vmatpush3.bf16.msra.mxu1 %v3797_v23 }
 0xa3f   :  { %3544 = vmatmul.mubr.msk.bf16.vlgmr.msra.gmra.mrb[40].mxu1 %vm64_vm0, %v1572_v20 }
 0xb02   :  { %v1694_v28 = vpop.f32.mrb[32].mxu1 }
 0xb03   :  { %v1696_v27 = vpop.f32.mrb[33].mxu1  ;;  %v1766_v32 = vmul.f32 %v1694_v28, %v4237_v57  ;;  %v1762_v29 = vmul.f32 %v4030_v45, %v1694_v28 }
 0xb04   :  { %v1796_v30 = vmul.f32 %v1696_v27, %v4237_v57  ;;  %v1698_v25 = vpop.f32.mrb[34].mxu1  ;;  %v1792_v47 = vmul.f32 %v4030_v45, %v1696_v27 }
 0xb05   :  { %v1700_v53 = vpop.f32.mrb[35].mxu1  ;;  %v1767_v1 = vmul.f32 %v1698_v25, %v4235_v56 }
 0xb06   :  { %v1797_v13 = vmul.f32 %v1700_v53, %v4235_v56  ;;  %1804 = vrot.lane.b32.xlu0 %v1796_v30, %s4063_s21  ;;  %v4031_v56 = vld [vmem:[%s5150_s1 + $0x8] sm:$0xff] }
 0xb07   :  { %v1793_v31 = vmul.f32 %v4031_v56, %v1700_v53  ;;  %v1763_v11 = vmul.f32 %v4031_v56, %v1698_v25 }
 0xb08   :  { %1806 = vrot.lane.b32.xlu1 %v1797_v13, %s4063_s21 }
 0xb0a   :  { %1774 = vrot.lane.b32.xlu0 %v1766_v32, %s4063_s21  ;;  %v1704_v33 = vpop.f32.mrb[36].mxu1 }
 0xb0b   :  { %v1768_v21 = vmul.f32 %v1704_v33, %v4239_v59  ;;  %v1706_v35 = vpop.f32.mrb[37].mxu1  ;;  %v1764_v7 = vmul.f32 %v4032_v43, %v1704_v33 }
 0xb0c   :  { %v1798_v34 = vmul.f32 %v1706_v35, %v4239_v59  ;;  %v1708_v52 = vpop.f32.mrb[38].mxu1  ;;  %v1794_v4 = vmul.f32 %v4032_v43, %v1706_v35 }
 0xb0d   :  { %v1710_v36 = vpop.f32.mrb[39].mxu1  ;;  %v1769_v59 = vmul.f32 %v1708_v52, %v4249_v9  ;;  %v1765_v51 = vmul.f32 %v4033_v58, %v1708_v52 }
 0xb0e   :  { %1778 = vrot.lane.b32.xlu0 %v1768_v21, %s4063_s21  ;;  %1808 = vrot.lane.b32.xlu1 %v1798_v34, %s4063_s21  ;;  %v1799_v54 = vmul.f32 %v1710_v36, %v4249_v9  ;;  %v1795_v42 = vmul.f32 %v4033_v58, %v1710_v36 }
 0xb12   :  { %1810 = vrot.lane.b32.xlu1 %v1799_v54, %s4063_s21  ;;  %v3545_v57 = vpop.f32.mrb[40].mxu1 }
 0xb13   :  { %v1747_v40 = vpop.f32.mrb[41].mxu1 }
 0xb14   :  { %v3546_v38 = vpop.f32.mrb[42].mxu1 }
 0xb15   :  { %v4732_v41 = vpack.c.bf16 %v3546_v38, %v3545_v57  ;;  %v1750_v10 = vpop.f32.mrb[43].mxu1 }
 0xb16   :  { %v4734_v44 = vpack.c.bf16 %v1750_v10, %v1747_v40  ;;  %1776 = vrot.lane.b32.xlu1 %v1767_v1, %s4063_s21  ;;  %v4034_v1 = vld [vmem:[%s5152_s3 + $0x10] sm:$0xff] }
 0xb1a   :  { %1780 = vrot.lane.b32.xlu1 %v1769_v59, %s4063_s21 }
 0xb78   :  { %v1805_v12 = vpop.permute.xlu0 %1804 }
 0xb79   :  { %v1816_v37 = vadd.f32 %v1805_v12, %v1792_v47  ;;  %v4035_v12 = vld [vmem:[%s5152_s3] sm:$0xff] }
 0xb7a   :  { %v1807_v50 = vpop.permute.xlu1 %1806 }
 0xb7b   :  { %v1817_v6 = vadd.f32 %v1807_v50, %v1793_v31  ;;  %v4806_v31 = vld [vmem:[%s5152_s3 + $0x8] sm:$0xff] }
 0xb7c   :  { %v1775_v60 = vpop.permute.xlu0 %1774 }
 0xb7d   :  { %v1820_v24 = vpack.c.bf16 %v1817_v6, %v1816_v37  ;;  %v1786_v48 = vadd.f32 %v1775_v60, %v1762_v29  ;;  %v4037_v6 = vld [vmem:[%s5152_s3 + $0x18] sm:$0xff] }
 0xb7f   :  { %1838 = vrot.lane.b32.xlu0 %v1820_v24, %s4064_s17  ;;  %3663 = vmatprep.subr.msk.bf16.mxu0 %vm420_vm1, %v1820_v24  ;;  %v1879_v9 = vsel %vm420_vm1, %v1820_v24, 0 }
 0xb80   :  { %3548 = vmatpush3.bf16.xpose.msra.mxu0 %v1879_v9  ;;  %v1809_v39 = vpop.permute.xlu1 %1808  ;;  %v1779_v3 = vpop.permute.xlu0 %1778 }
 0xb81   :  { %v1818_v61 = vadd.f32 %v1809_v39, %v1794_v4  ;;  %v1788_v16 = vadd.f32 %v1779_v3, %v1764_v7 }
 0xb83   :  { %1842 = vrot.lane.b32.xlu0 %v1820_v24, %s4065_s18 }
 0xb84   :  { %v1811_v26 = vpop.permute.xlu1 %1810 }
 0xb85   :  { %v1819_v15 = vadd.f32 %v1811_v26, %v1795_v42 }
 0xb87   :  { %v1821_v46 = vpack.c.bf16 %v1819_v15, %v1818_v61  ;;  %1846 = vrot.lane.b32.xlu0 %v1820_v24, %s4066_s19 }
 0xb88   :  { %v1777_v63 = vpop.permute.xlu1 %1776 }
 0xb89   :  { %v1787_v2 = vadd.f32 %v1777_v63, %v1763_v11  ;;  %1840 = vrot.lane.b32.xlu1 %v1821_v46, %s4064_s17  ;;  %3664 = vmatprep.subr.msk.bf16.mxu0 %vm420_vm1, %v1821_v46  ;;  %v1882_v0 = vsel %vm420_vm1, %v1821_v46, 0 }
 0xb8a   :  { %3550 = vmatpush3.bf16.xpose.msra.mxu0 %v1882_v0 }
 0xb8b   :  { %v1790_v8 = vpack.c.bf16 %v1787_v2, %v1786_v48  ;;  %1844 = vrot.lane.b32.xlu0 %v1821_v46, %s4065_s18 }
 0xb8c   :  { %v1781_v14 = vpop.permute.xlu1 %1780 }
 0xb8d   :  { %v1789_v55 = vadd.f32 %v1781_v14, %v1765_v51  ;;  %1824 = vrot.lane.b32.xlu1 %v1790_v8, %s4064_s17  ;;  %3551 = vmatprep.mubr.msk.bf16.mxu0 %vm420_vm1, %v1790_v8 }
 0xb8f   :  { %v1791_v17 = vpack.c.bf16 %v1789_v55, %v1788_v16  ;;  %1828 = vrot.lane.b32.xlu0 %v1790_v8, %s4065_s18 }
 0xb91   :  { %1826 = vrot.lane.b32.xlu1 %v1791_v17, %s4064_s17  ;;  %3552 = vmatmul.mubr.msk.bf16.vlgmr.msra.gmra.mrb[28].mxu0 %vm420_vm1, %v1791_v17 }
 0xb93   :  { %1832 = vrot.lane.b32.xlu0 %v1790_v8, %s4066_s19 }
 0xb95   :  { %1848 = vrot.lane.b32.xlu1 %v1821_v46, %s4066_s19 }
 0xb99   :  { %1830 = vrot.lane.b32.xlu1 %v1791_v17, %s4065_s18 }
 0xb9d   :  { %1834 = vrot.lane.b32.xlu1 %v1791_v17, %s4066_s19 }
 0xbf1   :  { %v1839_v62 = vpop.permute.xlu0 %1838 }
 0xbf2   :  { %v1940_v20 = vsel %vm420_vm1, %v1839_v62, 0  ;;  %3665 = vmatprep.subr.msk.bf16.mxu1 %vm420_vm1, %v1839_v62 }
 0xbf3   :  { %3556 = vmatpush3.bf16.xpose.msra.mxu1 %v1940_v20 }
 0xbf5   :  { %v1843_v23 = vpop.permute.xlu0 %1842 }
 0xbf6   :  { %v2001_v28 = vsel %vm420_vm1, %v1843_v23, 0  ;;  %3667 = vmatprep.subr.msk.bf16.mxu0 %vm420_vm1, %v1843_v23 }
 0xbf7   :  { %3564 = vmatpush3.bf16.xpose.msra.mxu0 %v2001_v28 }
 0xbf9   :  { %v1847_v27 = vpop.permute.xlu0 %1846 }
 0xbfa   :  { %v2062_v35 = vsel %vm420_vm1, %v1847_v27, 0 }
 0xbfb   :  { %v1841_v30 = vpop.permute.xlu1 %1840 }
 0xbfc   :  { %v1943_v25 = vsel %vm420_vm1, %v1841_v30, 0  ;;  %3666 = vmatprep.subr.msk.bf16.mxu1 %vm420_vm1, %v1841_v30 }
 0xbfd   :  { %v1845_v53 = vpop.permute.xlu0 %1844  ;;  %3558 = vmatpush3.bf16.xpose.msra.mxu1 %v1943_v25 }
 0xbfe   :  { %v2004_v13 = vsel %vm420_vm1, %v1845_v53, 0  ;;  %3668 = vmatprep.subr.msk.bf16.mxu0 %vm420_vm1, %v1845_v53  ;;  %3669 = vmatprep.subr.msk.bf16.mxu1 %vm420_vm1, %v1847_v27 }
 0xbff   :  { %3566 = vmatpush3.bf16.xpose.msra.mxu0 %v2004_v13  ;;  %v1825_v32 = vpop.permute.xlu1 %1824 }
 0xc00   :  { %3559 = vmatprep.mubr.msk.bf16.mxu1 %vm420_vm1, %v1825_v32  ;;  %3579 = vmatprep.subr.bf16.mxu0 %v4734_v44 }
 0xc01   :  { %v1829_v33 = vpop.permute.xlu0 %1828 }
 0xc02   :  { %3567 = vmatprep.mubr.msk.bf16.mxu0 %vm420_vm1, %v1829_v33 }
 0xc03   :  { %v1827_v21 = vpop.permute.xlu1 %1826 }
 0xc04   :  { %3560 = vmatmul.mubr.msk.bf16.vlgmr.msra.gmra.mrb[44].mxu1 %vm420_vm1, %v1827_v21 }
 0xc05   :  { %v1833_v34 = vpop.permute.xlu0 %1832  ;;  %3572 = vmatpush3.bf16.xpose.msra.mxu1 %v2062_v35 }
 0xc06   :  { %3575 = vmatprep.mubr.msk.bf16.mxu1 %vm420_vm1, %v1833_v34 }
 0xc07   :  { %v1849_v52 = vpop.permute.xlu1 %1848 }
 0xc08   :  { %3670 = vmatprep.subr.msk.bf16.mxu1 %vm420_vm1, %v1849_v52  ;;  %v2065_v54 = vsel %vm420_vm1, %v1849_v52, 0 }
 0xc0b   :  { %v1831_v36 = vpop.permute.xlu1 %1830 }
 0xc0c   :  { %3568 = vmatmul.mubr.msk.bf16.vlgmr.msra.gmra.mrb[32].mxu0 %vm420_vm1, %v1831_v36 }
 0xc0d   :  { %3580 = vmatpush3.bf16.msra.mxu0 %v4734_v44  ;;  %3574 = vmatpush3.bf16.xpose.msra.mxu1 %v2065_v54 }
 0xc0e   :  { %3581 = vmatprep.subr.bf16.mxu0 %v4732_v41 }
 0xc0f   :  { %v1835_v57 = vpop.permute.xlu1 %1834 }
 0xc11   :  { %3582 = vmatpush3.bf16.msra.mxu0 %v4732_v41 }
 0xc14   :  { %3576 = vmatmul.mubr.msk.bf16.vlgmr.msra.gmra.mrb[48].mxu1 %vm420_vm1, %v1835_v57 }
 0xc64   :  { %v3553_v40 = vpop.f32.mrb[28].mxu0 }
 0xc65   :  { %v4794_v38 = vadd.f32 %v4034_v1, %v3553_v40  ;;  %v1918_v10 = vpop.f32.mrb[29].mxu0 }
 0xc66   :  { %v3554_v59 = vpop.f32.mrb[30].mxu0  ;;  %v4799_v45 = vadd.f32 %v4035_v12, %v1918_v10 }
 0xc67   :  { %v1921_v47 = vpop.f32.mrb[31].mxu0  ;;  %v2122_v56 = vsel %vm665_vm2, %v4794_v38, -inf  ;;  %v4816_v24 = vadd.f32 %v4037_v6, %v3554_v59 }
 0xc68   :  { %v4809_v50 = vadd.f32 %v4806_v31, %v1921_v47  ;;  %2123 = vmax.xlane.f32.xlu0 %v2122_v56  ;;  %v2116_v9 = vsel %vm665_vm2, %v4799_v45, -inf }
 0xc69   :  { %v2125_v39 = vsel %vm665_vm2, %v4816_v24, -inf }
 0xc6a   :  { %v2119_v37 = vsel %vm665_vm2, %v4809_v50, -inf }
 0xc6b   :  { %2120 = vmax.xlane.f32.xlu1 %v2119_v37 }
 0xc6c   :  { %2117 = vmax.xlane.f32.xlu0 %v2116_v9 }
 0xc70   :  { %2126 = vmax.xlane.f32.xlu0 %v2125_v39 }
 0xcd7   :  { %v3561_v43 = vpop.f32.mrb[44].mxu1 }
 0xcd8   :  { %v4822_v4 = vadd.f32 %v4034_v1, %v3561_v43  ;;  %v1979_v58 = vpop.f32.mrb[45].mxu1 }
 0xcd9   :  { %v3562_v42 = vpop.f32.mrb[46].mxu1  ;;  %v4832_v48 = vadd.f32 %v4035_v12, %v1979_v58 }
 0xcda   :  { %v4824_v60 = vadd.f32 %v4037_v6, %v3562_v42  ;;  %v1982_v26 = vpop.f32.mrb[47].mxu1  ;;  %v2134_v61 = vsel %vm665_vm2, %v4822_v4, -inf }
 0xcdb   :  { %2135 = vmax.xlane.f32.xlu0 %v2134_v61  ;;  %v4839_v7 = vadd.f32 %v4806_v31, %v1982_v26  ;;  %v2128_v14 = vsel %vm665_vm2, %v4832_v48, -inf }
 0xcdc   :  { %v2137_v15 = vsel %vm665_vm2, %v4824_v60, -inf }
 0xcdd   :  { %2138 = vmax.xlane.f32.xlu1 %v2137_v15  ;;  %v2131_v62 = vsel %vm665_vm2, %v4839_v7, -inf }
 0xcdf   :  { %v3569_v29 = vpop.f32.mrb[32].mxu0 }
 0xce0   :  { %v4830_v11 = vadd.f32 %v4034_v1, %v3569_v29  ;;  %v2040_v46 = vpop.f32.mrb[33].mxu0 }
 0xce1   :  { %v3570_v63 = vpop.f32.mrb[34].mxu0  ;;  %v4843_v8 = vadd.f32 %v4035_v12, %v2040_v46 }
 0xce2   :  { %v4834_v2 = vadd.f32 %v4037_v6, %v3570_v63  ;;  %v2043_v0 = vpop.f32.mrb[35].mxu0  ;;  %v2146_v3 = vsel %vm665_vm2, %v4830_v11, -inf }
 0xce3   :  { %2147 = vmax.xlane.f32.xlu0 %v2146_v3  ;;  %v4848_v55 = vadd.f32 %v4806_v31, %v2043_v0  ;;  %v2140_v27 = vsel %vm665_vm2, %v4843_v8, -inf }
 0xce4   :  { %v2149_v51 = vsel %vm665_vm2, %v4834_v2, -inf }
 0xce5   :  { %2150 = vmax.xlane.f32.xlu1 %v2149_v51  ;;  %v2143_v30 = vsel %vm665_vm2, %v4848_v55, -inf }
 0xce7   :  { %2129 = vmax.xlane.f32.xlu0 %v2128_v14  ;;  %v3577_v16 = vpop.f32.mrb[48].mxu1 }
 0xce8   :  { %v2101_v17 = vpop.f32.mrb[49].mxu1  ;;  %v4858_v25 = vadd.f32 %v4034_v1, %v3577_v16 }
 0xce9   :  { %2132 = vmax.xlane.f32.xlu1 %v2131_v62  ;;  %v3578_v20 = vpop.f32.mrb[50].mxu1  ;;  %v4852_v23 = vadd.f32 %v4035_v12, %v2101_v17 }
 0xcea   :  { %v2104_v28 = vpop.f32.mrb[51].mxu1  ;;  %v2158_v13 = vsel %vm665_vm2, %v4858_v25, -inf  ;;  %v4872_v36 = vadd.f32 %v4037_v6, %v3578_v20 }
 0xceb   :  { %2141 = vmax.xlane.f32.xlu0 %v2140_v27  ;;  %v2152_v53 = vsel %vm665_vm2, %v4852_v23, -inf  ;;  %v4877_v57 = vadd.f32 %v4806_v31, %v2104_v28 }
 0xcec   :  { %v2161_v40 = vsel %vm665_vm2, %v4872_v36, -inf }
 0xced   :  { %2144 = vmax.xlane.f32.xlu1 %v2143_v30  ;;  %v2155_v10 = vsel %vm665_vm2, %v4877_v57, -inf }
 0xcef   :  { %2153 = vmax.xlane.f32.xlu0 %v2152_v53 }
 0xcf3   :  { %2159 = vmax.xlane.f32.xlu0 %v2158_v13 }
 0xcf5   :  { %v2124_v32 = vpop.xlane.xlu0 %2123 }
 0xcf6   :  { %v2166_v33 = vsub.f32 %v4794_v38, %v2124_v32 }
 0xcf8   :  { %v2184_v35 = vmul.f32 1.442695, %v2166_v33  ;;  %v2121_v47 = vpop.xlane.xlu1 %2120 }
 0xcf9   :  { %v2118_v21 = vpop.xlane.xlu0 %2117  ;;  %v2165_v56 = vsub.f32 %v4809_v50, %v2121_v47 }
 0xcfa   :  { %v2164_v34 = vsub.f32 %v4799_v45, %v2118_v21  ;;  %3930 = vpow2.f32 %v2184_v35 }
 0xcfb   :  { %v2182_v37 = vmul.f32 1.442695, %v2165_v56 }
 0xcfc   :  { %v2180_v52 = vmul.f32 1.442695, %v2164_v34 }
 0xcfd   :  { %v2127_v12 = vpop.xlane.xlu0 %2126 }
 0xcfe   :  { %1856 = vrot.lane.b32.xlu1 %v4732_v41, %s4064_s17  ;;  %3932 = vpow2.f32 %v2180_v52  ;;  %v2167_v45 = vsub.f32 %v4816_v24, %v2127_v12 }
 0xd00   :  { %v2186_v31 = vmul.f32 1.442695, %v2167_v45 }
 0xd02   :  { %1860 = vrot.lane.b32.xlu1 %v4734_v44, %s4065_s18  ;;  %3934 = vpow2.f32 %v2186_v31 }
 0xd03   :  { %3936 = vpow2.f32 %v2182_v37 }
 0xd04   :  { %v4874_v54 = vpop.eup %3930 }
 0xd05   :  { %v2218_v1 = vsel %vm665_vm2, %v4874_v54, 0.0 }
 0xd08   :  { %v4883_v38 = vpop.eup %3932 }
 0xd09   :  { %1854 = vrot.lane.b32.xlu0 %v4734_v44, %s4064_s17  ;;  %v2212_v59 = vsel %vm665_vm2, %v4883_v38, 0.0 }
 0xd0c   :  { %v4893_v6 = vpop.eup %3934 }
 0xd0d   :  { %v2221_v9 = vsel %vm665_vm2, %v4893_v6, 0.0  ;;  %v4897_v39 = vpop.eup %3936 }
 0xd26   :  { %2162 = vmax.xlane.f32.xlu1 %v2161_v40 }
 0xd28   :  { %2219 = vadd.xlane.f32.xlu0 %v2218_v1 }
 0xd2a   :  { %2156 = vmax.xlane.f32.xlu1 %v2155_v10 }
 0xd2c   :  { %2213 = vadd.xlane.f32.xlu0 %v2212_v59 }
 0xd3b   :  { %1866 = vrot.lane.b32.xlu1 %v4734_v44, %s4066_s19  ;;  %v2215_v44 = vsel %vm665_vm2, %v4897_v39, 0.0 }
 0xd5f   :  { %2222 = vadd.xlane.f32.xlu1 %v2221_v9 }
 0xd63   :  { %2216 = vadd.xlane.f32.xlu1 %v2215_v44 }
 0xd68   :  { %v2136_v24 = vpop.xlane.xlu0 %2135 }
 0xd69   :  { %v2170_v43 = vsub.f32 %v4822_v4, %v2136_v24 }
 0xd6a   :  { %v2139_v50 = vpop.xlane.xlu1 %2138 }
 0xd6b   :  { %v2192_v58 = vmul.f32 1.442695, %v2170_v43  ;;  %v2171_v42 = vsub.f32 %v4824_v60, %v2139_v50 }
 0xd6d   :  { %3938 = vpow2.f32 %v2192_v58  ;;  %v2194_v26 = vmul.f32 1.442695, %v2171_v42 }
 0xd6f   :  { %3940 = vpow2.f32 %v2194_v26 }
 0xd70   :  { %v2148_v61 = vpop.xlane.xlu0 %2147 }
 0xd71   :  { %v2174_v15 = vsub.f32 %v4830_v11, %v2148_v61 }
 0xd72   :  { %v2151_v29 = vpop.xlane.xlu1 %2150 }
 0xd73   :  { %v2200_v46 = vmul.f32 1.442695, %v2174_v15  ;;  %v2175_v63 = vsub.f32 %v4834_v2, %v2151_v29 }
 0xd74   :  { %v2130_v0 = vpop.xlane.xlu0 %2129 }
 0xd75   :  { %3942 = vpow2.f32 %v2200_v46  ;;  %v2202_v3 = vmul.f32 1.442695, %v2175_v63  ;;  %v2168_v51 = vsub.f32 %v4832_v48, %v2130_v0 }
 0xd76   :  { %v2133_v4 = vpop.xlane.xlu1 %2132 }
 0xd77   :  { %v4906_v14 = vpop.eup %3938  ;;  %3944 = vpow2.f32 %v2202_v3  ;;  %v2188_v60 = vmul.f32 1.442695, %v2168_v51  ;;  %v2169_v16 = vsub.f32 %v4839_v7, %v2133_v4 }
 0xd78   :  { %v2142_v17 = vpop.xlane.xlu0 %2141  ;;  %v2230_v11 = vsel %vm665_vm2, %v4906_v14, 0.0 }
 0xd79   :  { %v4911_v62 = vpop.eup %3940  ;;  %3946 = vpow2.f32 %v2188_v60  ;;  %v2190_v2 = vmul.f32 1.442695, %v2169_v16  ;;  %v2172_v20 = vsub.f32 %v4843_v8, %v2142_v17  ;;  %2231 = vadd.xlane.f32.xlu0 %v2230_v11 }
 0xd7a   :  { %v2145_v28 = vpop.xlane.xlu1 %2144  ;;  %v2233_v48 = vsel %vm665_vm2, %v4911_v62, 0.0 }
 0xd7b   :  { %3948 = vpow2.f32 %v2190_v2  ;;  %v2196_v27 = vmul.f32 1.442695, %v2172_v20  ;;  %v2173_v30 = vsub.f32 %v4848_v55, %v2145_v28  ;;  %2234 = vadd.xlane.f32.xlu1 %v2233_v48 }
 0xd7c   :  { %v2154_v7 = vpop.xlane.xlu0 %2153 }
 0xd7d   :  { %3950 = vpow2.f32 %v2196_v27  ;;  %v2198_v53 = vmul.f32 1.442695, %v2173_v30  ;;  %v2176_v33 = vsub.f32 %v4852_v23, %v2154_v7 }
 0xd7e   :  { %v1857_v13 = vpop.permute.xlu1 %1856 }
 0xd7f   :  { %v4917_v32 = vpop.eup %3942  ;;  %3952 = vpow2.f32 %v2198_v53  ;;  %v2204_v1 = vmul.f32 1.442695, %v2176_v33 }
 0xd80   :  { %v2160_v8 = vpop.xlane.xlu0 %2159  ;;  %v2242_v21 = vsel %vm665_vm2, %v4917_v32, 0.0 }
 0xd81   :  { %v4922_v35 = vpop.eup %3944  ;;  %v2178_v34 = vsub.f32 %v4858_v25, %v2160_v8  ;;  %2243 = vadd.xlane.f32.xlu0 %v2242_v21 }
 0xd82   :  { %v4925_v55 = vpop.permute.xlu1 %1860  ;;  %v2245_v52 = vsel %vm665_vm2, %v4922_v35, 0.0 }
 0xd83   :  { %v4929_v40 = vpop.eup %3946  ;;  %v2208_v10 = vmul.f32 1.442695, %v2178_v34  ;;  %2246 = vadd.xlane.f32.xlu1 %v2245_v52  ;;  %3595 = vmatprep.subr.bf16.mxu0 %v4925_v55 }
 0xd84   :  { %v1855_v23 = vpop.permute.xlu0 %1854  ;;  %v2224_v59 = vsel %vm665_vm2, %v4929_v40, 0.0 }
 0xd85   :  { %v4934_v12 = vpop.eup %3948  ;;  %3954 = vpow2.f32 %v2208_v10  ;;  %2225 = vadd.xlane.f32.xlu0 %v2224_v59  ;;  %3587 = vmatprep.subr.bf16.mxu1 %v1855_v23 }
 0xd86   :  { %3588 = vmatpush3.bf16.msra.mxu1 %v1855_v23  ;;  %v2227_v25 = vsel %vm665_vm2, %v4934_v12, 0.0  ;;  %3956 = vpow2.f32 %v2204_v1 }
 0xd87   :  { %v4938_v45 = vpop.eup %3950  ;;  %2228 = vadd.xlane.f32.xlu1 %v2227_v25  ;;  %3589 = vmatprep.subr.bf16.mxu1 %v1857_v13 }
 0xd88   :  { %v2236_v47 = vsel %vm665_vm2, %v4938_v45, 0.0 }
 0xd89   :  { %v4942_v56 = vpop.eup %3952  ;;  %2237 = vadd.xlane.f32.xlu0 %v2236_v47 }
 0xd8a   :  { %3590 = vmatpush3.bf16.msra.mxu1 %v1857_v13  ;;  %v2239_v31 = vsel %vm665_vm2, %v4942_v56, 0.0 }
 0xd8b   :  { %2240 = vadd.xlane.f32.xlu1 %v2239_v31 }
 0xd8f   :  { %v4946_v37 = vpop.eup %3954 }
 0xd90   :  { %v2254_v9 = vsel %vm665_vm2, %v4946_v37, 0.0  ;;  %v4950_v44 = vpop.eup %3956 }
 0xd91   :  { %2255 = vadd.xlane.f32.xlu0 %v2254_v9  ;;  %v2248_v24 = vsel %vm665_vm2, %v4950_v44, 0.0 }
 0xd95   :  { %2249 = vadd.xlane.f32.xlu0 %v2248_v24 }
 0xdab   :  { %1862 = vrot.lane.b32.xlu0 %v4732_v41, %s4065_s18 }
 0xdb3   :  { %v2163_v43 = vpop.xlane.xlu1 %2162 }
 0xdb4   :  { %v2179_v50 = vsub.f32 %v4872_v36, %v2163_v43 }
 0xdb6   :  { %v2210_v58 = vmul.f32 1.442695, %v2179_v50 }
 0xdb7   :  { %v2157_v42 = vpop.xlane.xlu1 %2156 }
 0xdb8   :  { %3958 = vpow2.f32 %v2210_v58  ;;  %v2177_v26 = vsub.f32 %v4877_v57, %v2157_v42  ;;  %v2220_v57 = vpop.xlane.xlu0 %2219 }
 0xdba   :  { %v2206_v61 = vmul.f32 1.442695, %v2177_v26 }
 0xdbb   :  { %v4958_v15 = vpop.permute.xlu1 %1866 }
 0xdbc   :  { %3960 = vpow2.f32 %v2206_v61  ;;  %3603 = vmatprep.subr.bf16.mxu1 %v4958_v15  ;;  %v2214_v0 = vpop.xlane.xlu0 %2213 }
 0xdc2   :  { %v4961_v29 = vpop.eup %3958 }
 0xdc3   :  { %v2257_v46 = vsel %vm665_vm2, %v4961_v29, 0.0 }
 0xdc4   :  { %2258 = vadd.xlane.f32.xlu1 %v2257_v46 }
 0xdc6   :  { %v4965_v63 = vpop.eup %3960 }
 0xdc7   :  { %v2251_v36 = vsel %vm665_vm2, %v4965_v63, 0.0 }
 0xdc8   :  { %2252 = vadd.xlane.f32.xlu1 %v2251_v36 }
 0xdd9   :  { %1868 = vrot.lane.b32.xlu1 %v4732_v41, %s4066_s19 }
 0xdec   :  { %v2223_v3 = vpop.xlane.xlu1 %2222 }
 0xded   :  { %3962 = vrcp.f32 %v2223_v3 }
 0xdee   :  { %3964 = vrcp.f32 %v2214_v0 }
 0xdef   :  { %3966 = vrcp.f32 %v2220_v57 }
 0xdf0   :  { %v2217_v51 = vpop.xlane.xlu1 %2216 }
 0xdf1   :  { %3968 = vrcp.f32 %v2217_v51 }
 0xdf7   :  { %v3963_v4 = vpop.eup %3962 }
 0xdf8   :  { %v3965_v60 = vpop.eup %3964  ;;  %v2279_v11 = vmul.f32 %v3963_v4, %v4893_v6 }
 0xdf9   :  { %v3967_v16 = vpop.eup %3966  ;;  %v2276_v2 = vmul.f32 %v3965_v60, %v4883_v38 }
 0xdfa   :  { %v2278_v41 = vmul.f32 %v3967_v16, %v4874_v54 }
 0xdfb   :  { %v3969_v17 = vpop.eup %3968 }
 0xdfc   :  { %v2277_v20 = vmul.f32 %v3969_v17, %v4897_v39  ;;  %v2293_v48 = vpack.c.bf16 %v2279_v11, %v2278_v41  ;;  %v3800_v41 = vld [vmem:[%s5155_s6 + $0x30] sm:$0xff]  }
 0xdfe   :  { %v2292_v28 = vpack.c.bf16 %v2277_v20, %v2276_v2 }
 0xe00   :  { %3583 = vmatprep.mubr.msk.bf16.mxu0 %vm665_vm2, %v2292_v28 }
 0xe01   :  { %3584 = vmatmul.mubr.msk.bf16.vlgmr.msra.gmra.mrb[36].mxu0 %vm665_vm2, %v2293_v48 }
 0xe02   :  { %3596 = vmatpush3.bf16.msra.mxu0 %v4925_v55 }
 0xe06   :  { %v2232_v27 = vpop.xlane.xlu0 %2231 }
 0xe08   :  { %v2235_v30 = vpop.xlane.xlu1 %2234 }
 0xe09   :  { %3970 = vrcp.f32 %v2235_v30 }
 0xe0e   :  { %v2244_v7 = vpop.xlane.xlu0 %2243 }
 0xe10   :  { %v2247_v53 = vpop.xlane.xlu1 %2246 }
 0xe12   :  { %v2226_v6 = vpop.xlane.xlu0 %2225 }
 0xe13   :  { %3972 = vrcp.f32 %v2226_v6  ;;  %v3971_v13 = vpop.eup %3970  ;;  %v3801_v6 = vld [vmem:[%s5155_s6 + $0x38] sm:$0xff]  }
 0xe14   :  { %3974 = vrcp.f32 %v2232_v27  ;;  %v2229_v38 = vpop.xlane.xlu1 %2228  ;;  %v2283_v55 = vmul.f32 %v3971_v13, %v4911_v62 }
 0xe15   :  { %3976 = vrcp.f32 %v2229_v38 }
 0xe16   :  { %v2238_v39 = vpop.xlane.xlu0 %2237 }
 0xe17   :  { %3978 = vrcp.f32 %v2238_v39 }
 0xe18   :  { %3980 = vrcp.f32 %v2247_v53  ;;  %v2241_v54 = vpop.xlane.xlu1 %2240 }
 0xe19   :  { %3982 = vrcp.f32 %v2241_v54 }
 0xe1a   :  { %3984 = vrcp.f32 %v2244_v7 }
 0xe1d   :  { %v3973_v33 = vpop.eup %3972 }
 0xe1e   :  { %v3975_v8 = vpop.eup %3974  ;;  %v2256_v21 = vpop.xlane.xlu0 %2255  ;;  %v2280_v52 = vmul.f32 %v3973_v33, %v4929_v40 }
 0xe1f   :  { %v3977_v34 = vpop.eup %3976  ;;  %v2282_v23 = vmul.f32 %v3975_v8, %v4906_v14 }
 0xe20   :  { %v2281_v1 = vmul.f32 %v3977_v34, %v4934_v12 }
 0xe21   :  { %v3979_v10 = vpop.eup %3978  ;;  %v2295_v9 = vpack.c.bf16 %v2283_v55, %v2282_v23 }
 0xe22   :  { %v3981_v59 = vpop.eup %3980  ;;  %v2250_v25 = vpop.xlane.xlu0 %2249  ;;  %v2294_v47 = vpack.c.bf16 %v2281_v1, %v2280_v52  ;;  %v2284_v43 = vmul.f32 %v3979_v10, %v4938_v45 }
 0xe23   :  { %v3983_v31 = vpop.eup %3982  ;;  %v2287_v62 = vmul.f32 %v3981_v59, %v4922_v35 }
 0xe24   :  { %v3985_v24 = vpop.eup %3984  ;;  %3591 = vmatprep.mubr.msk.bf16.mxu1 %vm665_vm2, %v2294_v47  ;;  %v2285_v50 = vmul.f32 %v3983_v31, %v4942_v56 }
 0xe25   :  { %3592 = vmatmul.mubr.msk.bf16.vlgmr.msra.gmra.mrb[52].mxu1 %vm665_vm2, %v2295_v9  ;;  %v2286_v12 = vmul.f32 %v3985_v24, %v4917_v32 }
 0xe26   :  { %3604 = vmatpush3.bf16.msra.mxu1 %v4958_v15  ;;  %v1863_v40 = vpop.permute.xlu0 %1862  ;;  %v2296_v14 = vpack.c.bf16 %v2285_v50, %v2284_v43 }
 0xe27   :  { %3597 = vmatprep.subr.bf16.mxu0 %v1863_v40  ;;  %v2297_v58 = vpack.c.bf16 %v2287_v62, %v2286_v12 }
 0xe28   :  { %3598 = vmatpush3.bf16.msra.mxu0 %v1863_v40  ;;  %3599 = vmatprep.mubr.msk.bf16.mxu0 %vm665_vm2, %v2296_v14 }
 0xe2b   :  { %3600 = vmatmul.mubr.msk.bf16.vlgmr.msra.gmra.mrb[40].mxu0 %vm665_vm2, %v2297_v58 }
 0xe51   :  { %v2259_v45 = vpop.xlane.xlu1 %2258 }
 0xe52   :  { %3986 = vrcp.f32 %v2259_v45 }
 0xe53   :  { %3988 = vrcp.f32 %v2250_v25 }
 0xe54   :  { %3990 = vrcp.f32 %v2256_v21 }
 0xe55   :  { %v2253_v35 = vpop.xlane.xlu1 %2252 }
 0xe56   :  { %3992 = vrcp.f32 %v2253_v35 }
 0xe59   :  { %v1869_v56 = vpop.permute.xlu1 %1868 }
 0xe5a   :  { %3605 = vmatprep.subr.bf16.mxu1 %v1869_v56 }
 0xe5b   :  { %3606 = vmatpush3.bf16.msra.mxu1 %v1869_v56 }
 0xe5c   :  { %v3987_v42 = vpop.eup %3986 }
 0xe5d   :  { %v3989_v26 = vpop.eup %3988  ;;  %v2291_v15 = vmul.f32 %v3987_v42, %v4961_v29 }
 0xe5e   :  { %v3991_v61 = vpop.eup %3990  ;;  %v2288_v46 = vmul.f32 %v3989_v26, %v4950_v44  ;;  %v3798_v44 = vld [vmem:[%s5155_s6 + $0x20] sm:$0xff]  }
 0xe5f   :  { %v2290_v57 = vmul.f32 %v3991_v61, %v4946_v37  ;;  %v3799_v37 = vld [vmem:[%s5155_s6 + $0x28] sm:$0xff]   ;;  %3611 = vmatprep.subr.bf16.mxu0 %v3798_v44 }
 0xe60   :  { %v3993_v32 = vpop.eup %3992  ;;  %3612 = vmatpush3.bf16.msra.mxu0 %v3798_v44 }
 0xe61   :  { %v2289_v36 = vmul.f32 %v3993_v32, %v4965_v63  ;;  %v2299_v3 = vpack.c.bf16 %v2291_v15, %v2290_v57  ;;  %3613 = vmatprep.subr.bf16.mxu0 %v3799_v37 }
 0xe63   :  { %v2298_v0 = vpack.c.bf16 %v2289_v36, %v2288_v46 }
 0xe64   :  { %3614 = vmatpush3.bf16.msra.mxu0 %v3799_v37 }
 0xe65   :  { %3607 = vmatprep.mubr.msk.bf16.mxu1 %vm665_vm2, %v2298_v0  ;;  %3615 = vmatprep.subr.bf16.mxu0 %v3800_v41 }
 0xe66   :  { %3608 = vmatmul.mubr.msk.bf16.vlgmr.msra.gmra.mrb[56].mxu1 %vm665_vm2, %v2299_v3 }
 0xe67   :  { %2807 = vmatprep.mubr.bf16.mxu1 %v4062_v22 }
 0xe68   :  { %3616 = vmatpush3.bf16.msra.mxu0 %v3800_v41  ;;  %v3802_v41 = vld [vmem:[%s5157_s8 + $0x40] ss:$8 sps:$4 sm:$0xff]  }
 0xe69   :  { %3617 = vmatprep.subr.bf16.mxu0 %v3801_v6 }
 0xe6c   :  { %3618 = vmatpush3.bf16.msra.mxu0 %v3801_v6 }
 0xed4   :  { %v3585_v51 = vpop.f32.mrb[36].mxu0 }
 0xed5   :  { %v2340_v4 = vpop.f32.mrb[37].mxu0 }
 0xed6   :  { %v3586_v60 = vpop.f32.mrb[38].mxu0 }
 0xed7   :  { %v2343_v16 = vpop.f32.mrb[39].mxu0 }
 0xef8   :  { %v3593_v17 = vpop.f32.mrb[52].mxu1 }
 0xef9   :  { %v2395_v29 = vpop.f32.mrb[53].mxu1 }
 0xefa   :  { %v3594_v63 = vpop.f32.mrb[54].mxu1 }
 0xefb   :  { %v3712_v11 = vpack.i.bf16 %v3594_v63, %v3593_v17  ;;  %v2398_v2 = vpop.f32.mrb[55].mxu1 }
 0xefc   :  { %v3722_v20 = vpack.i.bf16 %v2398_v2, %v2395_v29 }
 0xefd   :  { %3713 = vrot.lane.b32.xlu1 %v3712_v11, %s4067_s14 }
 0xefe   :  { %3723 = vrot.lane.b32.xlu0 %v3722_v20, %s4067_s14  ;;  %v3601_v28 = vpop.f32.mrb[40].mxu0  ;;  %v3804_v20 = vld [vmem:[%s5157_s8 + $0x44] ss:$8 sps:$4 sm:$0xff]  }
 0xeff   :  { %v2450_v48 = vpop.f32.mrb[41].mxu0  ;;  %2775 = vmatprep.subr.bf16.mxu1 %v3804_v20 }
 0xf00   :  { %v3602_v27 = vpop.f32.mrb[42].mxu0  ;;  %2776 = vmatpush1.bf16.msra.mxu1 %v3802_v41 }
 0xf01   :  { %v3717_v30 = vpack.i.bf16 %v3602_v27, %v3601_v28  ;;  %v2453_v7 = vpop.f32.mrb[43].mxu0  ;;  %v3807_v28 = vld [vmem:[%s5157_s8 + $0x54] ss:$8 sps:$4 sm:$0xff]   ;;  %v3810_v27 = vld [vmem:[%s5157_s8 + $0x64] ss:$8 sps:$4 sm:$0xff]  }
 0xf02   :  { %v3727_v53 = vpack.i.bf16 %v2453_v7, %v2450_v48  ;;  %v3805_v48 = vld [vmem:[%s5157_s8 + $0x50] ss:$8 sps:$4 sm:$0xff]   ;;  %2777 = vmatprep.subr.bf16.mxu1 %v3807_v28 }
 0xf03   :  { %3718 = vrot.lane.b32.xlu1 %v3717_v30, %s4068_s20  ;;  %v3808_v30 = vld [vmem:[%s5157_s8 + $0x60] ss:$8 sps:$4 sm:$0xff]   ;;  %v3811_v7 = vld [vmem:[%s5157_s8 + $0x70] ss:$8 sps:$4 sm:$0xff]  }
 0xf04   :  { %3728 = vrot.lane.b32.xlu0 %v3727_v53, %s4068_s20  ;;  %2778 = vmatpush1.bf16.msra.mxu1 %v3805_v48  ;;  %v3813_v53 = vld [vmem:[%s5157_s8 + $0x74] ss:$8 sps:$4 sm:$0xff]   ;;  %s3121_s8 = sshll.u32 %s4070_s23, 4  ;;  %s3122_s8 = int_to_ptr.vmem [resolvable:$true] %s3121_s8 }
 0xf05   :  { %2779 = vmatprep.subr.bf16.mxu1 %v3810_v27  ;;  %p4043_p1 = scmp.lt.s32.totalorder %s3122_s8, %s3122_s8 }
 0xf08   :  { %2780 = vmatpush1.bf16.msra.mxu1 %v3808_v30 }
 0xf09   :  { %2781 = vmatprep.subr.bf16.mxu1 %v3813_v53 }
 0xf0c   :  { %2782 = vmatpush1.bf16.msra.mxu1 %v3811_v7 }
 0xf39   :  { %v3609_v38 = vpop.f32.mrb[56].mxu1 }
 0xf3a   :  { %v2505_v39 = vpop.f32.mrb[57].mxu1 }
 0xf3b   :  { %v3610_v54 = vpop.f32.mrb[58].mxu1 }
 0xf3c   :  { %v3737_v13 = vpack.i.bf16 %v3610_v54, %v3609_v38  ;;  %v2508_v33 = vpop.f32.mrb[59].mxu1 }
 0xf3d   :  { %v3732_v8 = vpack.i.bf16 %v2508_v33, %v2505_v39 }
 0xf3e   :  { %3738 = vrot.lane.b32.xlu1 %v3737_v13, %s4069_s24 }
 0xf3f   :  { %3733 = vrot.lane.b32.xlu0 %v3732_v8, %s4069_s24 }
 0xf6f   :  { %v3714_v21 = vpop.permute.xlu1 %3713 }
 0xf70   :  { %v3724_v34 = vpop.permute.xlu0 %3723  ;;  %v3716_v52 = vunpack.i.h.bf16 %v3714_v21  ;;  %v3715_v1 = vunpack.i.l.bf16 %v3714_v21 }
 0xf71   :  { %v3726_v23 = vunpack.i.h.bf16 %v3724_v34  ;;  %v3725_v59 = vunpack.i.l.bf16 %v3724_v34 }
 0xf72   :  { %v2571_v24 = vsel %vm420_vm1, %v3586_v60, %v3716_v52  ;;  %v2570_v43 = vsel %vm420_vm1, %v3585_v51, %v3715_v1 }
 0xf73   :  { %v2569_v62 = vsel %vm420_vm1, %v2343_v16, %v3726_v23  ;;  %v2568_v40 = vsel %vm420_vm1, %v2340_v4, %v3725_v59 }
 0xf75   :  { %v3719_v55 = vpop.permute.xlu1 %3718 }
 0xf76   :  { %v3729_v10 = vpop.permute.xlu0 %3728  ;;  %v3721_v25 = vunpack.i.h.bf16 %v3719_v55  ;;  %v3720_v47 = vunpack.i.l.bf16 %v3719_v55 }
 0xf77   :  { %v3731_v31 = vunpack.i.h.bf16 %v3729_v10  ;;  %v3730_v9 = vunpack.i.l.bf16 %v3729_v10 }
 0xf78   :  { %v2574_v45 = vsel %vm665_vm2, %v2570_v43, %v3720_v47  ;;  %v2575_v35 = vsel %vm665_vm2, %v2571_v24, %v3721_v25  ;;  %v3259_v25 = vld [vmem:[%s5156_s7 + $0x1] ss:$0 sm:$0xff] }
 0xf79   :  { %v2573_v26 = vsel %vm665_vm2, %v2569_v62, %v3731_v31  ;;  %v2572_v61 = vsel %vm665_vm2, %v2568_v40, %v3730_v9 }
 0xfb0   :  { %v3739_v50 = vpop.permute.xlu1 %3738 }
 0xfb1   :  { %v3741_v14 = vunpack.i.h.bf16 %v3739_v50  ;;  %v3740_v12 = vunpack.i.l.bf16 %v3739_v50  ;;  %v3734_v58 = vpop.permute.xlu0 %3733 }
 0xfb2   :  { %v3736_v56 = vunpack.i.h.bf16 %v3734_v58  ;;  %v3735_v42 = vunpack.i.l.bf16 %v3734_v58 }
 0xfb3   :  { %v2578_v32 = vsel %vm1126_vm3, %v2574_v45, %v3740_v12  ;;  %v2579_v15 = vsel %vm1126_vm3, %v2575_v35, %v3741_v14  ;;  %v3814_v45 = vld [vmem:[%s5158_s9 + $0x40] sm:$0xff]   ;;  %v3815_v35 = vld [vmem:[%s5158_s9 + $0x48] sm:$0xff]  }
 0xfb4   :  { %v2581_v46 = vpack.c.bf16 %v2579_v15, %v2578_v32  ;;  %v2577_v36 = vsel %vm1126_vm3, %v2573_v26, %v3736_v56  ;;  %v2576_v57 = vsel %vm1126_vm3, %v2572_v61, %v3735_v42  ;;  %3623 = vmatprep.subr.bf16.mxu0 %v3814_v45  ;;  %v3817_v56 = vld [vmem:[%s5158_s9 + $0x58] sm:$0xff]   ;;  %v3818_v42 = vld [vmem:[%s5158_s9 + $0x60] sm:$0xff]   ;;  %v3819_v26 = vld [vmem:[%s5158_s9 + $0x68] sm:$0xff]  }
 0xfb5   :  { %v2580_v0 = vpack.c.bf16 %v2577_v36, %v2576_v57  ;;  %v3820_v61 = vld [vmem:[%s5158_s9 + $0x70] sm:$0xff]   ;;  %v3821_v32 = vld [vmem:[%s5158_s9 + $0x78] sm:$0xff]  }
 0xfb7   :  { %3619 = vmatprep.mubr.msk.bf16.mxu0 %vm64_vm0, %v2580_v0 }
 0xfb8   :  { %3620 = vmatmul.mubr.msk.bf16.vlgmr.msra.gmra.mrb[44].mxu0 %vm64_vm0, %v2581_v46 }
 0xfb9   :  { %3624 = vmatpush3.bf16.msra.mxu0 %v3814_v45 }
 0xfba   :  { %3625 = vmatprep.subr.bf16.mxu0 %v3815_v35 }
 0xfbd   :  { %3626 = vmatpush3.bf16.msra.mxu0 %v3815_v35 }
0x108b   :  { %v3621_v3 = vpop.f32.mrb[44].mxu0 }
0x108c   :  { %v2655_v51 = vpop.f32.mrb[45].mxu0  ;;  %v5031_v4 = vadd.f32 %v3621_v3, %v4648_v18 }
0x108d   :  { %v5034_v60 = vadd.f32 %v2655_v51, %v4651_v49  ;;  %v3622_v16 = vpop.f32.mrb[46].mxu0 }
0x108e   :  { %v2658_v17 = vpop.f32.mrb[47].mxu0  ;;  %v5042_v37 = vadd.f32 %v3622_v16, %v4654_v19  ;;  %v2678_v49 = vmul.f32 %v5031_v4, %v5031_v4 }
0x108f   :  { %v5037_v29 = vadd.f32 %v2658_v17, %v4657_v5  ;;  %v2676_v44 = vmul.f32 %v5034_v60, %v5034_v60 }
0x1090   :  { %v2686_v5 = vsel %vm64_vm0, %v2678_v49, 0.0  ;;  %v2679_v2 = vmul.f32 %v5042_v37, %v5042_v37 }
0x1091   :  { %v2680_v63 = vsel %vm64_vm0, %v2676_v44, 0.0  ;;  %v2677_v18 = vmul.f32 %v5037_v29, %v5037_v29 }
0x1092   :  { %2681 = vadd.xlane.f32.xlu0 %v2680_v63  ;;  %v2689_v19 = vsel %vm64_vm0, %v2679_v2, 0.0 }
0x1093   :  { %v2683_v11 = vsel %vm64_vm0, %v2677_v18, 0.0 }
0x1094   :  { %2684 = vadd.xlane.f32.xlu1 %v2683_v11 }
0x1096   :  { %2687 = vadd.xlane.f32.xlu0 %v2686_v5 }
0x109a   :  { %2690 = vadd.xlane.f32.xlu0 %v2689_v19 }
0x111f   :  { %v2682_v6 = vpop.xlane.xlu0 %2681 }
0x1120   :  { %v2692_v38 = vmul.f32 0.015625, %v2682_v6 }
0x1121   :  { %v2685_v39 = vpop.xlane.xlu1 %2684 }
0x1122   :  { %v2696_v54 = vadd.f32 1e-06, %v2692_v38  ;;  %v2693_v13 = vmul.f32 0.015625, %v2685_v39 }
0x1123   :  { %v2688_v33 = vpop.xlane.xlu0 %2687 }
0x1124   :  { %3994 = vrsqrt.f32 %v2696_v54  ;;  %v2697_v8 = vadd.f32 1e-06, %v2693_v13  ;;  %v2694_v21 = vmul.f32 0.015625, %v2688_v33 }
0x1126   :  { %3996 = vrsqrt.f32 %v2697_v8  ;;  %v2698_v34 = vadd.f32 1e-06, %v2694_v21 }
0x1127   :  { %v2691_v55 = vpop.xlane.xlu0 %2690 }
0x1128   :  { %v2695_v52 = vmul.f32 0.015625, %v2691_v55  ;;  %3998 = vrsqrt.f32 %v2698_v34 }
0x112a   :  { %v2699_v1 = vadd.f32 1e-06, %v2695_v52 }
0x112c   :  { %4000 = vrsqrt.f32 %v2699_v1 }
0x112e   :  { %v3995_v10 = vpop.eup %3994 }
0x112f   :  { %v2704_v23 = vmul.f32 %v3995_v10, %v5034_v60 }
0x1130   :  { %v3997_v59 = vpop.eup %3996 }
0x1131   :  { %v2705_v47 = vmul.f32 %v3997_v59, %v5037_v29  ;;  %v2714_v31 = vmul.f32 %v3259_v25, %v2704_v23 }
0x1132   :  { %v3999_v24 = vpop.eup %3998 }
0x1133   :  { %v2715_v9 = vmul.f32 %v3259_v25, %v2705_v47  ;;  %v2706_v62 = vmul.f32 %v3999_v24, %v5031_v4 }
0x1135   :  { %v2718_v43 = vpack.c.bf16 %v2715_v9, %v2714_v31  ;;  %v2716_v12 = vmul.f32 %v3259_v25, %v2706_v62 }
0x1136   :  { %v4001_v50 = vpop.eup %4000 }
0x1137   :  { %3276 = vmatmul.mubr.msk.bf16.vlgmr.msra.gmra.mrb[60].mxu1 %vm64_vm0, %v2718_v43  ;;  %v2707_v40 = vmul.f32 %v4001_v50, %v5042_v37 }
0x1138   :  { %2817 = vmatprep.mubr.bf16.mxu1 %v4062_v22  ;;  %v3816_v22 = vld [vmem:[%s5158_s9 + $0x50] sm:$0xff]  }
0x1139   :  { %v2717_v14 = vmul.f32 %v3259_v25, %v2707_v40  ;;  %3627 = vmatprep.subr.bf16.mxu0 %v3816_v22  ;;  %v3824_v40 = vld [vmem:[%s5160_s11 + $0x10] sm:$0xff]  }
0x113a   :  { %3628 = vmatpush3.bf16.msra.mxu0 %v3816_v22 }
0x113b   :  { %v2719_v58 = vpack.c.bf16 %v2717_v14, %v2716_v12  ;;  %3629 = vmatprep.subr.bf16.mxu0 %v3817_v56  ;;  %v3825_v14 = vld [vmem:[%s5160_s11 + $0x18] sm:$0xff]  }
0x113e   :  { %3630 = vmatpush3.bf16.msra.mxu0 %v3817_v56 }
0x113f   :  { %3277 = vmatmul.mubr.msk.bf16.gmra.mrb[64].mxu1 %vm64_vm0, %v2719_v58  ;;  %3631 = vmatprep.subr.bf16.mxu0 %v3818_v42 }
0x1142   :  { %3632 = vmatpush3.bf16.msra.mxu0 %v3818_v42 }
0x1143   :  { %3633 = vmatprep.subr.bf16.mxu0 %v3819_v26 }
0x1146   :  { %3634 = vmatpush3.bf16.msra.mxu0 %v3819_v26 }
0x1147   :  { %3635 = vmatprep.subr.bf16.mxu0 %v3820_v61 }
0x114a   :  { %3636 = vmatpush3.bf16.msra.mxu0 %v3820_v61 }
0x114b   :  { %3637 = vmatprep.subr.bf16.mxu0 %v3821_v32 }
0x114e   :  { %3638 = vmatpush3.bf16.msra.mxu0 %v3821_v32 }
0x120a   :  { %v2809_v15 = vpop.f32.mrb[60].mxu1 }
0x120b   :  { %v3278_v46 = vmul.f32 -1.442695, %v2809_v15  ;;  %v2811_v36 = vpop.f32.mrb[61].mxu1 }
0x120c   :  { %v2813_v57 = vpop.f32.mrb[62].mxu1 }
0x120d   :  { %4002 = vpow2.f32 %v3278_v46  ;;  %v3279_v0 = vmul.f32 -1.442695, %v2813_v57  ;;  %v2815_v3 = vpop.f32.mrb[63].mxu1 }
0x120f   :  { %4004 = vpow2.f32 %v3279_v0 }
0x1212   :  { %v2819_v51 = vpop.f32.mrb[64].mxu1 }
0x1213   :  { %v3280_v16 = vmul.f32 -1.442695, %v2819_v51  ;;  %v2821_v17 = vpop.f32.mrb[65].mxu1 }
0x1214   :  { %v2823_v44 = vpop.f32.mrb[66].mxu1 }
0x1215   :  { %4006 = vpow2.f32 %v3280_v16  ;;  %v3281_v63 = vmul.f32 -1.442695, %v2823_v44  ;;  %v2825_v18 = vpop.f32.mrb[67].mxu1 }
0x1217   :  { %v4003_v49 = vpop.eup %4002  ;;  %4008 = vpow2.f32 %v3281_v63 }
0x1218   :  { %v2840_v11 = vadd.f32 1.0, %v4003_v49 }
0x1219   :  { %v4005_v5 = vpop.eup %4004 }
0x121a   :  { %4010 = vrcp.f32 %v2840_v11  ;;  %v2841_v2 = vadd.f32 1.0, %v4005_v5 }
0x121c   :  { %4012 = vrcp.f32 %v2841_v2 }
0x121f   :  { %v4007_v19 = vpop.eup %4006 }
0x1220   :  { %v2842_v20 = vadd.f32 1.0, %v4007_v19 }
0x1221   :  { %v4009_v41 = vpop.eup %4008 }
0x1222   :  { %4014 = vrcp.f32 %v2842_v20  ;;  %v2843_v28 = vadd.f32 1.0, %v4009_v41 }
0x1224   :  { %v4011_v48 = vpop.eup %4010  ;;  %4016 = vrcp.f32 %v2843_v28 }
0x1225   :  { %v2852_v27 = vmul.f32 %v4011_v48, %v2809_v15 }
0x1226   :  { %v4013_v30 = vpop.eup %4012 }
0x1227   :  { %v2856_v7 = vmul.f32 %v2852_v27, %v2811_v36  ;;  %v2853_v53 = vmul.f32 %v4013_v30, %v2813_v57 }
0x1229   :  { %v2857_v6 = vmul.f32 %v2853_v53, %v2815_v3  ;;  %v3306_v3 = vld [vmem:[%s5159_s10] ss:$0 sm:$0xff]  ;;  %s4038_s10 = scalar_lea.vmem %s3122_s8, 512 }
0x122a   :  { %p4039_p0 = scmp.ne.s32.totalorder %s3122_s8, %s4038_s10  ;;  %p4044_p2 = scmp.lt.s32.totalorder %s4038_s10, %s4038_s10 }
0x122b   :  { %v2860_v38 = vpack.c.bf16 %v2857_v6, %v2856_v7 }
0x122c   :  { %v4015_v39 = vpop.eup %4014  ;;  %p4045_p3 = por %p4044_p2, %p4043_p1 }
0x122d   :  { %v2854_v54 = vmul.f32 %v4015_v39, %v2819_v51  ;;  %3639 = vmatprep.mubr.bf16.mxu0 %v2860_v38 }
0x122e   :  { %v4017_v13 = vpop.eup %4016  ;;  %p4046_p4 = pnand %p4045_p3, %p4039_p0 }
0x122f   :  { %v2858_v33 = vmul.f32 %v2854_v54, %v2821_v17  ;;  %v2855_v8 = vmul.f32 %v4017_v13, %v2823_v44 }
0x1231   :  { %v2859_v21 = vmul.f32 %v2855_v8, %v2825_v18 }
0x1233   :  { %v2861_v34 = vpack.c.bf16 %v2859_v21, %v2858_v33 }
0x1235   :  { %3640 = vmatmul.mubr.bf16.vlgmr.msra.gmra.mrb[48].mxu0 %v2861_v34 }
0x1308   :  { %v3641_v55 = vpop.f32.mrb[48].mxu0 }
0x1309   :  { %v2961_v52 = vpop.f32.mrb[49].mxu0  ;;  %v2978_v1 = vadd.f32 %v3641_v55, %v5031_v4 }
0x130a   :  { %v2976_v10 = vadd.f32 %v2961_v52, %v5034_v60  ;;  %v3642_v23 = vpop.f32.mrb[50].mxu0 }
0x130b   :  { %v2964_v59 = vpop.f32.mrb[51].mxu0  ;;  %v2979_v47 = vadd.f32 %v3642_v23, %v5042_v37  ;;  %v2983_v9 = vmul.f32 %v2978_v1, %v2978_v1  ;;  %v3822_v37 = vld [vmem:[%s5160_s11] sm:$0xff]  }
0x130c   :  { %v2981_v25 = vmul.f32 %v2976_v10, %v2976_v10  ;;  %v2977_v31 = vadd.f32 %v2964_v59, %v5037_v29  ;;  %3643 = vmatprep.subr.bf16.mxu1 %v3822_v37  ;;  %v3823_v29 = vld [vmem:[%s5160_s11 + $0x8] sm:$0xff]  }
0x130d   :  { %v2984_v50 = vmul.f32 %v2979_v47, %v2979_v47  ;;  %v2991_v4 = vsel %vm64_vm0, %v2983_v9, 0.0  ;;  %3644 = vmatpush3.bf16.msra.mxu1 %v3822_v37 }
0x130e   :  { %v2982_v24 = vmul.f32 %v2977_v31, %v2977_v31  ;;  %v2985_v43 = vsel %vm64_vm0, %v2981_v25, 0.0  ;;  %3645 = vmatprep.subr.bf16.mxu1 %v3823_v29 }
0x130f   :  { %2986 = vadd.xlane.f32.xlu0 %v2985_v43  ;;  %v2994_v60 = vsel %vm64_vm0, %v2984_v50, 0.0 }
0x1310   :  { %v2988_v62 = vsel %vm64_vm0, %v2982_v24, 0.0 }
0x1311   :  { %2989 = vadd.xlane.f32.xlu1 %v2988_v62  ;;  %3646 = vmatpush3.bf16.msra.mxu1 %v3823_v29 }
0x1312   :  { %3647 = vmatprep.subr.bf16.mxu1 %v3824_v40 }
0x1313   :  { %2992 = vadd.xlane.f32.xlu0 %v2991_v4 }
0x1315   :  { %2995 = vadd.xlane.f32.xlu1 %v2994_v60  ;;  %3648 = vmatpush3.bf16.msra.mxu1 %v3824_v40 }
0x1316   :  { %3649 = vmatprep.subr.bf16.mxu1 %v3825_v14 }
0x1319   :  { %3650 = vmatpush3.bf16.msra.mxu1 %v3825_v14 }
0x139c   :  { %v2987_v12 = vpop.xlane.xlu0 %2986 }
0x139d   :  { %v2997_v58 = vmul.f32 0.015625, %v2987_v12 }
0x139e   :  { %v2990_v45 = vpop.xlane.xlu1 %2989 }
0x139f   :  { %v3001_v35 = vadd.f32 1e-06, %v2997_v58  ;;  %v2998_v22 = vmul.f32 0.015625, %v2990_v45 }
0x13a0   :  { %v2993_v56 = vpop.xlane.xlu0 %2992 }
0x13a1   :  { %4018 = vrsqrt.f32 %v3001_v35  ;;  %v3002_v42 = vadd.f32 1e-06, %v2998_v22  ;;  %v2999_v26 = vmul.f32 0.015625, %v2993_v56 }
0x13a2   :  { %v2996_v61 = vpop.xlane.xlu1 %2995 }
0x13a3   :  { %4020 = vrsqrt.f32 %v3002_v42  ;;  %v3003_v32 = vadd.f32 1e-06, %v2999_v26  ;;  %v3000_v15 = vmul.f32 0.015625, %v2996_v61 }
0x13a5   :  { %4022 = vrsqrt.f32 %v3003_v32  ;;  %v3004_v46 = vadd.f32 1e-06, %v3000_v15 }
0x13a7   :  { %4024 = vrsqrt.f32 %v3004_v46 }
0x13ab   :  { %v4019_v36 = vpop.eup %4018 }
0x13ac   :  { %v3009_v57 = vmul.f32 %v4019_v36, %v2976_v10 }
0x13ad   :  { %v4021_v0 = vpop.eup %4020 }
0x13ae   :  { %v3010_v51 = vmul.f32 %v4021_v0, %v2977_v31  ;;  %v3019_v44 = vmul.f32 %v3306_v3, %v3009_v57 }
0x13af   :  { %v4023_v16 = vpop.eup %4022 }
0x13b0   :  { %v3011_v17 = vmul.f32 %v4023_v16, %v2978_v1  ;;  %v3020_v63 = vmul.f32 %v3306_v3, %v3010_v51 }
0x13b1   :  { %v4025_v18 = vpop.eup %4024 }
0x13b2   :  { %v3012_v49 = vmul.f32 %v4025_v18, %v2979_v47  ;;  %v3023_v11 = vpack.c.bf16 %v3020_v63, %v3019_v44  ;;  %v3021_v5 = vmul.f32 %v3306_v3, %v3011_v17 }
0x13b4   :  { %v3022_v2 = vmul.f32 %v3306_v3, %v3012_v49  ;;  %3651 = vmatprep.mubr.msk.bf16.mxu1 %vm64_vm0, %v3023_v11 }
0x13b6   :  { %v3024_v19 = vpack.c.bf16 %v3022_v2, %v3021_v5 }
0x13b8   :  { %3652 = vmatmul.mubr.msk.bf16.vlgmr.msra.gmra.mrb[68].mxu1 %vm64_vm0, %v3024_v19 }
0x148b   :  { %v3653_v20 = vpop.f32.mrb[68].mxu1 }
0x148c   :  { %3114 = vst [vmem:[#allocation2 + $0x10] sm:$0xff] %v3653_v20  ;;  %v3097_v41 = vpop.f32.mrb[69].mxu1 }
0x148d   :  { %3112 = vst [vmem:[#allocation2] sm:$0xff] %v3097_v41  ;;  %v3654_v28 = vpop.f32.mrb[70].mxu1 }
0x148e   :  { %3115 = vst [vmem:[#allocation2 + $0x18] sm:$0xff] %v3654_v28  ;;  %v3100_v48 = vpop.f32.mrb[71].mxu1 }
0x148f   :  { %3113 = vst [vmem:[#allocation2 + $0x8] sm:$0xff] %v3100_v48 }
0x1490   :  { %4049 = shalt.err (!%p4046_p4)
}
0x1491   :  { %s4050_s3 = scalar_lea.hbm %s5161_s12, 512 }
0x1492   :  { %p4051_p5 = scmp.ne.s32.totalorder %s5161_s12, %s4050_s3  ;;  %p4054_p6 = scmp.lt.u32.totalorder %s4050_s3, %s5161_s12 }
0x1494   :  { %p4056_p7 = pnand %p4054_p6, %p4051_p5 }
0x1496   :  { %4059 = shalt.err (!%p4056_p7)
}
0x1497   :  { %s4071_s5 = smov 128   ;;  %s4072_s26 = smov 8  }
0x1498   :  { %3127 = dma.vmem_to_hbm [thread:$0]  %s3122_s8, 512, %s5161_s12, [#allocation3], %s4071_s5, %s4071_s5, %s4072_s26  }
0x1499   :  { %4060 = dma.done.wait [#allocation3], 512  }
0x149a   :  { %4061 = vsyncadd [#allocation3], 4294966784 }
0x149b   :  { %3131 = vsyncpa [#allocation3], 1 }

</bundles_post_ra>
